<compile_context>
chip_gen: v6e
topology: v6e:2x2x1
jax: 0.10.0
libtpu: 0.0.40
codegen_flags: <defaults>
</compile_context>

<pallas_src>
import functools

import jax
import jax.numpy as jnp
from jax.experimental import pallas as pl
from jax.experimental.pallas import tpu as pltpu

N_CLASSES = 10
IMAGE_W = 28
IMAGE_H = 28
IN_FEATURES = IMAGE_W * IMAGE_H            # 784
CAT_FEATURES = IN_FEATURES + N_CLASSES     # 794
K_PAD = 896                                # 794 -> next multiple of 128
NEG_SLOPE = 0.01                           # PyTorch LeakyReLU default
H1, H2, H3 = 1024, 512, 256


def _leaky_relu(x):
    # max(x, 0.01*x): 2 VPU ops, equivalent to where(x>0, x, 0.01x) for slope<1.
    return jnp.maximum(x, NEG_SLOPE * x)


def _round_up(x, m):
    return ((x + m - 1) // m) * m


def _choose_tile(batch, tile_b):
    """Batch tile: full (rounded) batch for small B, else a multiple of 256
    chosen so the grid has >= 2 steps (v7x megacore)."""
    b_min = _round_up(batch, 8)
    if b_min <= 256:
        return b_min
    half = _round_up((b_min + 1) // 2, 256)
    return min(_round_up(tile_b, 256), half)


def disc_kernel(x_ref, w1_ref, b1_ref, w2_ref, b2_ref, w3_ref, b3_ref,
                w4_ref, b4_ref, o_ref):
    # layer1: [x | emb[y] | 0] @ [W1 ; 0] + b1   (embedding folded into the
    # K-padded input columns; bias added here as an f32 constant block).
    h = jnp.dot(x_ref[...], w1_ref[...],
                preferred_element_type=jnp.float32) + b1_ref[...]
    h = _leaky_relu(h).astype(jnp.bfloat16)

    # layer2 (bf16 operands, f32 accumulation)
    h = jnp.dot(h, w2_ref[...],
                preferred_element_type=jnp.float32) + b2_ref[...]
    h = _leaky_relu(h).astype(jnp.bfloat16)

    # layer3
    h = jnp.dot(h, w3_ref[...],
                preferred_element_type=jnp.float32) + b3_ref[...]
    h = _leaky_relu(h).astype(jnp.bfloat16)

    # output head: (1, 256) x (tb, 256)^T -> (1, tb), lane-dense row output.
    z = jax.lax.dot_general(w4_ref[...], h, (((1,), (1,)), ((), ())),
                            preferred_element_type=jnp.float32)
    o_ref[...] = jax.nn.sigmoid(z + b4_ref[...])


def init_params(key):
    """Deterministic f32 master params (shapes from Discriminator.__init__).

    Weights are stored (in_features, out_features) so the kernel computes x @ W,
    semantically equivalent to PyTorch's x @ W_t.T."""
    ks = jax.random.split(key, 9)

    def linear(kw, kb, fan_in, fan_out):
        bound = 1.0 / jnp.sqrt(fan_in)
        w = jax.random.uniform(kw, (fan_in, fan_out), jnp.float32, -bound, bound)
        b = jax.random.uniform(kb, (fan_out,), jnp.float32, -bound, bound)
        return w, b

    emb = jax.random.normal(ks[0], (N_CLASSES, N_CLASSES), jnp.float32)
    w1, b1 = linear(ks[1], ks[2], CAT_FEATURES, H1)
    w2, b2 = linear(ks[3], ks[4], H1, H2)
    w3, b3 = linear(ks[5], ks[6], H2, H3)
    w4, b4 = linear(ks[7], ks[8], H3, 1)
    return dict(emb=emb, w1=w1, b1=b1, w2=w2, b2=b2, w3=w3, b3=b3, w4=w4, b4=b4)


@functools.partial(jax.jit, static_argnames=("tile_b",))
def discriminator_forward(x, y, p, tile_b=512):
    B = x.shape[0]
    tb = _choose_tile(B, tile_b)
    b_pad = _round_up(B, tb)

    # Fold the embedding lookup into the K-padded input: [x | emb[y] | zeros].
    x_flat = x.reshape(B, IN_FEATURES).astype(jnp.float32)
    emb_rows = p["emb"][y]                                         # (B, 10)
    xin = jnp.concatenate([x_flat, emb_rows], axis=-1)             # (B, 794)
    xin = jnp.pad(xin, ((0, b_pad - B), (0, K_PAD - CAT_FEATURES)))
    xin = xin.astype(jnp.bfloat16)                                 # (b_pad, 896)

    # bf16 weights (MXU-native); biases stay f32.  W1 zero-extended to K_PAD.
    w1 = jnp.pad(p["w1"], ((0, K_PAD - CAT_FEATURES), (0, 0))).astype(jnp.bfloat16)
    b1 = p["b1"][None, :]                                          # (1, 1024) f32
    w2 = p["w2"].astype(jnp.bfloat16)                              # (1024, 512)
    b2 = p["b2"][None, :]                                          # (1, 512)
    w3 = p["w3"].astype(jnp.bfloat16)                              # (512, 256)
    b3 = p["b3"][None, :]                                          # (1, 256)
    w4r = p["w4"].T.astype(jnp.bfloat16)                           # (1, 256)
    b4 = p["b4"][None, :]                                          # (1, 1)

    grid = (b_pad // tb,)

    def const_spec(shape):
        # Block index never changes -> single pipeline buffer is enough.
        return pl.BlockSpec(shape, lambda i: (0, 0),
                            pipeline_mode=pl.Buffered(buffer_count=1))

    flops = 2 * b_pad * (K_PAD * H1 + H1 * H2 + H2 * H3 + H3)
    bytes_accessed = (xin.size * 2
                      + (w1.size + w2.size + w3.size + w4r.size) * 2
                      + (b1.size + b2.size + b3.size + b4.size) * 4
                      + b_pad * 4)

    out = pl.pallas_call(
        disc_kernel,
        out_shape=jax.ShapeDtypeStruct((1, b_pad), jnp.float32),
        grid=grid,
        in_specs=[
            pl.BlockSpec((tb, K_PAD), lambda i: (i, 0)),   # batch tile (bf16)
            const_spec((K_PAD, H1)),                       # W1 (resident)
            const_spec((1, H1)),                           # b1
            const_spec((H1, H2)),                          # W2
            const_spec((1, H2)),                           # b2
            const_spec((H2, H3)),                          # W3
            const_spec((1, H3)),                           # b3
            const_spec((1, H3)),                           # W4 row
            const_spec((1, 1)),                            # b4
        ],
        out_specs=pl.BlockSpec((1, tb), lambda i: (0, i)),  # lane-dense row
        compiler_params=pltpu.CompilerParams(
            dimension_semantics=("parallel",),
            vmem_limit_bytes=48 * 1024 * 1024),
        cost_estimate=pl.CostEstimate(
            flops=flops, transcendentals=b_pad, bytes_accessed=bytes_accessed),
    )(xin, w1, b1, w2, b2, w3, b3, w4r, b4)

    return out[0, :B][:, None]


def reference_forward(x, y, p):
    """Pure-JAX f32 reference mirroring the PyTorch forward exactly."""
    B = x.shape[0]
    xf = x.reshape(B, IN_FEATURES).astype(jnp.float32)
    emb = p["emb"][y]
    h = jnp.concatenate([xf, emb], axis=-1)
    h = jnp.where(h @ p["w1"] + p["b1"] > 0,
                  h @ p["w1"] + p["b1"], NEG_SLOPE * (h @ p["w1"] + p["b1"]))
    h = jnp.where(h @ p["w2"] + p["b2"] > 0,
                  h @ p["w2"] + p["b2"], NEG_SLOPE * (h @ p["w2"] + p["b2"]))
    h = jnp.where(h @ p["w3"] + p["b3"] > 0,
                  h @ p["w3"] + p["b3"], NEG_SLOPE * (h @ p["w3"] + p["b3"]))
    return jax.nn.sigmoid(h @ p["w4"] + p["b4"])


if __name__ == "__main__":
    key = jax.random.PRNGKey(0)
    k_param, k_x, k_y = jax.random.split(key, 3)

    B = 8
    params = init_params(k_param)
    x = jax.random.normal(k_x, (B, 1, IMAGE_H, IMAGE_W), jnp.float32)  # NCHW, like PyTorch
    y = jax.random.randint(k_y, (B,), 0, N_CLASSES, jnp.int32)

    out = discriminator_forward(x, y, params)
    out = jax.block_until_ready(out)

    ref = reference_forward(x, y, params)
    assert out.shape == (B, 1), out.shape
    # bf16 weights/activations/embedding in the matmuls -> loosened tolerance.
    assert jnp.allclose(out, ref, rtol=2e-2, atol=2e-2), "mismatch vs reference"

    print("KERNEL_OK")
</pallas_src>

<mosaic_0001>
module attributes {stable_mosaic.version = 11 : i64} {
  func.func @disc_kernel(%arg0: i32, %arg1: memref<8x896xbf16, #tpu.memory_space<vmem>>, %arg2: memref<896x1024xbf16, #tpu.memory_space<vmem>>, %arg3: memref<1x1024xf32, #tpu.memory_space<vmem>>, %arg4: memref<1024x512xbf16, #tpu.memory_space<vmem>>, %arg5: memref<1x512xf32, #tpu.memory_space<vmem>>, %arg6: memref<512x256xbf16, #tpu.memory_space<vmem>>, %arg7: memref<1x256xf32, #tpu.memory_space<vmem>>, %arg8: memref<1x256xbf16, #tpu.memory_space<vmem>>, %arg9: memref<1x1xf32, #tpu.memory_space<vmem>>, %arg10: memref<1x8xf32, #tpu.memory_space<vmem>>) attributes {dimension_semantics = [#tpu.dimension_semantics<parallel>], iteration_bounds = array<i64: 1>, scalar_prefetch = 0 : i64, scratch_operands = 0 : i64, tpu.core_type = #tpu.core_type<tc>, window_params = [{transform_indices = @transform_0, window_bounds = array<i64: 8, 896>}, {pipeline_mode = #tpu.pipeline_mode<synchronous>, transform_indices = @transform_1, window_bounds = array<i64: 896, 1024>}, {pipeline_mode = #tpu.pipeline_mode<synchronous>, transform_indices = @transform_2, window_bounds = array<i64: 1, 1024>}, {pipeline_mode = #tpu.pipeline_mode<synchronous>, transform_indices = @transform_3, window_bounds = array<i64: 1024, 512>}, {pipeline_mode = #tpu.pipeline_mode<synchronous>, transform_indices = @transform_4, window_bounds = array<i64: 1, 512>}, {pipeline_mode = #tpu.pipeline_mode<synchronous>, transform_indices = @transform_5, window_bounds = array<i64: 512, 256>}, {pipeline_mode = #tpu.pipeline_mode<synchronous>, transform_indices = @transform_6, window_bounds = array<i64: 1, 256>}, {pipeline_mode = #tpu.pipeline_mode<synchronous>, transform_indices = @transform_7, window_bounds = array<i64: 1, 256>}, {pipeline_mode = #tpu.pipeline_mode<synchronous>, transform_indices = @transform_8, window_bounds = array<i64: 1, 1>}, {transform_indices = @transform_9, window_bounds = array<i64: 1, 8>}]} {
    %c0 = arith.constant 0 : index
    %c0_0 = arith.constant 0 : index
    %0 = vector.load %arg1[%c0, %c0_0] : memref<8x896xbf16, #tpu.memory_space<vmem>>, vector<8x896xbf16>
    %c0_1 = arith.constant 0 : index
    %c0_2 = arith.constant 0 : index
    %1 = vector.load %arg2[%c0_1, %c0_2] : memref<896x1024xbf16, #tpu.memory_space<vmem>>, vector<896x1024xbf16>
    %cst = arith.constant dense<0.000000e+00> : vector<8x1024xf32>
    %2 = tpu.matmul %0, %1, %cst {dimension_numbers = #tpu.dot_dimension_numbers<[1], [0], [0], [1], [0, 0, 1, 1], [], []>} : vector<8x896xbf16>, vector<896x1024xbf16>, vector<8x1024xf32> -> vector<8x1024xf32>
    %c0_3 = arith.constant 0 : index
    %c0_4 = arith.constant 0 : index
    %3 = vector.load %arg3[%c0_3, %c0_4] : memref<1x1024xf32, #tpu.memory_space<vmem>>, vector<1x1024xf32>
    %4 = vector.broadcast %3 : vector<1x1024xf32> to vector<8x1024xf32>
    %5 = arith.addf %2, %4 : vector<8x1024xf32>
    %cst_5 = arith.constant 0.00999999977 : f32
    %6 = vector.broadcast %cst_5 : f32 to vector<8x1024xf32>
    %7 = arith.mulf %6, %5 : vector<8x1024xf32>
    %8 = arith.maximumf %5, %7 : vector<8x1024xf32>
    %9 = arith.truncf %8 : vector<8x1024xf32> to vector<8x1024xbf16>
    %c0_6 = arith.constant 0 : index
    %c0_7 = arith.constant 0 : index
    %10 = vector.load %arg4[%c0_6, %c0_7] : memref<1024x512xbf16, #tpu.memory_space<vmem>>, vector<1024x512xbf16>
    %cst_8 = arith.constant dense<0.000000e+00> : vector<8x512xf32>
    %11 = tpu.matmul %9, %10, %cst_8 {dimension_numbers = #tpu.dot_dimension_numbers<[1], [0], [0], [1], [0, 0, 1, 1], [], []>} : vector<8x1024xbf16>, vector<1024x512xbf16>, vector<8x512xf32> -> vector<8x512xf32>
    %c0_9 = arith.constant 0 : index
    %c0_10 = arith.constant 0 : index
    %12 = vector.load %arg5[%c0_9, %c0_10] : memref<1x512xf32, #tpu.memory_space<vmem>>, vector<1x512xf32>
    %13 = vector.broadcast %12 : vector<1x512xf32> to vector<8x512xf32>
    %14 = arith.addf %11, %13 : vector<8x512xf32>
    %cst_11 = arith.constant 0.00999999977 : f32
    %15 = vector.broadcast %cst_11 : f32 to vector<8x512xf32>
    %16 = arith.mulf %15, %14 : vector<8x512xf32>
    %17 = arith.maximumf %14, %16 : vector<8x512xf32>
    %18 = arith.truncf %17 : vector<8x512xf32> to vector<8x512xbf16>
    %c0_12 = arith.constant 0 : index
    %c0_13 = arith.constant 0 : index
    %19 = vector.load %arg6[%c0_12, %c0_13] : memref<512x256xbf16, #tpu.memory_space<vmem>>, vector<512x256xbf16>
    %cst_14 = arith.constant dense<0.000000e+00> : vector<8x256xf32>
    %20 = tpu.matmul %18, %19, %cst_14 {dimension_numbers = #tpu.dot_dimension_numbers<[1], [0], [0], [1], [0, 0, 1, 1], [], []>} : vector<8x512xbf16>, vector<512x256xbf16>, vector<8x256xf32> -> vector<8x256xf32>
    %c0_15 = arith.constant 0 : index
    %c0_16 = arith.constant 0 : index
    %21 = vector.load %arg7[%c0_15, %c0_16] : memref<1x256xf32, #tpu.memory_space<vmem>>, vector<1x256xf32>
    %22 = vector.broadcast %21 : vector<1x256xf32> to vector<8x256xf32>
    %23 = arith.addf %20, %22 : vector<8x256xf32>
    %cst_17 = arith.constant 0.00999999977 : f32
    %24 = vector.broadcast %cst_17 : f32 to vector<8x256xf32>
    %25 = arith.mulf %24, %23 : vector<8x256xf32>
    %26 = arith.maximumf %23, %25 : vector<8x256xf32>
    %27 = arith.truncf %26 : vector<8x256xf32> to vector<8x256xbf16>
    %c0_18 = arith.constant 0 : index
    %c0_19 = arith.constant 0 : index
    %28 = vector.load %arg8[%c0_18, %c0_19] : memref<1x256xbf16, #tpu.memory_space<vmem>>, vector<1x256xbf16>
    %cst_20 = arith.constant dense<0.000000e+00> : vector<1x8xf32>
    %29 = tpu.matmul %28, %27, %cst_20 {dimension_numbers = #tpu.dot_dimension_numbers<[1], [1], [0], [0], [0, 0, 1, 0], [], []>} : vector<1x256xbf16>, vector<8x256xbf16>, vector<1x8xf32> -> vector<1x8xf32>
    %c0_21 = arith.constant 0 : index
    %c0_22 = arith.constant 0 : index
    %30 = vector.load %arg9[%c0_21, %c0_22] : memref<1x1xf32, #tpu.memory_space<vmem>>, vector<1x1xf32>
    %31 = vector.broadcast %30 : vector<1x1xf32> to vector<1x8xf32>
    %32 = arith.addf %29, %31 : vector<1x8xf32>
    %33 = arith.negf %32 : vector<1x8xf32>
    %34 = math.exp %33 : vector<1x8xf32>
    %cst_23 = arith.constant 1.000000e+00 : f32
    %35 = vector.broadcast %cst_23 : f32 to vector<1x8xf32>
    %36 = arith.addf %35, %34 : vector<1x8xf32>
    %37 = arith.divf %35, %36 : vector<1x8xf32>
    %c0_24 = arith.constant 0 : index
    %c0_25 = arith.constant 0 : index
    %38 = vector.load %arg10[%c0_24, %c0_25] : memref<1x8xf32, #tpu.memory_space<vmem>>, vector<1x8xf32>
    tpu.vector_store %arg10[%c0_24, %c0_25], %37 {strides = array<i32>} : memref<1x8xf32, #tpu.memory_space<vmem>>, vector<1x8xf32>,
    return
  }
  func.func @transform_0(%arg0: i32) -> (i32, i32) {
    %c0_i32 = arith.constant 0 : i32
    %c0_i32_0 = arith.constant 0 : i32
    return %arg0, %c0_i32 : i32, i32
  }
  func.func @transform_1(%arg0: i32) -> (i32, i32) {
    %c0_i32 = arith.constant 0 : i32
    %c0_i32_0 = arith.constant 0 : i32
    %c0_i32_1 = arith.constant 0 : i32
    return %c0_i32, %c0_i32_0 : i32, i32
  }
  func.func @transform_2(%arg0: i32) -> (i32, i32) {
    %c0_i32 = arith.constant 0 : i32
    %c0_i32_0 = arith.constant 0 : i32
    %c0_i32_1 = arith.constant 0 : i32
    return %c0_i32, %c0_i32_0 : i32, i32
  }
  func.func @transform_3(%arg0: i32) -> (i32, i32) {
    %c0_i32 = arith.constant 0 : i32
    %c0_i32_0 = arith.constant 0 : i32
    %c0_i32_1 = arith.constant 0 : i32
    return %c0_i32, %c0_i32_0 : i32, i32
  }
  func.func @transform_4(%arg0: i32) -> (i32, i32) {
    %c0_i32 = arith.constant 0 : i32
    %c0_i32_0 = arith.constant 0 : i32
    %c0_i32_1 = arith.constant 0 : i32
    return %c0_i32, %c0_i32_0 : i32, i32
  }
  func.func @transform_5(%arg0: i32) -> (i32, i32) {
    %c0_i32 = arith.constant 0 : i32
    %c0_i32_0 = arith.constant 0 : i32
    %c0_i32_1 = arith.constant 0 : i32
    return %c0_i32, %c0_i32_0 : i32, i32
  }
  func.func @transform_6(%arg0: i32) -> (i32, i32) {
    %c0_i32 = arith.constant 0 : i32
    %c0_i32_0 = arith.constant 0 : i32
    %c0_i32_1 = arith.constant 0 : i32
    return %c0_i32, %c0_i32_0 : i32, i32
  }
  func.func @transform_7(%arg0: i32) -> (i32, i32) {
    %c0_i32 = arith.constant 0 : i32
    %c0_i32_0 = arith.constant 0 : i32
    %c0_i32_1 = arith.constant 0 : i32
    return %c0_i32, %c0_i32_0 : i32, i32
  }
  func.func @transform_8(%arg0: i32) -> (i32, i32) {
    %c0_i32 = arith.constant 0 : i32
    %c0_i32_0 = arith.constant 0 : i32
    %c0_i32_1 = arith.constant 0 : i32
    return %c0_i32, %c0_i32_0 : i32, i32
  }
  func.func @transform_9(%arg0: i32) -> (i32, i32) {
    %c0_i32 = arith.constant 0 : i32
    %c0_i32_0 = arith.constant 0 : i32
    return %c0_i32, %arg0 : i32, i32
  }
}

</mosaic_0001>

<bundles_post_ra>
// kernel: discriminator_forward.1
= control target key start
LH: loop header
LB: loop body
LE: loop exit
PB: predicated region body
PF: predicated region fallthrough
CT: control target
= control target key end

     0   :  { %s9863_s0 = inlined_call_operand.vmem [shape: bf16[8,896], index: 0, kind: input, shape index: {}]   ;;  %s9864_s1 = inlined_call_operand.vmem [shape: bf16[896,1024], index: 1, kind: input, shape index: {}]   ;;  %s9865_s2 = inlined_call_operand.vmem [shape: f32[1,1024], index: 2, kind: input, shape index: {}]   ;;  %s9866_s3 = inlined_call_operand.vmem [shape: bf16[1024,512], index: 3, kind: input, shape index: {}]   ;;  %s9867_s4 = inlined_call_operand.vmem [shape: f32[1,512], index: 4, kind: input, shape index: {}]   ;;  %s9868_s5 = inlined_call_operand.vmem [shape: bf16[512,256], index: 5, kind: input, shape index: {}]   ;;  %s9869_s6 = inlined_call_operand.vmem [shape: f32[1,256], index: 6, kind: input, shape index: {}]   ;;  %s9870_s7 = inlined_call_operand.vmem [shape: bf16[1,256], index: 7, kind: input, shape index: {}]   ;;  %s9871_s8 = inlined_call_operand.<no memory space> [shape: f32[1,1], index: 8, kind: input, shape index: {}]   ;;  %s9872_s9 = inlined_call_operand.hbm [shape: f32[1,8], index: 9, kind: output, shape index: {}]  }
   0x1   :  { %v14_v0 = vstv %s9871_s8 }
   0x2   :  { %15 = vst [vmem:[#allocation2] sm:$0x1] %v14_v0 }
   0x3   :  { %v96_v1 = vld [vmem:[%s9864_s1 + $0x1c0] sm:$0xff]  ;;  %v7252_v9 = vmov 0   ;;  %v7401_v56 = vld [vmem:[%s9863_s0 + $0x8] sm:$0xff] }
   0x4   :  { %v100_v2 = vld [vmem:[%s9864_s1 + $0x1e0] sm:$0xff]  ;;  %6735 = vset.pattern.permute.xlu0 %v7252_v9  ;;  %v7415_v61 = vcombine.high %v7401_v56, %v7401_v56 }
   0x5   :  { %v224_v3 = vld [vmem:[%s9864_s1 + $0x5c0] sm:$0xff]  ;;  %v6019_v4 = vcombine.high %v96_v1, %v100_v2  ;;  %v6018_v6 = vcombine.low %v96_v1, %v100_v2 }
   0x6   :  { %v228_v5 = vld [vmem:[%s9864_s1 + $0x5e0] sm:$0xff]  ;;  %2868 = vmatprep.mubr.bf16.mxu1 %v7415_v61 }
   0x7   :  { %v88_v7 = vld [vmem:[%s9864_s1 + $0x180] sm:$0xff]  ;;  %v6147_v10 = vcombine.high %v224_v3, %v228_v5  ;;  %v6146_v11 = vcombine.low %v224_v3, %v228_v5  ;;  %2795 = vmatprep.subr.bf16.mxu0 %v6019_v4 }
   0x8   :  { %v92_v8 = vld [vmem:[%s9864_s1 + $0x1a0] sm:$0xff]  ;;  %2796 = vmatpush1.bf16.msra.mxu0 %v6018_v6 }
   0x9   :  { %v6011_v12 = vcombine.high %v88_v7, %v92_v8  ;;  %v216_v13 = vld [vmem:[%s9864_s1 + $0x580] sm:$0xff]  ;;  %2836 = vmatprep.subr.bf16.mxu1 %v6147_v10  ;;  %v6010_v20 = vcombine.low %v88_v7, %v92_v8 }
   0xa   :  { %v220_v14 = vld [vmem:[%s9864_s1 + $0x5a0] sm:$0xff]  ;;  %2837 = vmatpush1.bf16.msra.mxu1 %v6146_v11 }
   0xb   :  { %v80_v15 = vld [vmem:[%s9864_s1 + $0x140] sm:$0xff]  ;;  %v6139_v16 = vcombine.high %v216_v13, %v220_v14  ;;  %2797 = vmatprep.subr.bf16.mxu0 %v6011_v12  ;;  %v6138_v21 = vcombine.low %v216_v13, %v220_v14 }
   0xc   :  { %v84_v17 = vld [vmem:[%s9864_s1 + $0x160] sm:$0xff]  ;;  %2798 = vmatpush1.bf16.msra.mxu0 %v6010_v20 }
   0xd   :  { %v208_v18 = vld [vmem:[%s9864_s1 + $0x540] sm:$0xff]  ;;  %v6003_v22 = vcombine.high %v80_v15, %v84_v17  ;;  %2838 = vmatprep.subr.bf16.mxu1 %v6139_v16  ;;  %v6002_v28 = vcombine.low %v80_v15, %v84_v17 }
   0xe   :  { %v212_v19 = vld [vmem:[%s9864_s1 + $0x560] sm:$0xff]  ;;  %2839 = vmatpush1.bf16.msra.mxu1 %v6138_v21 }
   0xf   :  { %v6131_v23 = vcombine.high %v208_v18, %v212_v19  ;;  %v72_v24 = vld [vmem:[%s9864_s1 + $0x100] sm:$0xff]  ;;  %2799 = vmatprep.subr.bf16.mxu0 %v6003_v22  ;;  %v6130_v29 = vcombine.low %v208_v18, %v212_v19 }
  0x10   :  { %v76_v25 = vld [vmem:[%s9864_s1 + $0x120] sm:$0xff]  ;;  %2800 = vmatpush1.bf16.msra.mxu0 %v6002_v28 }
  0x11   :  { %v200_v26 = vld [vmem:[%s9864_s1 + $0x500] sm:$0xff]  ;;  %v5995_v30 = vcombine.high %v72_v24, %v76_v25  ;;  %2840 = vmatprep.subr.bf16.mxu1 %v6131_v23  ;;  %v5994_v36 = vcombine.low %v72_v24, %v76_v25 }
  0x12   :  { %v204_v27 = vld [vmem:[%s9864_s1 + $0x520] sm:$0xff]  ;;  %2841 = vmatpush1.bf16.msra.mxu1 %v6130_v29 }
  0x13   :  { %v6123_v31 = vcombine.high %v200_v26, %v204_v27  ;;  %v64_v32 = vld [vmem:[%s9864_s1 + $0xc0] sm:$0xff]  ;;  %2801 = vmatprep.subr.bf16.mxu0 %v5995_v30  ;;  %v6122_v37 = vcombine.low %v200_v26, %v204_v27 }
  0x14   :  { %v68_v33 = vld [vmem:[%s9864_s1 + $0xe0] sm:$0xff]  ;;  %2802 = vmatpush1.bf16.msra.mxu0 %v5994_v36 }
  0x15   :  { %v192_v34 = vld [vmem:[%s9864_s1 + $0x4c0] sm:$0xff]  ;;  %v5987_v38 = vcombine.high %v64_v32, %v68_v33  ;;  %2842 = vmatprep.subr.bf16.mxu1 %v6123_v31  ;;  %v5986_v44 = vcombine.low %v64_v32, %v68_v33 }
  0x16   :  { %v196_v35 = vld [vmem:[%s9864_s1 + $0x4e0] sm:$0xff]  ;;  %2843 = vmatpush1.bf16.msra.mxu1 %v6122_v37 }
  0x17   :  { %v6115_v39 = vcombine.high %v192_v34, %v196_v35  ;;  %v56_v40 = vld [vmem:[%s9864_s1 + $0x80] sm:$0xff]  ;;  %2803 = vmatprep.subr.bf16.mxu0 %v5987_v38  ;;  %v6114_v45 = vcombine.low %v192_v34, %v196_v35 }
  0x18   :  { %v60_v41 = vld [vmem:[%s9864_s1 + $0xa0] sm:$0xff]  ;;  %2804 = vmatpush1.bf16.msra.mxu0 %v5986_v44 }
  0x19   :  { %v184_v42 = vld [vmem:[%s9864_s1 + $0x480] sm:$0xff]  ;;  %v5979_v46 = vcombine.high %v56_v40, %v60_v41  ;;  %2844 = vmatprep.subr.bf16.mxu1 %v6115_v39  ;;  %v5978_v52 = vcombine.low %v56_v40, %v60_v41 }
  0x1a   :  { %v188_v43 = vld [vmem:[%s9864_s1 + $0x4a0] sm:$0xff]  ;;  %2845 = vmatpush1.bf16.msra.mxu1 %v6114_v45 }
  0x1b   :  { %v6107_v47 = vcombine.high %v184_v42, %v188_v43  ;;  %v48_v48 = vld [vmem:[%s9864_s1 + $0x40] sm:$0xff]  ;;  %2805 = vmatprep.subr.bf16.mxu0 %v5979_v46  ;;  %v6106_v53 = vcombine.low %v184_v42, %v188_v43 }
  0x1c   :  { %v52_v49 = vld [vmem:[%s9864_s1 + $0x60] sm:$0xff]  ;;  %2806 = vmatpush1.bf16.msra.mxu0 %v5978_v52 }
  0x1d   :  { %v176_v50 = vld [vmem:[%s9864_s1 + $0x440] sm:$0xff]  ;;  %v5971_v54 = vcombine.high %v48_v48, %v52_v49  ;;  %2846 = vmatprep.subr.bf16.mxu1 %v6107_v47  ;;  %v5970_v0 = vcombine.low %v48_v48, %v52_v49 }
  0x1e   :  { %v180_v51 = vld [vmem:[%s9864_s1 + $0x460] sm:$0xff]  ;;  %2847 = vmatpush1.bf16.msra.mxu1 %v6106_v53 }
  0x1f   :  { %v7396_v55 = vld [vmem:[%s9863_s0] sm:$0xff]  ;;  %v6099_v57 = vcombine.high %v176_v50, %v180_v51  ;;  %2807 = vmatprep.subr.bf16.mxu0 %v5971_v54  ;;  %v6098_v1 = vcombine.low %v176_v50, %v180_v51 }
  0x20   :  { %v40_v58 = vld [vmem:[%s9864_s1] sm:$0xff]  ;;  %v7411_v60 = vcombine.high %v7396_v55, %v7396_v55  ;;  %2808 = vmatpush1.bf16.msra.mxu0 %v5970_v0 }
  0x21   :  { %v44_v59 = vld [vmem:[%s9864_s1 + $0x20] sm:$0xff]  ;;  %2848 = vmatprep.subr.bf16.mxu1 %v6099_v57 }
  0x22   :  { %v168_v62 = vld [vmem:[%s9864_s1 + $0x400] sm:$0xff]  ;;  %2827 = vmatprep.mubr.bf16.mxu0 %v7411_v60  ;;  %v5963_v2 = vcombine.high %v40_v58, %v44_v59  ;;  %v5962_v8 = vcombine.low %v40_v58, %v44_v59  ;;  %2849 = vmatpush1.bf16.msra.mxu1 %v6098_v1 }
  0x23   :  { %v172_v63 = vld [vmem:[%s9864_s1 + $0x420] sm:$0xff] }
  0x24   :  { %v6091_v3 = vcombine.high %v168_v62, %v172_v63  ;;  %v160_v4 = vld [vmem:[%s9864_s1 + $0x3c0] sm:$0xff]  ;;  %2809 = vmatprep.subr.bf16.mxu0 %v5963_v2  ;;  %v6090_v10 = vcombine.low %v168_v62, %v172_v63 }
  0x25   :  { %v164_v5 = vld [vmem:[%s9864_s1 + $0x3e0] sm:$0xff]  ;;  %2810 = vmatpush1.bf16.msra.mxu0 %v5962_v8 }
  0x26   :  { %v288_v6 = vld [vmem:[%s9864_s1 + $0x7c0] sm:$0xff]  ;;  %v6083_v11 = vcombine.high %v160_v4, %v164_v5  ;;  %2850 = vmatprep.subr.bf16.mxu1 %v6091_v3  ;;  %v6082_v17 = vcombine.low %v160_v4, %v164_v5 }
  0x27   :  { %v292_v7 = vld [vmem:[%s9864_s1 + $0x7e0] sm:$0xff]  ;;  %2851 = vmatpush1.bf16.msra.mxu1 %v6090_v10 }
  0x28   :  { %v6211_v12 = vcombine.high %v288_v6, %v292_v7  ;;  %v152_v13 = vld [vmem:[%s9864_s1 + $0x380] sm:$0xff]  ;;  %2811 = vmatprep.subr.bf16.mxu0 %v6083_v11  ;;  %v6210_v18 = vcombine.low %v288_v6, %v292_v7 }
  0x29   :  { %v156_v14 = vld [vmem:[%s9864_s1 + $0x3a0] sm:$0xff]  ;;  %2812 = vmatpush2.bf16.msra.mxu0 %v6082_v17 }
  0x2a   :  { %v280_v15 = vld [vmem:[%s9864_s1 + $0x780] sm:$0xff]  ;;  %v6075_v19 = vcombine.high %v152_v13, %v156_v14  ;;  %2852 = vmatprep.subr.bf16.mxu1 %v6211_v12  ;;  %v6074_v25 = vcombine.low %v152_v13, %v156_v14 }
  0x2b   :  { %v284_v16 = vld [vmem:[%s9864_s1 + $0x7a0] sm:$0xff]  ;;  %2853 = vmatpush2.bf16.msra.mxu1 %v6210_v18 }
  0x2c   :  { %v6203_v20 = vcombine.high %v280_v15, %v284_v16  ;;  %v144_v21 = vld [vmem:[%s9864_s1 + $0x340] sm:$0xff]  ;;  %2813 = vmatprep.subr.bf16.mxu0 %v6075_v19  ;;  %v6202_v26 = vcombine.low %v280_v15, %v284_v16 }
  0x2d   :  { %v148_v22 = vld [vmem:[%s9864_s1 + $0x360] sm:$0xff]  ;;  %2814 = vmatpush2.bf16.msra.mxu0 %v6074_v25  ;;  %v7556_v25 = vld [vmem:[%s9863_s0 + $0x10] sm:$0xff] }
  0x2e   :  { %v272_v23 = vld [vmem:[%s9864_s1 + $0x740] sm:$0xff]  ;;  %v6067_v27 = vcombine.high %v144_v21, %v148_v22  ;;  %2854 = vmatprep.subr.bf16.mxu1 %v6203_v20  ;;  %v6066_v33 = vcombine.low %v144_v21, %v148_v22  ;;  %v7541_v20 = vcombine.low %v7396_v55, %v7396_v55 }
  0x2f   :  { %v276_v24 = vld [vmem:[%s9864_s1 + $0x760] sm:$0xff]  ;;  %2855 = vmatpush2.bf16.msra.mxu1 %v6202_v26 }
  0x30   :  { %v6195_v28 = vcombine.high %v272_v23, %v276_v24  ;;  %v136_v29 = vld [vmem:[%s9864_s1 + $0x300] sm:$0xff]  ;;  %2815 = vmatprep.subr.bf16.mxu0 %v6067_v27  ;;  %v6194_v34 = vcombine.low %v272_v23, %v276_v24  ;;  %v7551_v23 = vcombine.low %v7401_v56, %v7401_v56 }
  0x31   :  { %v140_v30 = vld [vmem:[%s9864_s1 + $0x320] sm:$0xff]  ;;  %2816 = vmatpush2.bf16.msra.mxu0 %v6066_v33 }
  0x32   :  { %v264_v31 = vld [vmem:[%s9864_s1 + $0x700] sm:$0xff]  ;;  %v6059_v35 = vcombine.high %v136_v29, %v140_v30  ;;  %2856 = vmatprep.subr.bf16.mxu1 %v6195_v28  ;;  %v6058_v41 = vcombine.low %v136_v29, %v140_v30 }
  0x33   :  { %v268_v32 = vld [vmem:[%s9864_s1 + $0x720] sm:$0xff]  ;;  %2857 = vmatpush2.bf16.msra.mxu1 %v6194_v34 }
  0x34   :  { %v6187_v36 = vcombine.high %v264_v31, %v268_v32  ;;  %v128_v37 = vld [vmem:[%s9864_s1 + $0x2c0] sm:$0xff]  ;;  %2817 = vmatprep.subr.bf16.mxu0 %v6059_v35  ;;  %v6186_v42 = vcombine.low %v264_v31, %v268_v32  ;;  %v7573_v31 = vcombine.high %v7556_v25, %v7556_v25 }
  0x35   :  { %v132_v38 = vld [vmem:[%s9864_s1 + $0x2e0] sm:$0xff]  ;;  %2818 = vmatpush2.bf16.msra.mxu0 %v6058_v41 }
  0x36   :  { %v256_v39 = vld [vmem:[%s9864_s1 + $0x6c0] sm:$0xff]  ;;  %v6051_v43 = vcombine.high %v128_v37, %v132_v38  ;;  %2858 = vmatprep.subr.bf16.mxu1 %v6187_v36  ;;  %v6050_v49 = vcombine.low %v128_v37, %v132_v38 }
  0x37   :  { %v260_v40 = vld [vmem:[%s9864_s1 + $0x6e0] sm:$0xff]  ;;  %2859 = vmatpush2.bf16.msra.mxu1 %v6186_v42 }
  0x38   :  { %v6179_v44 = vcombine.high %v256_v39, %v260_v40  ;;  %v120_v45 = vld [vmem:[%s9864_s1 + $0x280] sm:$0xff]  ;;  %2819 = vmatprep.subr.bf16.mxu0 %v6051_v43  ;;  %v6178_v50 = vcombine.low %v256_v39, %v260_v40 }
  0x39   :  { %v124_v46 = vld [vmem:[%s9864_s1 + $0x2a0] sm:$0xff]  ;;  %2820 = vmatpush2.bf16.msra.mxu0 %v6050_v49 }
  0x3a   :  { %v248_v47 = vld [vmem:[%s9864_s1 + $0x680] sm:$0xff]  ;;  %v6043_v51 = vcombine.high %v120_v45, %v124_v46  ;;  %2860 = vmatprep.subr.bf16.mxu1 %v6179_v44  ;;  %v6042_v59 = vcombine.low %v120_v45, %v124_v46 }
  0x3b   :  { %v252_v48 = vld [vmem:[%s9864_s1 + $0x6a0] sm:$0xff]  ;;  %2861 = vmatpush2.bf16.msra.mxu1 %v6178_v50 }
  0x3c   :  { %v6171_v52 = vcombine.high %v248_v47, %v252_v48  ;;  %v112_v53 = vld [vmem:[%s9864_s1 + $0x240] sm:$0xff]  ;;  %2821 = vmatprep.subr.bf16.mxu0 %v6043_v51  ;;  %v6170_v62 = vcombine.low %v248_v47, %v252_v48 }
  0x3d   :  { %v116_v54 = vld [vmem:[%s9864_s1 + $0x260] sm:$0xff]  ;;  %2822 = vmatpush2.bf16.msra.mxu0 %v6042_v59 }
  0x3e   :  { %v240_v57 = vld [vmem:[%s9864_s1 + $0x640] sm:$0xff]  ;;  %v6035_v63 = vcombine.high %v112_v53, %v116_v54  ;;  %2862 = vmatprep.subr.bf16.mxu1 %v6171_v52  ;;  %v6034_v5 = vcombine.low %v112_v53, %v116_v54 }
  0x3f   :  { %v244_v58 = vld [vmem:[%s9864_s1 + $0x660] sm:$0xff]  ;;  %2863 = vmatpush2.bf16.msra.mxu1 %v6170_v62 }
  0x40   :  { %v6163_v0 = vcombine.high %v240_v57, %v244_v58  ;;  %v104_v1 = vld [vmem:[%s9864_s1 + $0x200] sm:$0xff]  ;;  %2823 = vmatprep.subr.bf16.mxu0 %v6035_v63  ;;  %v6162_v6 = vcombine.low %v240_v57, %v244_v58 }
  0x41   :  { %v108_v2 = vld [vmem:[%s9864_s1 + $0x220] sm:$0xff]  ;;  %2824 = vmatpush2.bf16.msra.mxu0 %v6034_v5 }
  0x42   :  { %v232_v3 = vld [vmem:[%s9864_s1 + $0x600] sm:$0xff]  ;;  %v6027_v7 = vcombine.high %v104_v1, %v108_v2  ;;  %2864 = vmatprep.subr.bf16.mxu1 %v6163_v0  ;;  %v6026_v14 = vcombine.low %v104_v1, %v108_v2 }
  0x43   :  { %v236_v4 = vld [vmem:[%s9864_s1 + $0x620] sm:$0xff]  ;;  %2865 = vmatpush2.bf16.msra.mxu1 %v6162_v6 }
  0x44   :  { %v6155_v8 = vcombine.high %v232_v3, %v236_v4  ;;  %v352_v10 = vld [vmem:[%s9864_s1 + $0x9c0] sm:$0xff]  ;;  %2825 = vmatprep.subr.bf16.mxu0 %v6027_v7  ;;  %v6154_v15 = vcombine.low %v232_v3, %v236_v4 }
  0x45   :  { %v356_v11 = vld [vmem:[%s9864_s1 + $0x9e0] sm:$0xff]  ;;  %2826 = vmatpush2.bf16.msra.mxu0 %v6026_v14 }
  0x46   :  { %v480_v12 = vld [vmem:[%s9864_s1 + $0xdc0] sm:$0xff]  ;;  %v6275_v16 = vcombine.high %v352_v10, %v356_v11  ;;  %2866 = vmatprep.subr.bf16.mxu1 %v6155_v8  ;;  %v6274_v24 = vcombine.low %v352_v10, %v356_v11 }
  0x47   :  { %v484_v13 = vld [vmem:[%s9864_s1 + $0xde0] sm:$0xff]  ;;  %2867 = vmatpush2.bf16.msra.mxu1 %v6154_v15 }
  0x48   :  { %v6403_v17 = vcombine.high %v480_v12, %v484_v13  ;;  %v344_v18 = vld [vmem:[%s9864_s1 + $0x980] sm:$0xff]  ;;  %2877 = vmatprep.subr.bf16.mxu0 %v6275_v16  ;;  %v6402_v55 = vcombine.low %v480_v12, %v484_v13  ;;  %2828 = vmatmul.mubr.bf16.vlgmr.msra.gmra.mxu0 %v7541_v20 }
  0x49   :  { %v348_v19 = vld [vmem:[%s9864_s1 + $0x9a0] sm:$0xff]  ;;  %2878 = vmatpush1.bf16.msra.mxu0 %v6274_v24  ;;  %2909 = vmatprep.mubr.bf16.mxu0 %v7573_v31 }
  0x4a   :  { %v472_v21 = vld [vmem:[%s9864_s1 + $0xd80] sm:$0xff]  ;;  %v6267_v26 = vcombine.high %v344_v18, %v348_v19  ;;  %2918 = vmatprep.subr.bf16.mxu1 %v6403_v17  ;;  %2869 = vmatmul.mubr.bf16.vlgmr.msra.gmra.mxu1 %v7551_v23  ;;  %v6266_v32 = vcombine.low %v344_v18, %v348_v19  ;;  %v97_v18 = vld [vmem:[%s9864_s1 + $0x1c8] sm:$0xff] }
  0x4b   :  { %v476_v22 = vld [vmem:[%s9864_s1 + $0xda0] sm:$0xff]  ;;  %2919 = vmatpush1.bf16.msra.mxu1 %v6402_v55  ;;  %2950 = vmatprep.mubr.bf16.mxu1 %v7252_v9 }
  0x4c   :  { %v336_v27 = vld [vmem:[%s9864_s1 + $0x940] sm:$0xff]  ;;  %v6395_v28 = vcombine.high %v472_v21, %v476_v22  ;;  %2879 = vmatprep.subr.bf16.mxu0 %v6267_v26  ;;  %v6394_v33 = vcombine.low %v472_v21, %v476_v22  ;;  %v101_v21 = vld [vmem:[%s9864_s1 + $0x1e8] sm:$0xff] }
  0x4d   :  { %v340_v56 = vld [vmem:[%s9864_s1 + $0x960] sm:$0xff]  ;;  %2880 = vmatpush1.bf16.msra.mxu0 %v6266_v32 }
  0x4e   :  { %v464_v29 = vld [vmem:[%s9864_s1 + $0xd40] sm:$0xff]  ;;  %v6259_v34 = vcombine.high %v336_v27, %v340_v56  ;;  %2920 = vmatprep.subr.bf16.mxu1 %v6395_v28  ;;  %v6258_v40 = vcombine.low %v336_v27, %v340_v56  ;;  %v89_v28 = vld [vmem:[%s9864_s1 + $0x188] sm:$0xff]  ;;  %v6740_v56 = vld [vmem:[%s9863_s0 + $0x18] ss:$0 sps:$4 sm:$0xff]  }
  0x4f   :  { %v468_v30 = vld [vmem:[%s9864_s1 + $0xd60] sm:$0xff]  ;;  %2921 = vmatpush1.bf16.msra.mxu1 %v6394_v33  ;;  %v6020_v33 = vcombine.low %v97_v18, %v101_v21 }
  0x50   :  { %v328_v35 = vld [vmem:[%s9864_s1 + $0x900] sm:$0xff]  ;;  %v6387_v38 = vcombine.high %v464_v29, %v468_v30  ;;  %2881 = vmatprep.subr.bf16.mxu0 %v6259_v34  ;;  %v6386_v41 = vcombine.low %v464_v29, %v468_v30  ;;  %v6021_v29 = vcombine.high %v97_v18, %v101_v21  ;;  %v93_v30 = vld [vmem:[%s9864_s1 + $0x1a8] sm:$0xff] }
  0x51   :  { %v332_v36 = vld [vmem:[%s9864_s1 + $0x920] sm:$0xff]  ;;  %2882 = vmatpush1.bf16.msra.mxu0 %v6258_v40  ;;  %v41_v18 = vld [vmem:[%s9864_s1 + $0x8] sm:$0xff] }
  0x52   :  { %v456_v37 = vld [vmem:[%s9864_s1 + $0xd00] sm:$0xff]  ;;  %v6251_v42 = vcombine.high %v328_v35, %v332_v36  ;;  %2922 = vmatprep.subr.bf16.mxu1 %v6387_v38  ;;  %v6250_v48 = vcombine.low %v328_v35, %v332_v36  ;;  %v6013_v38 = vcombine.high %v89_v28, %v93_v30  ;;  %v45_v21 = vld [vmem:[%s9864_s1 + $0x28] sm:$0xff] }
  0x53   :  { %v460_v39 = vld [vmem:[%s9864_s1 + $0xd20] sm:$0xff]  ;;  %2923 = vmatpush1.bf16.msra.mxu1 %v6386_v41  ;;  %v6012_v41 = vcombine.low %v89_v28, %v93_v30  ;;  %v225_v28 = vld [vmem:[%s9864_s1 + $0x5c8] sm:$0xff] }
  0x54   :  { %v320_v43 = vld [vmem:[%s9864_s1 + $0x8c0] sm:$0xff]  ;;  %v6379_v46 = vcombine.high %v456_v37, %v460_v39  ;;  %2883 = vmatprep.subr.bf16.mxu0 %v6251_v42  ;;  %v6378_v49 = vcombine.low %v456_v37, %v460_v39  ;;  %v81_v37 = vld [vmem:[%s9864_s1 + $0x148] sm:$0xff] }
  0x55   :  { %v324_v44 = vld [vmem:[%s9864_s1 + $0x8e0] sm:$0xff]  ;;  %2884 = vmatpush1.bf16.msra.mxu0 %v6250_v48  ;;  %v85_v39 = vld [vmem:[%s9864_s1 + $0x168] sm:$0xff] }
  0x56   :  { %v448_v45 = vld [vmem:[%s9864_s1 + $0xcc0] sm:$0xff]  ;;  %v6243_v50 = vcombine.high %v320_v43, %v324_v44  ;;  %2924 = vmatprep.subr.bf16.mxu1 %v6379_v46  ;;  %v6242_v58 = vcombine.low %v320_v43, %v324_v44  ;;  %v6005_v46 = vcombine.high %v81_v37, %v85_v39 }
  0x57   :  { %v452_v47 = vld [vmem:[%s9864_s1 + $0xce0] sm:$0xff]  ;;  %2925 = vmatpush1.bf16.msra.mxu1 %v6378_v49  ;;  %v6004_v49 = vcombine.low %v81_v37, %v85_v39  ;;  %v7764_v39 = vcombine.low %v7556_v25, %v7556_v25  ;;  %v209_v25 = vld [vmem:[%s9864_s1 + $0x548] sm:$0xff] }
  0x58   :  { %v312_v51 = vld [vmem:[%s9864_s1 + $0x880] sm:$0xff]  ;;  %v6371_v54 = vcombine.high %v448_v45, %v452_v47  ;;  %2885 = vmatprep.subr.bf16.mxu0 %v6243_v50  ;;  %v6370_v59 = vcombine.low %v448_v45, %v452_v47  ;;  %v73_v45 = vld [vmem:[%s9864_s1 + $0x108] sm:$0xff] }
  0x59   :  { %v316_v52 = vld [vmem:[%s9864_s1 + $0x8a0] sm:$0xff]  ;;  %2886 = vmatpush1.bf16.msra.mxu0 %v6242_v58  ;;  %v77_v47 = vld [vmem:[%s9864_s1 + $0x128] sm:$0xff] }
  0x5a   :  { %v440_v53 = vld [vmem:[%s9864_s1 + $0xc80] sm:$0xff]  ;;  %v6235_v62 = vcombine.high %v312_v51, %v316_v52  ;;  %2926 = vmatprep.subr.bf16.mxu1 %v6371_v54  ;;  %v6234_v4 = vcombine.low %v312_v51, %v316_v52  ;;  %v5997_v54 = vcombine.high %v73_v45, %v77_v47 }
  0x5b   :  { %v444_v57 = vld [vmem:[%s9864_s1 + $0xca0] sm:$0xff]  ;;  %2927 = vmatpush1.bf16.msra.mxu1 %v6370_v59  ;;  %v5996_v59 = vcombine.low %v73_v45, %v77_v47 }
  0x5c   :  { %v304_v63 = vld [vmem:[%s9864_s1 + $0x840] sm:$0xff]  ;;  %v6363_v2 = vcombine.high %v440_v53, %v444_v57  ;;  %2887 = vmatprep.subr.bf16.mxu0 %v6235_v62  ;;  %v6362_v5 = vcombine.low %v440_v53, %v444_v57  ;;  %v65_v53 = vld [vmem:[%s9864_s1 + $0xc8] sm:$0xff] }
  0x5d   :  { %v308_v0 = vld [vmem:[%s9864_s1 + $0x860] sm:$0xff]  ;;  %2888 = vmatpush1.bf16.msra.mxu0 %v6234_v4  ;;  %v69_v57 = vld [vmem:[%s9864_s1 + $0xe8] sm:$0xff] }
  0x5e   :  { %v432_v1 = vld [vmem:[%s9864_s1 + $0xc40] sm:$0xff]  ;;  %v6227_v6 = vcombine.high %v304_v63, %v308_v0  ;;  %2928 = vmatprep.subr.bf16.mxu1 %v6363_v2  ;;  %v6226_v13 = vcombine.low %v304_v63, %v308_v0  ;;  %v5989_v2 = vcombine.high %v65_v53, %v69_v57 }
  0x5f   :  { %v436_v3 = vld [vmem:[%s9864_s1 + $0xc60] sm:$0xff]  ;;  %2929 = vmatpush1.bf16.msra.mxu1 %v6362_v5  ;;  %v5988_v5 = vcombine.low %v65_v53, %v69_v57 }
  0x60   :  { %v296_v7 = vld [vmem:[%s9864_s1 + $0x800] sm:$0xff]  ;;  %v6355_v11 = vcombine.high %v432_v1, %v436_v3  ;;  %2889 = vmatprep.subr.bf16.mxu0 %v6227_v6  ;;  %v6354_v14 = vcombine.low %v432_v1, %v436_v3  ;;  %v57_v1 = vld [vmem:[%s9864_s1 + $0x88] sm:$0xff] }
  0x61   :  { %v300_v8 = vld [vmem:[%s9864_s1 + $0x820] sm:$0xff]  ;;  %2890 = vmatpush1.bf16.msra.mxu0 %v6226_v13  ;;  %v61_v3 = vld [vmem:[%s9864_s1 + $0xa8] sm:$0xff] }
  0x62   :  { %v424_v10 = vld [vmem:[%s9864_s1 + $0xc00] sm:$0xff]  ;;  %v6219_v15 = vcombine.high %v296_v7, %v300_v8  ;;  %2930 = vmatprep.subr.bf16.mxu1 %v6355_v11  ;;  %v6218_v22 = vcombine.low %v296_v7, %v300_v8  ;;  %v5981_v11 = vcombine.high %v57_v1, %v61_v3 }
  0x63   :  { %v428_v12 = vld [vmem:[%s9864_s1 + $0xc20] sm:$0xff]  ;;  %2931 = vmatpush1.bf16.msra.mxu1 %v6354_v14  ;;  %v5980_v14 = vcombine.low %v57_v1, %v61_v3 }
  0x64   :  { %v416_v16 = vld [vmem:[%s9864_s1 + $0xbc0] sm:$0xff]  ;;  %v6347_v19 = vcombine.high %v424_v10, %v428_v12  ;;  %2891 = vmatprep.subr.bf16.mxu0 %v6219_v15  ;;  %v6346_v24 = vcombine.low %v424_v10, %v428_v12  ;;  %v49_v10 = vld [vmem:[%s9864_s1 + $0x48] sm:$0xff] }
  0x65   :  { %v420_v17 = vld [vmem:[%s9864_s1 + $0xbe0] sm:$0xff]  ;;  %2892 = vmatpush1.bf16.msra.mxu0 %v6218_v22  ;;  %v53_v12 = vld [vmem:[%s9864_s1 + $0x68] sm:$0xff] }
  0x66   :  { %v6339_v55 = vcombine.high %v416_v16, %v420_v17  ;;  %v408_v26 = vld [vmem:[%s9864_s1 + $0xb80] sm:$0xff]  ;;  %2932 = vmatprep.subr.bf16.mxu1 %v6347_v19  ;;  %v6338_v32 = vcombine.low %v416_v16, %v420_v17  ;;  %v5973_v19 = vcombine.high %v49_v10, %v53_v12 }
  0x67   :  { %v412_v27 = vld [vmem:[%s9864_s1 + $0xba0] sm:$0xff]  ;;  %2933 = vmatpush1.bf16.msra.mxu1 %v6346_v24  ;;  %v5972_v24 = vcombine.low %v49_v10, %v53_v12 }
  0x68   :  { %2893 = vmatprep.subr.bf16.mxu0 %v6339_v55  ;;  %v6331_v34 = vcombine.high %v408_v26, %v412_v27  ;;  %v400_v35 = vld [vmem:[%s9864_s1 + $0xb40] sm:$0xff]  ;;  %2959 = vmatprep.subr.bf16.mxu1 %v6021_v29  ;;  %v6330_v40 = vcombine.low %v408_v26, %v412_v27  ;;  %v161_v26 = vld [vmem:[%s9864_s1 + $0x3c8] sm:$0xff] }
  0x69   :  { %v404_v36 = vld [vmem:[%s9864_s1 + $0xb60] sm:$0xff]  ;;  %2894 = vmatpush2.bf16.msra.mxu0 %v6338_v32  ;;  %v165_v27 = vld [vmem:[%s9864_s1 + $0x3e8] sm:$0xff]  ;;  %v5964_v32 = vcombine.low %v41_v18, %v45_v21 }
  0x6a   :  { %2951 = vmatmul.mubr.bf16.vlgmr.msra.gmra.mxu1 %v6740_v56  ;;  %2895 = vmatprep.subr.bf16.mxu0 %v6331_v34  ;;  %v6323_v42 = vcombine.high %v400_v35, %v404_v36  ;;  %v392_v43 = vld [vmem:[%s9864_s1 + $0xb00] sm:$0xff]  ;;  %v6322_v48 = vcombine.low %v400_v35, %v404_v36  ;;  %v5965_v56 = vcombine.high %v41_v18, %v45_v21  ;;  %v229_v29 = vld [vmem:[%s9864_s1 + $0x5e8] sm:$0xff] }
  0x6b   :  { %2960 = vmatpush1.bf16.msra.mxu1 %v6020_v33  ;;  %v396_v44 = vld [vmem:[%s9864_s1 + $0xb20] sm:$0xff]  ;;  %2991 = vmatprep.mubr.bf16.mxu1 %v7411_v60  ;;  %v6149_v33 = vcombine.high %v225_v28, %v229_v29  ;;  %v153_v34 = vld [vmem:[%s9864_s1 + $0x388] sm:$0xff]  ;;  %v6085_v37 = vcombine.high %v161_v26, %v165_v27 }
  0x6c   :  { %2961 = vmatprep.subr.bf16.mxu1 %v6013_v38  ;;  %v6315_v50 = vcombine.high %v392_v43, %v396_v44  ;;  %v384_v51 = vld [vmem:[%s9864_s1 + $0xac0] sm:$0xff]  ;;  %v6314_v58 = vcombine.low %v392_v43, %v396_v44  ;;  %v157_v35 = vld [vmem:[%s9864_s1 + $0x3a8] sm:$0xff] }
  0x6d   :  { %2896 = vmatpush2.bf16.msra.mxu0 %v6330_v40  ;;  %v388_v52 = vld [vmem:[%s9864_s1 + $0xae0] sm:$0xff]  ;;  %v217_v36 = vld [vmem:[%s9864_s1 + $0x588] sm:$0xff]  ;;  %v6148_v40 = vcombine.low %v225_v28, %v229_v29  ;;  %v6077_v45 = vcombine.high %v153_v34, %v157_v35 }
  0x6e   :  { %2897 = vmatprep.subr.bf16.mxu0 %v6323_v42  ;;  %v6307_v62 = vcombine.high %v384_v51, %v388_v52  ;;  %v376_v63 = vld [vmem:[%s9864_s1 + $0xa80] sm:$0xff]  ;;  %v6306_v4 = vcombine.low %v384_v51, %v388_v52  ;;  %v221_v38 = vld [vmem:[%s9864_s1 + $0x5a8] sm:$0xff] }
  0x6f   :  { %2962 = vmatpush1.bf16.msra.mxu1 %v6012_v41  ;;  %v380_v0 = vld [vmem:[%s9864_s1 + $0xaa0] sm:$0xff]  ;;  %v6084_v41 = vcombine.low %v161_v26, %v165_v27  ;;  %v6141_v42 = vcombine.high %v217_v36, %v221_v38  ;;  %v145_v43 = vld [vmem:[%s9864_s1 + $0x348] sm:$0xff]  ;;  %v6140_v47 = vcombine.low %v217_v36, %v221_v38 }
  0x70   :  { %2963 = vmatprep.subr.bf16.mxu1 %v6005_v46  ;;  %v6299_v6 = vcombine.high %v376_v63, %v380_v0  ;;  %v368_v7 = vld [vmem:[%s9864_s1 + $0xa40] sm:$0xff]  ;;  %v6298_v13 = vcombine.low %v376_v63, %v380_v0  ;;  %v149_v44 = vld [vmem:[%s9864_s1 + $0x368] sm:$0xff] }
  0x71   :  { %2898 = vmatpush2.bf16.msra.mxu0 %v6322_v48  ;;  %v372_v8 = vld [vmem:[%s9864_s1 + $0xa60] sm:$0xff]  ;;  %v213_v46 = vld [vmem:[%s9864_s1 + $0x568] sm:$0xff]  ;;  %v6076_v48 = vcombine.low %v153_v34, %v157_v35  ;;  %v6069_v53 = vcombine.high %v145_v43, %v149_v44 }
  0x72   :  { %2899 = vmatprep.subr.bf16.mxu0 %v6315_v50  ;;  %v6291_v15 = vcombine.high %v368_v7, %v372_v8  ;;  %v360_v16 = vld [vmem:[%s9864_s1 + $0xa00] sm:$0xff]  ;;  %v6290_v22 = vcombine.low %v368_v7, %v372_v8  ;;  %v137_v50 = vld [vmem:[%s9864_s1 + $0x308] sm:$0xff]  ;;  %v6132_v57 = vcombine.low %v209_v25, %v213_v46 }
  0x73   :  { %2964 = vmatpush1.bf16.msra.mxu1 %v6004_v49  ;;  %v364_v17 = vld [vmem:[%s9864_s1 + $0xa20] sm:$0xff]  ;;  %v6133_v49 = vcombine.high %v209_v25, %v213_v46  ;;  %v141_v51 = vld [vmem:[%s9864_s1 + $0x328] sm:$0xff] }
  0x74   :  { %2965 = vmatprep.subr.bf16.mxu1 %v5997_v54  ;;  %v6283_v55 = vcombine.high %v360_v16, %v364_v17  ;;  %v6282_v30 = vcombine.low %v360_v16, %v364_v17  ;;  %v201_v52 = vld [vmem:[%s9864_s1 + $0x508] sm:$0xff]  ;;  %v6061_v1 = vcombine.high %v137_v50, %v141_v51 }
  0x75   :  { %2900 = vmatpush2.bf16.msra.mxu0 %v6314_v58  ;;  %v205_v54 = vld [vmem:[%s9864_s1 + $0x528] sm:$0xff]  ;;  %v6068_v58 = vcombine.low %v145_v43, %v149_v44 }
  0x76   :  { %2901 = vmatprep.subr.bf16.mxu0 %v6307_v62  ;;  %v129_v62 = vld [vmem:[%s9864_s1 + $0x2c8] sm:$0xff]  ;;  %v6124_v3 = vcombine.low %v201_v52, %v205_v54 }
  0x77   :  { %2966 = vmatpush1.bf16.msra.mxu1 %v5996_v59  ;;  %v6125_v59 = vcombine.high %v201_v52, %v205_v54  ;;  %v133_v63 = vld [vmem:[%s9864_s1 + $0x2e8] sm:$0xff] }
  0x78   :  { %2967 = vmatprep.subr.bf16.mxu1 %v5989_v2  ;;  %v193_v0 = vld [vmem:[%s9864_s1 + $0x4c8] sm:$0xff]  ;;  %v6053_v10 = vcombine.high %v129_v62, %v133_v63 }
  0x79   :  { %2902 = vmatpush2.bf16.msra.mxu0 %v6306_v4  ;;  %v197_v2 = vld [vmem:[%s9864_s1 + $0x4e8] sm:$0xff]  ;;  %v6060_v4 = vcombine.low %v137_v50, %v141_v51 }
  0x7a   :  { %2903 = vmatprep.subr.bf16.mxu0 %v6299_v6  ;;  %v121_v6 = vld [vmem:[%s9864_s1 + $0x288] sm:$0xff]  ;;  %v6116_v12 = vcombine.low %v193_v0, %v197_v2 }
  0x7b   :  { %2968 = vmatpush1.bf16.msra.mxu1 %v5988_v5  ;;  %v6117_v5 = vcombine.high %v193_v0, %v197_v2  ;;  %v125_v7 = vld [vmem:[%s9864_s1 + $0x2a8] sm:$0xff] }
  0x7c   :  { %2969 = vmatprep.subr.bf16.mxu1 %v5981_v11  ;;  %v185_v8 = vld [vmem:[%s9864_s1 + $0x488] sm:$0xff]  ;;  %v6045_v18 = vcombine.high %v121_v6, %v125_v7 }
  0x7d   :  { %2904 = vmatpush2.bf16.msra.mxu0 %v6298_v13  ;;  %v189_v11 = vld [vmem:[%s9864_s1 + $0x4a8] sm:$0xff]  ;;  %v6052_v13 = vcombine.low %v129_v62, %v133_v63 }
  0x7e   :  { %2905 = vmatprep.subr.bf16.mxu0 %v6291_v15  ;;  %v113_v15 = vld [vmem:[%s9864_s1 + $0x248] sm:$0xff]  ;;  %v6108_v21 = vcombine.low %v185_v8, %v189_v11 }
  0x7f   :  { %2970 = vmatpush1.bf16.msra.mxu1 %v5980_v14  ;;  %v6109_v14 = vcombine.high %v185_v8, %v189_v11  ;;  %v117_v16 = vld [vmem:[%s9864_s1 + $0x268] sm:$0xff] }
  0x80   :  { %2971 = vmatprep.subr.bf16.mxu1 %v5973_v19  ;;  %v177_v17 = vld [vmem:[%s9864_s1 + $0x448] sm:$0xff]  ;;  %v6037_v28 = vcombine.high %v113_v15, %v117_v16 }
  0x81   :  { %2906 = vmatpush2.bf16.msra.mxu0 %v6290_v22  ;;  %v181_v19 = vld [vmem:[%s9864_s1 + $0x468] sm:$0xff]  ;;  %v6044_v22 = vcombine.low %v121_v6, %v125_v7 }
  0x82   :  { %2907 = vmatprep.subr.bf16.mxu0 %v6283_v55  ;;  %v105_v55 = vld [vmem:[%s9864_s1 + $0x208] sm:$0xff]  ;;  %v6100_v29 = vcombine.low %v177_v17, %v181_v19 }
  0x83   :  { %2972 = vmatpush1.bf16.msra.mxu1 %v5972_v24  ;;  %v6101_v24 = vcombine.high %v177_v17, %v181_v19  ;;  %v109_v26 = vld [vmem:[%s9864_s1 + $0x228] sm:$0xff] }
  0x84   :  { %2973 = vmatprep.subr.bf16.mxu1 %v5965_v56  ;;  %v169_v27 = vld [vmem:[%s9864_s1 + $0x408] sm:$0xff]  ;;  %v6029_v36 = vcombine.high %v105_v55, %v109_v26 }
  0x85   :  { %2908 = vmatpush2.bf16.msra.mxu0 %v6282_v30  ;;  %v173_v56 = vld [vmem:[%s9864_s1 + $0x428] sm:$0xff]  ;;  %v6036_v30 = vcombine.low %v113_v15, %v117_v16 }
  0x86   :  { %3000 = vmatprep.subr.bf16.mxu0 %v6149_v33  ;;  %v289_v33 = vld [vmem:[%s9864_s1 + $0x7c8] sm:$0xff]  ;;  %v6092_v38 = vcombine.low %v169_v27, %v173_v56 }
  0x87   :  { %2974 = vmatpush1.bf16.msra.mxu1 %v5964_v32  ;;  %v6093_v32 = vcombine.high %v169_v27, %v173_v56  ;;  %v293_v34 = vld [vmem:[%s9864_s1 + $0x7e8] sm:$0xff] }
  0x88   :  { %2975 = vmatprep.subr.bf16.mxu1 %v6085_v37  ;;  %2910 = vmatmul.mubr.bf16.vlgmr.msra.gmra.mxu0 %v7764_v39  ;;  %v353_v35 = vld [vmem:[%s9864_s1 + $0x9c8] sm:$0xff]  ;;  %v6212_v46 = vcombine.low %v289_v33, %v293_v34 }
  0x89   :  { %3001 = vmatpush1.bf16.msra.mxu0 %v6148_v40  ;;  %3032 = vmatprep.mubr.bf16.mxu0 %v7415_v61  ;;  %v357_v37 = vld [vmem:[%s9864_s1 + $0x9e8] sm:$0xff]  ;;  %v6028_v40 = vcombine.low %v105_v55, %v109_v26 }
  0x8a   :  { %3002 = vmatprep.subr.bf16.mxu0 %v6141_v42  ;;  %v281_v42 = vld [vmem:[%s9864_s1 + $0x788] sm:$0xff] }
  0x8b   :  { %2976 = vmatpush2.bf16.msra.mxu1 %v6084_v41  ;;  %v6213_v41 = vcombine.high %v289_v33, %v293_v34  ;;  %v285_v43 = vld [vmem:[%s9864_s1 + $0x7a8] sm:$0xff] }
  0x8c   :  { %2977 = vmatprep.subr.bf16.mxu1 %v6077_v45  ;;  %v345_v44 = vld [vmem:[%s9864_s1 + $0x988] sm:$0xff]  ;;  %v6277_v45 = vcombine.high %v353_v35, %v357_v37  ;;  %v6204_v54 = vcombine.low %v281_v42, %v285_v43 }
  0x8d   :  { %3003 = vmatpush1.bf16.msra.mxu0 %v6140_v47  ;;  %v349_v25 = vld [vmem:[%s9864_s1 + $0x9a8] sm:$0xff]  ;;  %v6276_v47 = vcombine.low %v353_v35, %v357_v37 }
  0x8e   :  { %3004 = vmatprep.subr.bf16.mxu0 %v6133_v49  ;;  %v273_v49 = vld [vmem:[%s9864_s1 + $0x748] sm:$0xff]  ;;  %v6269_v52 = vcombine.high %v345_v44, %v349_v25 }
  0x8f   :  { %2978 = vmatpush2.bf16.msra.mxu1 %v6076_v48  ;;  %v6205_v48 = vcombine.high %v281_v42, %v285_v43  ;;  %v277_v50 = vld [vmem:[%s9864_s1 + $0x768] sm:$0xff] }
  0x90   :  { %2979 = vmatprep.subr.bf16.mxu1 %v6069_v53  ;;  %v337_v51 = vld [vmem:[%s9864_s1 + $0x948] sm:$0xff]  ;;  %v6196_v2 = vcombine.low %v273_v49, %v277_v50 }
  0x91   :  { %3005 = vmatpush1.bf16.msra.mxu0 %v6132_v57  ;;  %v341_v53 = vld [vmem:[%s9864_s1 + $0x968] sm:$0xff]  ;;  %v6268_v57 = vcombine.low %v345_v44, %v349_v25 }
  0x92   :  { %3006 = vmatprep.subr.bf16.mxu0 %v6125_v59  ;;  %v265_v59 = vld [vmem:[%s9864_s1 + $0x708] sm:$0xff]  ;;  %v6261_v0 = vcombine.high %v337_v51, %v341_v53 }
  0x93   :  { %2980 = vmatpush2.bf16.msra.mxu1 %v6068_v58  ;;  %v6197_v58 = vcombine.high %v273_v49, %v277_v50  ;;  %v269_v62 = vld [vmem:[%s9864_s1 + $0x728] sm:$0xff] }
  0x94   :  { %2981 = vmatprep.subr.bf16.mxu1 %v6061_v1  ;;  %v329_v63 = vld [vmem:[%s9864_s1 + $0x908] sm:$0xff]  ;;  %v6188_v11 = vcombine.low %v265_v59, %v269_v62 }
  0x95   :  { %3007 = vmatpush1.bf16.msra.mxu0 %v6124_v3  ;;  %v333_v1 = vld [vmem:[%s9864_s1 + $0x928] sm:$0xff]  ;;  %v6260_v3 = vcombine.low %v337_v51, %v341_v53 }
  0x96   :  { %3008 = vmatprep.subr.bf16.mxu0 %v6117_v5  ;;  %v257_v5 = vld [vmem:[%s9864_s1 + $0x6c8] sm:$0xff]  ;;  %v6253_v8 = vcombine.high %v329_v63, %v333_v1 }
  0x97   :  { %2982 = vmatpush2.bf16.msra.mxu1 %v6060_v4  ;;  %v6189_v4 = vcombine.high %v265_v59, %v269_v62  ;;  %v261_v6 = vld [vmem:[%s9864_s1 + $0x6e8] sm:$0xff] }
  0x98   :  { %2983 = vmatprep.subr.bf16.mxu1 %v6053_v10  ;;  %v321_v7 = vld [vmem:[%s9864_s1 + $0x8c8] sm:$0xff]  ;;  %v6180_v19 = vcombine.low %v257_v5, %v261_v6 }
  0x99   :  { %3009 = vmatpush1.bf16.msra.mxu0 %v6116_v12  ;;  %v325_v10 = vld [vmem:[%s9864_s1 + $0x8e8] sm:$0xff]  ;;  %v6252_v12 = vcombine.low %v329_v63, %v333_v1 }
  0x9a   :  { %3010 = vmatprep.subr.bf16.mxu0 %v6109_v14  ;;  %v249_v14 = vld [vmem:[%s9864_s1 + $0x688] sm:$0xff]  ;;  %v6245_v17 = vcombine.high %v321_v7, %v325_v10 }
  0x9b   :  { %2984 = vmatpush2.bf16.msra.mxu1 %v6052_v13  ;;  %v6181_v13 = vcombine.high %v257_v5, %v261_v6  ;;  %v253_v15 = vld [vmem:[%s9864_s1 + $0x6a8] sm:$0xff] }
  0x9c   :  { %2985 = vmatprep.subr.bf16.mxu1 %v6045_v18  ;;  %v313_v16 = vld [vmem:[%s9864_s1 + $0x888] sm:$0xff]  ;;  %v6172_v56 = vcombine.low %v249_v14, %v253_v15 }
  0x9d   :  { %3011 = vmatpush1.bf16.msra.mxu0 %v6108_v21  ;;  %v317_v18 = vld [vmem:[%s9864_s1 + $0x8a8] sm:$0xff]  ;;  %v6244_v21 = vcombine.low %v321_v7, %v325_v10 }
  0x9e   :  { %3012 = vmatprep.subr.bf16.mxu0 %v6101_v24  ;;  %v241_v24 = vld [vmem:[%s9864_s1 + $0x648] sm:$0xff]  ;;  %v6237_v27 = vcombine.high %v313_v16, %v317_v18 }
  0x9f   :  { %2986 = vmatpush2.bf16.msra.mxu1 %v6044_v22  ;;  %v6173_v22 = vcombine.high %v249_v14, %v253_v15  ;;  %v245_v55 = vld [vmem:[%s9864_s1 + $0x668] sm:$0xff] }
  0xa0   :  { %2987 = vmatprep.subr.bf16.mxu1 %v6037_v28  ;;  %v305_v26 = vld [vmem:[%s9864_s1 + $0x848] sm:$0xff]  ;;  %v6164_v37 = vcombine.low %v241_v24, %v245_v55 }
  0xa1   :  { %3013 = vmatpush1.bf16.msra.mxu0 %v6100_v29  ;;  %v309_v28 = vld [vmem:[%s9864_s1 + $0x868] sm:$0xff]  ;;  %v6236_v29 = vcombine.low %v313_v16, %v317_v18 }
  0xa2   :  { %3014 = vmatprep.subr.bf16.mxu0 %v6093_v32  ;;  %v233_v32 = vld [vmem:[%s9864_s1 + $0x608] sm:$0xff]  ;;  %v6229_v35 = vcombine.high %v305_v26, %v309_v28 }
  0xa3   :  { %2988 = vmatpush2.bf16.msra.mxu1 %v6036_v30  ;;  %v6165_v30 = vcombine.high %v241_v24, %v245_v55  ;;  %v237_v33 = vld [vmem:[%s9864_s1 + $0x628] sm:$0xff] }
  0xa4   :  { %2989 = vmatprep.subr.bf16.mxu1 %v6029_v36  ;;  %v297_v34 = vld [vmem:[%s9864_s1 + $0x808] sm:$0xff]  ;;  %v6156_v25 = vcombine.low %v233_v32, %v237_v33 }
  0xa5   :  { %3015 = vmatpush1.bf16.msra.mxu0 %v6092_v38  ;;  %v301_v36 = vld [vmem:[%s9864_s1 + $0x828] sm:$0xff]  ;;  %v6228_v38 = vcombine.low %v305_v26, %v309_v28 }
  0xa6   :  { %3016 = vmatprep.subr.bf16.mxu0 %v6213_v41  ;;  %v417_v41 = vld [vmem:[%s9864_s1 + $0xbc8] sm:$0xff]  ;;  %v6221_v44 = vcombine.high %v297_v34, %v301_v36 }
  0xa7   :  { %2990 = vmatpush2.bf16.msra.mxu1 %v6028_v40  ;;  %v6157_v40 = vcombine.high %v233_v32, %v237_v33  ;;  %v421_v42 = vld [vmem:[%s9864_s1 + $0xbe8] sm:$0xff] }
  0xa8   :  { %3041 = vmatprep.subr.bf16.mxu1 %v6277_v45  ;;  %v481_v43 = vld [vmem:[%s9864_s1 + $0xdc8] sm:$0xff]  ;;  %v6341_v51 = vcombine.high %v417_v41, %v421_v42 }
  0xa9   :  { %3017 = vmatpush2.bf16.msra.mxu0 %v6212_v46  ;;  %v485_v45 = vld [vmem:[%s9864_s1 + $0xde8] sm:$0xff]  ;;  %v6220_v46 = vcombine.low %v297_v34, %v301_v36 }
  0xaa   :  { %2992 = vmatmul.mubr.bf16.vlgmr.msra.gmra.mxu1 %v7541_v20  ;;  %3018 = vmatprep.subr.bf16.mxu0 %v6205_v48  ;;  %v409_v48 = vld [vmem:[%s9864_s1 + $0xb88] sm:$0xff]  ;;  %v6404_v53 = vcombine.low %v481_v43, %v485_v45 }
  0xab   :  { %3042 = vmatpush1.bf16.msra.mxu1 %v6276_v47  ;;  %3073 = vmatprep.mubr.bf16.mxu1 %v7573_v31  ;;  %v6405_v47 = vcombine.high %v481_v43, %v485_v45  ;;  %v413_v49 = vld [vmem:[%s9864_s1 + $0xba8] sm:$0xff] }
  0xac   :  { %3043 = vmatprep.subr.bf16.mxu1 %v6269_v52  ;;  %v473_v50 = vld [vmem:[%s9864_s1 + $0xd88] sm:$0xff]  ;;  %v6333_v63 = vcombine.high %v409_v48, %v413_v49 }
  0xad   :  { %3019 = vmatpush2.bf16.msra.mxu0 %v6204_v54  ;;  %v477_v52 = vld [vmem:[%s9864_s1 + $0xda8] sm:$0xff]  ;;  %v6340_v54 = vcombine.low %v417_v41, %v421_v42 }
  0xae   :  { %3020 = vmatprep.subr.bf16.mxu0 %v6197_v58  ;;  %v401_v58 = vld [vmem:[%s9864_s1 + $0xb48] sm:$0xff]  ;;  %v6396_v1 = vcombine.low %v473_v50, %v477_v52 }
  0xaf   :  { %3044 = vmatpush1.bf16.msra.mxu1 %v6268_v57  ;;  %v6397_v57 = vcombine.high %v473_v50, %v477_v52  ;;  %v405_v59 = vld [vmem:[%s9864_s1 + $0xb68] sm:$0xff] }
  0xb0   :  { %3045 = vmatprep.subr.bf16.mxu1 %v6261_v0  ;;  %v465_v62 = vld [vmem:[%s9864_s1 + $0xd48] sm:$0xff]  ;;  %v6325_v7 = vcombine.high %v401_v58, %v405_v59 }
  0xb1   :  { %3021 = vmatpush2.bf16.msra.mxu0 %v6196_v2  ;;  %v469_v0 = vld [vmem:[%s9864_s1 + $0xd68] sm:$0xff]  ;;  %v6332_v2 = vcombine.low %v409_v48, %v413_v49  ;;  %v102_v48 = vld [vmem:[%s9864_s1 + $0x1f0] sm:$0xff] }
  0xb2   :  { %3022 = vmatprep.subr.bf16.mxu0 %v6189_v4  ;;  %v393_v4 = vld [vmem:[%s9864_s1 + $0xb08] sm:$0xff]  ;;  %v6388_v10 = vcombine.low %v465_v62, %v469_v0  ;;  %v226_v49 = vld [vmem:[%s9864_s1 + $0x5d0] sm:$0xff] }
  0xb3   :  { %3046 = vmatpush1.bf16.msra.mxu1 %v6260_v3  ;;  %v6389_v3 = vcombine.high %v465_v62, %v469_v0  ;;  %v397_v5 = vld [vmem:[%s9864_s1 + $0xb28] sm:$0xff] }
  0xb4   :  { %3047 = vmatprep.subr.bf16.mxu1 %v6253_v8  ;;  %v457_v6 = vld [vmem:[%s9864_s1 + $0xd08] sm:$0xff]  ;;  %v6317_v16 = vcombine.high %v393_v4, %v397_v5 }
  0xb5   :  { %3023 = vmatpush2.bf16.msra.mxu0 %v6188_v11  ;;  %v461_v8 = vld [vmem:[%s9864_s1 + $0xd28] sm:$0xff]  ;;  %v6324_v11 = vcombine.low %v401_v58, %v405_v59  ;;  %v94_v58 = vld [vmem:[%s9864_s1 + $0x1b0] sm:$0xff] }
  0xb6   :  { %3024 = vmatprep.subr.bf16.mxu0 %v6181_v13  ;;  %v385_v13 = vld [vmem:[%s9864_s1 + $0xac8] sm:$0xff]  ;;  %v6380_v18 = vcombine.low %v457_v6, %v461_v8  ;;  %v218_v59 = vld [vmem:[%s9864_s1 + $0x590] sm:$0xff] }
  0xb7   :  { %3048 = vmatpush1.bf16.msra.mxu1 %v6252_v12  ;;  %v6381_v12 = vcombine.high %v457_v6, %v461_v8  ;;  %v389_v14 = vld [vmem:[%s9864_s1 + $0xae8] sm:$0xff]  ;;  %v210_v6 = vld [vmem:[%s9864_s1 + $0x550] sm:$0xff] }
  0xb8   :  { %3049 = vmatprep.subr.bf16.mxu1 %v6245_v17  ;;  %v449_v15 = vld [vmem:[%s9864_s1 + $0xcc8] sm:$0xff]  ;;  %v6309_v26 = vcombine.high %v385_v13, %v389_v14  ;;  %v214_v8 = vld [vmem:[%s9864_s1 + $0x570] sm:$0xff] }
  0xb9   :  { %3025 = vmatpush2.bf16.msra.mxu0 %v6180_v19  ;;  %v453_v17 = vld [vmem:[%s9864_s1 + $0xce8] sm:$0xff]  ;;  %v6316_v19 = vcombine.low %v393_v4, %v397_v5  ;;  %v86_v4 = vld [vmem:[%s9864_s1 + $0x170] sm:$0xff] }
  0xba   :  { %3026 = vmatprep.subr.bf16.mxu0 %v6173_v22  ;;  %v377_v22 = vld [vmem:[%s9864_s1 + $0xa88] sm:$0xff]  ;;  %v6372_v28 = vcombine.low %v449_v15, %v453_v17 }
  0xbb   :  { %3050 = vmatpush1.bf16.msra.mxu1 %v6244_v21  ;;  %v6373_v21 = vcombine.high %v449_v15, %v453_v17  ;;  %v381_v24 = vld [vmem:[%s9864_s1 + $0xaa8] sm:$0xff] }
  0xbc   :  { %3051 = vmatprep.subr.bf16.mxu1 %v6237_v27  ;;  %v441_v55 = vld [vmem:[%s9864_s1 + $0xc88] sm:$0xff]  ;;  %v6301_v34 = vcombine.high %v377_v22, %v381_v24 }
  0xbd   :  { %3027 = vmatpush2.bf16.msra.mxu0 %v6172_v56  ;;  %v445_v27 = vld [vmem:[%s9864_s1 + $0xca8] sm:$0xff]  ;;  %v6308_v56 = vcombine.low %v385_v13, %v389_v14 }
  0xbe   :  { %3028 = vmatprep.subr.bf16.mxu0 %v6165_v30  ;;  %v369_v30 = vld [vmem:[%s9864_s1 + $0xa48] sm:$0xff]  ;;  %v6364_v36 = vcombine.low %v441_v55, %v445_v27 }
  0xbf   :  { %3052 = vmatpush1.bf16.msra.mxu1 %v6236_v29  ;;  %v6365_v29 = vcombine.high %v441_v55, %v445_v27  ;;  %v373_v32 = vld [vmem:[%s9864_s1 + $0xa68] sm:$0xff] }
  0xc0   :  { %3053 = vmatprep.subr.bf16.mxu1 %v6229_v35  ;;  %v433_v33 = vld [vmem:[%s9864_s1 + $0xc48] sm:$0xff]  ;;  %v6293_v43 = vcombine.high %v369_v30, %v373_v32 }
  0xc1   :  { %3029 = vmatpush2.bf16.msra.mxu0 %v6164_v37  ;;  %v437_v35 = vld [vmem:[%s9864_s1 + $0xc68] sm:$0xff]  ;;  %v6300_v37 = vcombine.low %v377_v22, %v381_v24 }
  0xc2   :  { %3030 = vmatprep.subr.bf16.mxu0 %v6157_v40  ;;  %v361_v40 = vld [vmem:[%s9864_s1 + $0xa08] sm:$0xff]  ;;  %v6356_v45 = vcombine.low %v433_v33, %v437_v35 }
  0xc3   :  { %3054 = vmatpush1.bf16.msra.mxu1 %v6228_v38  ;;  %v6357_v38 = vcombine.high %v433_v33, %v437_v35  ;;  %v365_v41 = vld [vmem:[%s9864_s1 + $0xa28] sm:$0xff] }
  0xc4   :  { %3055 = vmatprep.subr.bf16.mxu1 %v6221_v44  ;;  %v425_v42 = vld [vmem:[%s9864_s1 + $0xc08] sm:$0xff]  ;;  %v6285_v50 = vcombine.high %v361_v40, %v365_v41 }
  0xc5   :  { %3031 = vmatpush2.bf16.msra.mxu0 %v6156_v25  ;;  %v429_v44 = vld [vmem:[%s9864_s1 + $0xc28] sm:$0xff]  ;;  %v6292_v25 = vcombine.low %v369_v30, %v373_v32 }
  0xc6   :  { %3082 = vmatprep.subr.bf16.mxu0 %v6405_v47  ;;  %v98_v47 = vld [vmem:[%s9864_s1 + $0x1d0] sm:$0xff]  ;;  %v6348_v52 = vcombine.low %v425_v42, %v429_v44 }
  0xc7   :  { %3056 = vmatpush1.bf16.msra.mxu1 %v6220_v46  ;;  %v6349_v46 = vcombine.high %v425_v42, %v429_v44  ;;  %v6022_v0 = vcombine.low %v98_v47, %v102_v48 }
  0xc8   :  { %3057 = vmatprep.subr.bf16.mxu1 %v6341_v51  ;;  %3033 = vmatmul.mubr.bf16.vlgmr.msra.gmra.mxu0 %v7551_v23  ;;  %v230_v51 = vld [vmem:[%s9864_s1 + $0x5f0] sm:$0xff] }
  0xc9   :  { %3083 = vmatpush1.bf16.msra.mxu0 %v6404_v53  ;;  %3114 = vmatprep.mubr.bf16.mxu0 %v7252_v9  ;;  %v6284_v53 = vcombine.low %v361_v40, %v365_v41  ;;  %v6151_v62 = vcombine.high %v226_v49, %v230_v51 }
  0xca   :  { %3084 = vmatprep.subr.bf16.mxu0 %v6397_v57  ;;  %v90_v57 = vld [vmem:[%s9864_s1 + $0x190] sm:$0xff] }
  0xcb   :  { %3058 = vmatpush2.bf16.msra.mxu1 %v6340_v54  ;;  %v6023_v54 = vcombine.high %v98_v47, %v102_v48 }
  0xcc   :  { %3059 = vmatprep.subr.bf16.mxu1 %v6333_v63  ;;  %v222_v63 = vld [vmem:[%s9864_s1 + $0x5b0] sm:$0xff] }
  0xcd   :  { %3085 = vmatpush1.bf16.msra.mxu0 %v6396_v1  ;;  %v6150_v1 = vcombine.low %v226_v49, %v230_v51  ;;  %v6143_v5 = vcombine.high %v218_v59, %v222_v63 }
  0xce   :  { %3086 = vmatprep.subr.bf16.mxu0 %v6389_v3  ;;  %v82_v3 = vld [vmem:[%s9864_s1 + $0x150] sm:$0xff] }
  0xcf   :  { %3060 = vmatpush2.bf16.msra.mxu1 %v6332_v2  ;;  %v6015_v2 = vcombine.high %v90_v57, %v94_v58 }
  0xd0   :  { %3061 = vmatprep.subr.bf16.mxu1 %v6325_v7  ;;  %v8072_v7 = vld [vmem:[%s9863_s0 + $0x18] ss:$0 sps:$4 sm:$0xff]  }
  0xd1   :  { %3087 = vmatpush1.bf16.msra.mxu0 %v6388_v10 }
  0xd2   :  { %3088 = vmatprep.subr.bf16.mxu0 %v6381_v12 }
  0xd3   :  { %3062 = vmatpush2.bf16.msra.mxu1 %v6324_v11 }
  0xd4   :  { %3063 = vmatprep.subr.bf16.mxu1 %v6317_v16 }
  0xd5   :  { %3089 = vmatpush1.bf16.msra.mxu0 %v6380_v18 }
  0xd6   :  { %3090 = vmatprep.subr.bf16.mxu0 %v6373_v21 }
  0xd7   :  { %3064 = vmatpush2.bf16.msra.mxu1 %v6316_v19 }
  0xd8   :  { %3065 = vmatprep.subr.bf16.mxu1 %v6309_v26 }
  0xd9   :  { %3091 = vmatpush1.bf16.msra.mxu0 %v6372_v28 }
  0xda   :  { %3092 = vmatprep.subr.bf16.mxu0 %v6365_v29 }
  0xdb   :  { %3066 = vmatpush2.bf16.msra.mxu1 %v6308_v56 }
  0xdc   :  { %3067 = vmatprep.subr.bf16.mxu1 %v6301_v34 }
  0xdd   :  { %3093 = vmatpush1.bf16.msra.mxu0 %v6364_v36 }
  0xde   :  { %3094 = vmatprep.subr.bf16.mxu0 %v6357_v38 }
  0xdf   :  { %3068 = vmatpush2.bf16.msra.mxu1 %v6300_v37 }
  0xe0   :  { %3069 = vmatprep.subr.bf16.mxu1 %v6293_v43 }
  0xe1   :  { %3095 = vmatpush1.bf16.msra.mxu0 %v6356_v45 }
  0xe2   :  { %3096 = vmatprep.subr.bf16.mxu0 %v6349_v46 }
  0xe3   :  { %3070 = vmatpush2.bf16.msra.mxu1 %v6292_v25 }
  0xe4   :  { %3071 = vmatprep.subr.bf16.mxu1 %v6285_v50 }
  0xe5   :  { %3097 = vmatpush1.bf16.msra.mxu0 %v6348_v52 }
  0xe6   :  { %3123 = vmatprep.subr.bf16.mxu0 %v6023_v54 }
  0xe7   :  { %3072 = vmatpush2.bf16.msra.mxu1 %v6284_v53 }
  0xe8   :  { %3164 = vmatprep.subr.bf16.mxu1 %v6151_v62  ;;  %3115 = vmatmul.mubr.bf16.vlgmr.msra.gmra.mxu0 %v8072_v7 }
  0xe9   :  { %16 = vsyncpa [#allocation4], 0  ;;  %3124 = vmatpush1.bf16.msra.mxu0 %v6022_v0  ;;  %v6014_v10 = vcombine.low %v90_v57, %v94_v58  ;;  %v6142_v11 = vcombine.low %v218_v59, %v222_v63  ;;  %v6007_v12 = vcombine.high %v82_v3, %v86_v4  ;;  %v6135_v13 = vcombine.high %v210_v6, %v214_v8  ;;  %v74_v14 = vld [vmem:[%s9864_s1 + $0x110] sm:$0xff] }
  0xea   :  { %3074 = vmatmul.mubr.bf16.vlgmr.msra.gmra.mxu1 %v7764_v39  ;;  %3125 = vmatprep.subr.bf16.mxu0 %v6015_v2  ;;  %v78_v15 = vld [vmem:[%s9864_s1 + $0x130] sm:$0xff]  ;;  %v6006_v18 = vcombine.low %v82_v3, %v86_v4  ;;  %v6134_v19 = vcombine.low %v210_v6, %v214_v8  ;;  %v490_v25 = vlaneseq  ;;  %vm5939_vm0 = vcmask 57344  }
  0xeb   :  { %3165 = vmatpush1.bf16.msra.mxu1 %v6150_v1  ;;  %3155 = vmatprep.mubr.bf16.mxu0 %v7411_v60  ;;  %v202_v16 = vld [vmem:[%s9864_s1 + $0x510] sm:$0xff]  ;;  %v5999_v21 = vcombine.high %v74_v14, %v78_v15  ;;  %v5998_v28 = vcombine.low %v74_v14, %v78_v15 }
  0xec   :  { %3166 = vmatprep.subr.bf16.mxu1 %v6143_v5  ;;  %v206_v17 = vld [vmem:[%s9864_s1 + $0x530] sm:$0xff]  ;;  %3196 = vmatprep.mubr.bf16.mxu1 %v7415_v61  ;;  %v8141_v54 = vshrl.u32 %v490_v25, 7  ;;  %v8161_v5 = vld [vmem:[%s9865_s2] sm:$0xff] }
  0xed   :  { %3126 = vmatpush1.bf16.msra.mxu0 %v6014_v10  ;;  %v6127_v22 = vcombine.high %v202_v16, %v206_v17  ;;  %v66_v24 = vld [vmem:[%s9864_s1 + $0xd0] sm:$0xff]  ;;  %v6126_v56 = vcombine.low %v202_v16, %v206_v17 }
  0xee   :  { %3127 = vmatprep.subr.bf16.mxu0 %v6007_v12  ;;  %v70_v55 = vld [vmem:[%s9864_s1 + $0xf0] sm:$0xff]  ;;  %v8156_v3 = vsub.s32 0, %v8141_v54  ;;  %v8164_v10 = vsub.s32 1, %v8141_v54 }
  0xef   :  { %3167 = vmatpush1.bf16.msra.mxu1 %v6142_v11  ;;  %v194_v26 = vld [vmem:[%s9864_s1 + $0x4d0] sm:$0xff]  ;;  %v5991_v29 = vcombine.high %v66_v24, %v70_v55  ;;  %v5990_v36 = vcombine.low %v66_v24, %v70_v55 }
  0xf0   :  { %3168 = vmatprep.subr.bf16.mxu1 %v6135_v13  ;;  %v198_v27 = vld [vmem:[%s9864_s1 + $0x4f0] sm:$0xff]  ;;  %v493_v15 = vrot.slane %v8161_v5, %v8156_v3 }
  0xf1   :  { %3128 = vmatpush1.bf16.msra.mxu0 %v6006_v18  ;;  %v6119_v30 = vcombine.high %v194_v26, %v198_v27  ;;  %v58_v32 = vld [vmem:[%s9864_s1 + $0x90] sm:$0xff]  ;;  %v6118_v37 = vcombine.low %v194_v26, %v198_v27 }
  0xf2   :  { %3129 = vmatprep.subr.bf16.mxu0 %v5999_v21  ;;  %v62_v33 = vld [vmem:[%s9864_s1 + $0xb0] sm:$0xff] }
  0xf3   :  { %3169 = vmatpush1.bf16.msra.mxu1 %v6134_v19  ;;  %v186_v34 = vld [vmem:[%s9864_s1 + $0x490] sm:$0xff]  ;;  %v5983_v38 = vcombine.high %v58_v32, %v62_v33  ;;  %v5982_v45 = vcombine.low %v58_v32, %v62_v33  ;;  %v497_v19 = vrot.slane %v8161_v5, %v8164_v10 }
  0xf4   :  { %3170 = vmatprep.subr.bf16.mxu1 %v6127_v22  ;;  %v190_v35 = vld [vmem:[%s9864_s1 + $0x4b0] sm:$0xff] }
  0xf5   :  { %3130 = vmatpush1.bf16.msra.mxu0 %v5998_v28  ;;  %v6111_v40 = vcombine.high %v186_v34, %v190_v35  ;;  %v50_v41 = vld [vmem:[%s9864_s1 + $0x50] sm:$0xff]  ;;  %v6110_v46 = vcombine.low %v186_v34, %v190_v35 }
  0xf6   :  { %3131 = vmatprep.subr.bf16.mxu0 %v5991_v29  ;;  %v54_v42 = vld [vmem:[%s9864_s1 + $0x70] sm:$0xff] }
  0xf7   :  { %3171 = vmatpush1.bf16.msra.mxu1 %v6126_v56  ;;  %v178_v43 = vld [vmem:[%s9864_s1 + $0x450] sm:$0xff]  ;;  %v5975_v47 = vcombine.high %v50_v41, %v54_v42  ;;  %v5974_v53 = vcombine.low %v50_v41, %v54_v42 }
  0xf8   :  { %3172 = vmatprep.subr.bf16.mxu1 %v6119_v30  ;;  %v182_v44 = vld [vmem:[%s9864_s1 + $0x470] sm:$0xff] }
  0xf9   :  { %3132 = vmatpush1.bf16.msra.mxu0 %v5990_v36  ;;  %v6103_v48 = vcombine.high %v178_v43, %v182_v44  ;;  %v42_v49 = vld [vmem:[%s9864_s1 + $0x10] sm:$0xff]  ;;  %v6102_v57 = vcombine.low %v178_v43, %v182_v44 }
  0xfa   :  { %3133 = vmatprep.subr.bf16.mxu0 %v5983_v38  ;;  %v46_v50 = vld [vmem:[%s9864_s1 + $0x30] sm:$0xff] }
  0xfb   :  { %3173 = vmatpush1.bf16.msra.mxu1 %v6118_v37  ;;  %v170_v51 = vld [vmem:[%s9864_s1 + $0x410] sm:$0xff]  ;;  %v5967_v58 = vcombine.high %v42_v49, %v46_v50  ;;  %v5966_v2 = vcombine.low %v42_v49, %v46_v50 }
  0xfc   :  { %3174 = vmatprep.subr.bf16.mxu1 %v6111_v40  ;;  %v174_v52 = vld [vmem:[%s9864_s1 + $0x430] sm:$0xff] }
  0xfd   :  { %3134 = vmatpush1.bf16.msra.mxu0 %v5982_v45  ;;  %v6095_v59 = vcombine.high %v170_v51, %v174_v52  ;;  %v162_v62 = vld [vmem:[%s9864_s1 + $0x3d0] sm:$0xff]  ;;  %v6094_v4 = vcombine.low %v170_v51, %v174_v52 }
  0xfe   :  { %3135 = vmatprep.subr.bf16.mxu0 %v5975_v47  ;;  %v166_v63 = vld [vmem:[%s9864_s1 + $0x3f0] sm:$0xff] }
  0xff   :  { %3175 = vmatpush1.bf16.msra.mxu1 %v6110_v46  ;;  %v290_v0 = vld [vmem:[%s9864_s1 + $0x7d0] sm:$0xff]  ;;  %v6087_v6 = vcombine.high %v162_v62, %v166_v63  ;;  %v6086_v16 = vcombine.low %v162_v62, %v166_v63 }
 0x100   :  { %3176 = vmatprep.subr.bf16.mxu1 %v6103_v48  ;;  %v294_v1 = vld [vmem:[%s9864_s1 + $0x7f0] sm:$0xff] }
 0x101   :  { %3136 = vmatpush1.bf16.msra.mxu0 %v5974_v53  ;;  %v6215_v8 = vcombine.high %v290_v0, %v294_v1  ;;  %v154_v11 = vld [vmem:[%s9864_s1 + $0x390] sm:$0xff]  ;;  %v6214_v17 = vcombine.low %v290_v0, %v294_v1 }
 0x102   :  { %3137 = vmatprep.subr.bf16.mxu0 %v5967_v58  ;;  %v158_v12 = vld [vmem:[%s9864_s1 + $0x3b0] sm:$0xff] }
 0x103   :  { %3177 = vmatpush1.bf16.msra.mxu1 %v6102_v57  ;;  %v282_v13 = vld [vmem:[%s9864_s1 + $0x790] sm:$0xff]  ;;  %v6079_v18 = vcombine.high %v154_v11, %v158_v12  ;;  %v6078_v29 = vcombine.low %v154_v11, %v158_v12 }
 0x104   :  { %3178 = vmatprep.subr.bf16.mxu1 %v6095_v59  ;;  %v286_v14 = vld [vmem:[%s9864_s1 + $0x7b0] sm:$0xff] }
 0x105   :  { %3138 = vmatpush1.bf16.msra.mxu0 %v5966_v2  ;;  %v6207_v21 = vcombine.high %v282_v13, %v286_v14  ;;  %v146_v22 = vld [vmem:[%s9864_s1 + $0x350] sm:$0xff]  ;;  %v6206_v32 = vcombine.low %v282_v13, %v286_v14 }
 0x106   :  { %3139 = vmatprep.subr.bf16.mxu0 %v6087_v6  ;;  %v150_v24 = vld [vmem:[%s9864_s1 + $0x370] sm:$0xff] }
 0x107   :  { %3179 = vmatpush1.bf16.msra.mxu1 %v6094_v4  ;;  %v274_v26 = vld [vmem:[%s9864_s1 + $0x750] sm:$0xff]  ;;  %v6071_v33 = vcombine.high %v146_v22, %v150_v24  ;;  %v6070_v25 = vcombine.low %v146_v22, %v150_v24 }
 0x108   :  { %3180 = vmatprep.subr.bf16.mxu1 %v6215_v8  ;;  %v2829_v55 = vpop.f32.mrf.mxu0  ;;  %v278_v27 = vld [vmem:[%s9864_s1 + $0x770] sm:$0xff] }
 0x109   :  { %v2830_v28 = vadd.f32 %v2829_v55, %v493_v15  ;;  %3140 = vmatpush2.bf16.msra.mxu0 %v6086_v16  ;;  %v6199_v37 = vcombine.high %v274_v26, %v278_v27  ;;  %v138_v38 = vld [vmem:[%s9864_s1 + $0x310] sm:$0xff]  ;;  %v6198_v47 = vcombine.low %v274_v26, %v278_v27 }
 0x10a   :  { %v2870_v56 = vpop.f32.mrf.mxu1  ;;  %v2831_v30 = vpop.f32.mrf.mxu0  ;;  %3141 = vmatprep.subr.bf16.mxu0 %v6079_v18  ;;  %v142_v40 = vld [vmem:[%s9864_s1 + $0x330] sm:$0xff] }
 0x10b   :  { %3181 = vmatpush2.bf16.msra.mxu1 %v6214_v17  ;;  %v8194_v34 = vadd.f32 %v2870_v56, %v2830_v28  ;;  %v2832_v35 = vadd.f32 %v2831_v30, %v497_v19  ;;  %v266_v42 = vld [vmem:[%s9864_s1 + $0x710] sm:$0xff]  ;;  %v6063_v48 = vcombine.high %v138_v38, %v142_v40  ;;  %v6062_v58 = vcombine.low %v138_v38, %v142_v40 }
 0x10c   :  { %v2872_v36 = vpop.f32.mrf.mxu1  ;;  %3182 = vmatprep.subr.bf16.mxu1 %v6207_v21  ;;  %v2833_v41 = vpop.f32.mrf.mxu0  ;;  %v270_v43 = vld [vmem:[%s9864_s1 + $0x730] sm:$0xff] }
 0x10d   :  { %v8208_v44 = vadd.f32 %v2872_v36, %v2832_v35  ;;  %3142 = vmatpush2.bf16.msra.mxu0 %v6078_v29  ;;  %v6191_v50 = vcombine.high %v266_v42, %v270_v43  ;;  %v130_v51 = vld [vmem:[%s9864_s1 + $0x2d0] sm:$0xff]  ;;  %v6190_v59 = vcombine.low %v266_v42, %v270_v43 }
 0x10e   :  { %v2874_v45 = vpop.f32.mrf.mxu1  ;;  %v2834_v46 = vpop.f32.mrf.mxu0  ;;  %3143 = vmatprep.subr.bf16.mxu0 %v6071_v33  ;;  %v134_v52 = vld [vmem:[%s9864_s1 + $0x2f0] sm:$0xff] }
 0x10f   :  { %3183 = vmatpush2.bf16.msra.mxu1 %v6206_v32  ;;  %v258_v53 = vld [vmem:[%s9864_s1 + $0x6d0] sm:$0xff]  ;;  %v6055_v62 = vcombine.high %v130_v51, %v134_v52  ;;  %v6054_v6 = vcombine.low %v130_v51, %v134_v52 }
 0x110   :  { %v2875_v49 = vpop.f32.mrf.mxu1  ;;  %3184 = vmatprep.subr.bf16.mxu1 %v6199_v37  ;;  %v262_v57 = vld [vmem:[%s9864_s1 + $0x6f0] sm:$0xff] }
 0x111   :  { %3144 = vmatpush2.bf16.msra.mxu0 %v6070_v25  ;;  %v6183_v63 = vcombine.high %v258_v53, %v262_v57  ;;  %v122_v0 = vld [vmem:[%s9864_s1 + $0x290] sm:$0xff]  ;;  %v6182_v8 = vcombine.low %v258_v53, %v262_v57 }
 0x112   :  { %3145 = vmatprep.subr.bf16.mxu0 %v6063_v48  ;;  %v126_v1 = vld [vmem:[%s9864_s1 + $0x2b0] sm:$0xff] }
 0x113   :  { %3185 = vmatpush2.bf16.msra.mxu1 %v6198_v47  ;;  %v250_v2 = vld [vmem:[%s9864_s1 + $0x690] sm:$0xff]  ;;  %v6047_v11 = vcombine.high %v122_v0, %v126_v1  ;;  %v6046_v17 = vcombine.low %v122_v0, %v126_v1 }
 0x114   :  { %3186 = vmatprep.subr.bf16.mxu1 %v6191_v50  ;;  %v254_v4 = vld [vmem:[%s9864_s1 + $0x6b0] sm:$0xff] }
 0x115   :  { %3146 = vmatpush2.bf16.msra.mxu0 %v6062_v58  ;;  %v6175_v12 = vcombine.high %v250_v2, %v254_v4  ;;  %v114_v13 = vld [vmem:[%s9864_s1 + $0x250] sm:$0xff]  ;;  %v6174_v18 = vcombine.low %v250_v2, %v254_v4 }
 0x116   :  { %3147 = vmatprep.subr.bf16.mxu0 %v6055_v62  ;;  %v118_v14 = vld [vmem:[%s9864_s1 + $0x270] sm:$0xff] }
 0x117   :  { %3187 = vmatpush2.bf16.msra.mxu1 %v6190_v59  ;;  %v242_v15 = vld [vmem:[%s9864_s1 + $0x650] sm:$0xff]  ;;  %v6039_v19 = vcombine.high %v114_v13, %v118_v14  ;;  %v6038_v27 = vcombine.low %v114_v13, %v118_v14 }
 0x118   :  { %3188 = vmatprep.subr.bf16.mxu1 %v6183_v63  ;;  %v246_v16 = vld [vmem:[%s9864_s1 + $0x670] sm:$0xff] }
 0x119   :  { %3148 = vmatpush2.bf16.msra.mxu0 %v6054_v6  ;;  %v6167_v21 = vcombine.high %v242_v15, %v246_v16  ;;  %v106_v22 = vld [vmem:[%s9864_s1 + $0x210] sm:$0xff]  ;;  %v6166_v28 = vcombine.low %v242_v15, %v246_v16 }
 0x11a   :  { %3149 = vmatprep.subr.bf16.mxu0 %v6047_v11  ;;  %v110_v24 = vld [vmem:[%s9864_s1 + $0x230] sm:$0xff] }
 0x11b   :  { %3189 = vmatpush2.bf16.msra.mxu1 %v6182_v8  ;;  %v234_v55 = vld [vmem:[%s9864_s1 + $0x610] sm:$0xff]  ;;  %v6031_v56 = vcombine.high %v106_v22, %v110_v24  ;;  %v6030_v36 = vcombine.low %v106_v22, %v110_v24 }
 0x11c   :  { %3190 = vmatprep.subr.bf16.mxu1 %v6175_v12  ;;  %v238_v26 = vld [vmem:[%s9864_s1 + $0x630] sm:$0xff] }
 0x11d   :  { %3150 = vmatpush2.bf16.msra.mxu0 %v6046_v17  ;;  %v6159_v29 = vcombine.high %v234_v55, %v238_v26  ;;  %v354_v30 = vld [vmem:[%s9864_s1 + $0x9d0] sm:$0xff]  ;;  %v6158_v37 = vcombine.low %v234_v55, %v238_v26 }
 0x11e   :  { %3151 = vmatprep.subr.bf16.mxu0 %v6039_v19  ;;  %v358_v32 = vld [vmem:[%s9864_s1 + $0x9f0] sm:$0xff] }
 0x11f   :  { %3191 = vmatpush2.bf16.msra.mxu1 %v6174_v18  ;;  %v482_v33 = vld [vmem:[%s9864_s1 + $0xdd0] sm:$0xff]  ;;  %v6279_v38 = vcombine.high %v354_v30, %v358_v32  ;;  %v6278_v25 = vcombine.low %v354_v30, %v358_v32 }
 0x120   :  { %3192 = vmatprep.subr.bf16.mxu1 %v6167_v21  ;;  %v486_v35 = vld [vmem:[%s9864_s1 + $0xdf0] sm:$0xff] }
 0x121   :  { %3152 = vmatpush2.bf16.msra.mxu0 %v6038_v27  ;;  %v6407_v40 = vcombine.high %v482_v33, %v486_v35  ;;  %v346_v41 = vld [vmem:[%s9864_s1 + $0x990] sm:$0xff]  ;;  %v6406_v46 = vcombine.low %v482_v33, %v486_v35 }
 0x122   :  { %3153 = vmatprep.subr.bf16.mxu0 %v6031_v56  ;;  %v350_v42 = vld [vmem:[%s9864_s1 + $0x9b0] sm:$0xff] }
 0x123   :  { %3193 = vmatpush2.bf16.msra.mxu1 %v6166_v28  ;;  %v474_v43 = vld [vmem:[%s9864_s1 + $0xd90] sm:$0xff]  ;;  %v6271_v47 = vcombine.high %v346_v41, %v350_v42  ;;  %v6270_v57 = vcombine.low %v346_v41, %v350_v42 }
 0x124   :  { %3194 = vmatprep.subr.bf16.mxu1 %v6159_v29  ;;  %v478_v45 = vld [vmem:[%s9864_s1 + $0xdb0] sm:$0xff] }
 0x125   :  { %3154 = vmatpush2.bf16.msra.mxu0 %v6030_v36  ;;  %v6399_v48 = vcombine.high %v474_v43, %v478_v45  ;;  %v338_v49 = vld [vmem:[%s9864_s1 + $0x950] sm:$0xff]  ;;  %v6398_v58 = vcombine.low %v474_v43, %v478_v45 }
 0x126   :  { %3205 = vmatprep.subr.bf16.mxu0 %v6279_v38  ;;  %v342_v50 = vld [vmem:[%s9864_s1 + $0x970] sm:$0xff] }
 0x127   :  { %3195 = vmatpush2.bf16.msra.mxu1 %v6158_v37  ;;  %v466_v51 = vld [vmem:[%s9864_s1 + $0xd50] sm:$0xff]  ;;  %v6263_v59 = vcombine.high %v338_v49, %v342_v50  ;;  %v6262_v8 = vcombine.low %v338_v49, %v342_v50 }
 0x128   :  { %3246 = vmatprep.subr.bf16.mxu1 %v6407_v40  ;;  %3156 = vmatmul.mubr.bf16.vlgmr.msra.gmra.mxu0 %v7541_v20  ;;  %v470_v52 = vld [vmem:[%s9864_s1 + $0xd70] sm:$0xff] }
 0x129   :  { %3206 = vmatpush1.bf16.msra.mxu0 %v6278_v25  ;;  %v6391_v63 = vcombine.high %v466_v51, %v470_v52  ;;  %v330_v0 = vld [vmem:[%s9864_s1 + $0x910] sm:$0xff]  ;;  %3237 = vmatprep.mubr.bf16.mxu0 %v7573_v31  ;;  %v6390_v11 = vcombine.low %v466_v51, %v470_v52 }
 0x12a   :  { %v8295_v53 = vpop.f32.mrf.mxu1  ;;  %3197 = vmatmul.mubr.bf16.vlgmr.msra.gmra.mxu1 %v7551_v23  ;;  %3207 = vmatprep.subr.bf16.mxu0 %v6271_v47  ;;  %v334_v1 = vld [vmem:[%s9864_s1 + $0x930] sm:$0xff] }
 0x12b   :  { %3247 = vmatpush1.bf16.msra.mxu1 %v6406_v46  ;;  %3278 = vmatprep.mubr.bf16.mxu1 %v7252_v9  ;;  %v458_v2 = vld [vmem:[%s9864_s1 + $0xd10] sm:$0xff]  ;;  %v6255_v12 = vcombine.high %v330_v0, %v334_v1  ;;  %v6254_v19 = vcombine.low %v330_v0, %v334_v1 }
 0x12c   :  { %v8298_v62 = vpop.f32.mrf.mxu1  ;;  %3248 = vmatprep.subr.bf16.mxu1 %v6399_v48  ;;  %v462_v4 = vld [vmem:[%s9864_s1 + $0xd30] sm:$0xff] }
 0x12d   :  { %3208 = vmatpush1.bf16.msra.mxu0 %v6270_v57  ;;  %v6383_v14 = vcombine.high %v458_v2, %v462_v4  ;;  %v322_v15 = vld [vmem:[%s9864_s1 + $0x8d0] sm:$0xff]  ;;  %v6382_v21 = vcombine.low %v458_v2, %v462_v4  ;;  %v99_v57 = vld [vmem:[%s9864_s1 + $0x1d8] sm:$0xff] }
 0x12e   :  { %v2956_v6 = vpop.f32.mrf.mxu1  ;;  %3209 = vmatprep.subr.bf16.mxu0 %v6263_v59  ;;  %v326_v16 = vld [vmem:[%s9864_s1 + $0x8f0] sm:$0xff] }
 0x12f   :  { %3249 = vmatpush1.bf16.msra.mxu1 %v6398_v58  ;;  %v450_v17 = vld [vmem:[%s9864_s1 + $0xcd0] sm:$0xff]  ;;  %v6247_v22 = vcombine.high %v322_v15, %v326_v16  ;;  %v6246_v56 = vcombine.low %v322_v15, %v326_v16  ;;  %v103_v58 = vld [vmem:[%s9864_s1 + $0x1f8] sm:$0xff] }
 0x130   :  { %v2957_v13 = vpop.f32.mrf.mxu1  ;;  %3250 = vmatprep.subr.bf16.mxu1 %v6391_v63  ;;  %v454_v18 = vld [vmem:[%s9864_s1 + $0xcf0] sm:$0xff]  ;;  %v6025_v1 = vcombine.high %v99_v57, %v103_v58  ;;  %v91_v6 = vld [vmem:[%s9864_s1 + $0x198] sm:$0xff] }
 0x131   :  { %3210 = vmatpush1.bf16.msra.mxu0 %v6262_v8  ;;  %v6375_v24 = vcombine.high %v450_v17, %v454_v18  ;;  %v314_v55 = vld [vmem:[%s9864_s1 + $0x890] sm:$0xff]  ;;  %v6374_v29 = vcombine.low %v450_v17, %v454_v18  ;;  %v95_v8 = vld [vmem:[%s9864_s1 + $0x1b8] sm:$0xff] }
 0x132   :  { %3211 = vmatprep.subr.bf16.mxu0 %v6255_v12  ;;  %v318_v26 = vld [vmem:[%s9864_s1 + $0x8b0] sm:$0xff]  ;;  %v6024_v12 = vcombine.low %v99_v57, %v103_v58  ;;  %v83_v18 = vld [vmem:[%s9864_s1 + $0x158] sm:$0xff] }
 0x133   :  { %3251 = vmatpush1.bf16.msra.mxu1 %v6390_v11  ;;  %v442_v27 = vld [vmem:[%s9864_s1 + $0xc90] sm:$0xff]  ;;  %v6239_v30 = vcombine.high %v314_v55, %v318_v26  ;;  %v6238_v38 = vcombine.low %v314_v55, %v318_v26  ;;  %v6016_v55 = vcombine.low %v91_v6, %v95_v8 }
 0x134   :  { %3252 = vmatprep.subr.bf16.mxu1 %v6383_v14  ;;  %v446_v28 = vld [vmem:[%s9864_s1 + $0xcb0] sm:$0xff]  ;;  %v6017_v14 = vcombine.high %v91_v6, %v95_v8 }
 0x135   :  { %3212 = vmatpush1.bf16.msra.mxu0 %v6254_v19  ;;  %v6367_v32 = vcombine.high %v442_v27, %v446_v28  ;;  %v306_v33 = vld [vmem:[%s9864_s1 + $0x850] sm:$0xff]  ;;  %v6366_v40 = vcombine.low %v442_v27, %v446_v28  ;;  %v87_v19 = vld [vmem:[%s9864_s1 + $0x178] sm:$0xff] }
 0x136   :  { %3213 = vmatprep.subr.bf16.mxu0 %v6247_v22  ;;  %v310_v35 = vld [vmem:[%s9864_s1 + $0x870] sm:$0xff] }
 0x137   :  { %3253 = vmatpush1.bf16.msra.mxu1 %v6382_v21  ;;  %v434_v36 = vld [vmem:[%s9864_s1 + $0xc50] sm:$0xff]  ;;  %v6231_v41 = vcombine.high %v306_v33, %v310_v35  ;;  %v6230_v47 = vcombine.low %v306_v33, %v310_v35  ;;  %v6008_v35 = vcombine.low %v83_v18, %v87_v19 }
 0x138   :  { %3254 = vmatprep.subr.bf16.mxu1 %v6375_v24  ;;  %v438_v37 = vld [vmem:[%s9864_s1 + $0xc70] sm:$0xff] }
 0x139   :  { %3214 = vmatpush1.bf16.msra.mxu0 %v6246_v56  ;;  %v6359_v42 = vcombine.high %v434_v36, %v438_v37  ;;  %v298_v43 = vld [vmem:[%s9864_s1 + $0x810] sm:$0xff]  ;;  %v6358_v48 = vcombine.low %v434_v36, %v438_v37  ;;  %v6009_v56 = vcombine.high %v83_v18, %v87_v19  ;;  %v231_v18 = vld [vmem:[%s9864_s1 + $0x5f8] sm:$0xff] }
 0x13a   :  { %3215 = vmatprep.subr.bf16.mxu0 %v6239_v30  ;;  %v302_v45 = vld [vmem:[%s9864_s1 + $0x830] sm:$0xff]  ;;  %v163_v19 = vld [vmem:[%s9864_s1 + $0x3d8] sm:$0xff] }
 0x13b   :  { %3255 = vmatpush1.bf16.msra.mxu1 %v6374_v29  ;;  %v426_v25 = vld [vmem:[%s9864_s1 + $0xc10] sm:$0xff]  ;;  %v6223_v49 = vcombine.high %v298_v43, %v302_v45  ;;  %v6222_v59 = vcombine.low %v298_v43, %v302_v45 }
 0x13c   :  { %3256 = vmatprep.subr.bf16.mxu1 %v6367_v32  ;;  %v430_v46 = vld [vmem:[%s9864_s1 + $0xc30] sm:$0xff] }
 0x13d   :  { %3216 = vmatpush1.bf16.msra.mxu0 %v6238_v38  ;;  %v6351_v50 = vcombine.high %v426_v25, %v430_v46  ;;  %v418_v51 = vld [vmem:[%s9864_s1 + $0xbd0] sm:$0xff]  ;;  %v6350_v63 = vcombine.low %v426_v25, %v430_v46 }
 0x13e   :  { %3217 = vmatprep.subr.bf16.mxu0 %v6231_v41  ;;  %v422_v52 = vld [vmem:[%s9864_s1 + $0xbf0] sm:$0xff] }
 0x13f   :  { %3257 = vmatpush1.bf16.msra.mxu1 %v6366_v40  ;;  %v6343_v0 = vcombine.high %v418_v51, %v422_v52  ;;  %v410_v2 = vld [vmem:[%s9864_s1 + $0xb90] sm:$0xff]  ;;  %v6342_v11 = vcombine.low %v418_v51, %v422_v52  ;;  %v71_v40 = vld [vmem:[%s9864_s1 + $0xf8] sm:$0xff] }
 0x140   :  { %3258 = vmatprep.subr.bf16.mxu1 %v6359_v42  ;;  %v414_v4 = vld [vmem:[%s9864_s1 + $0xbb0] sm:$0xff] }
 0x141   :  { %3218 = vmatpush1.bf16.msra.mxu0 %v6230_v47  ;;  %v6335_v13 = vcombine.high %v410_v2, %v414_v4  ;;  %v402_v15 = vld [vmem:[%s9864_s1 + $0xb50] sm:$0xff]  ;;  %v6334_v22 = vcombine.low %v410_v2, %v414_v4  ;;  %v59_v47 = vld [vmem:[%s9864_s1 + $0x98] sm:$0xff] }
 0x142   :  { %3219 = vmatprep.subr.bf16.mxu0 %v6223_v49  ;;  %v406_v16 = vld [vmem:[%s9864_s1 + $0xb70] sm:$0xff] }
 0x143   :  { %3259 = vmatpush1.bf16.msra.mxu1 %v6358_v48  ;;  %v6327_v26 = vcombine.high %v402_v15, %v406_v16  ;;  %v6326_v32 = vcombine.low %v402_v15, %v406_v16  ;;  %v386_v37 = vld [vmem:[%s9864_s1 + $0xad0] sm:$0xff]  ;;  %v63_v48 = vld [vmem:[%s9864_s1 + $0xb8] sm:$0xff] }
 0x144   :  { %3260 = vmatprep.subr.bf16.mxu1 %v6351_v50  ;;  %v390_v38 = vld [vmem:[%s9864_s1 + $0xaf0] sm:$0xff]  ;;  %v5985_v52 = vcombine.high %v59_v47, %v63_v48 }
 0x145   :  { %3220 = vmatpush1.bf16.msra.mxu0 %v6222_v59  ;;  %v6311_v43 = vcombine.high %v386_v37, %v390_v38  ;;  %v378_v25 = vld [vmem:[%s9864_s1 + $0xa90] sm:$0xff]  ;;  %v6310_v49 = vcombine.low %v386_v37, %v390_v38  ;;  %v51_v59 = vld [vmem:[%s9864_s1 + $0x58] sm:$0xff] }
 0x146   :  { %3221 = vmatprep.subr.bf16.mxu0 %v6343_v0  ;;  %v382_v46 = vld [vmem:[%s9864_s1 + $0xab0] sm:$0xff] }
 0x147   :  { %3261 = vmatpush1.bf16.msra.mxu1 %v6350_v63  ;;  %v6303_v51 = vcombine.high %v378_v25, %v382_v46  ;;  %v370_v57 = vld [vmem:[%s9864_s1 + $0xa50] sm:$0xff]  ;;  %v55_v63 = vld [vmem:[%s9864_s1 + $0x78] sm:$0xff]  ;;  %v6302_v0 = vcombine.low %v378_v25, %v382_v46 }
 0x148   :  { %3287 = vmatprep.subr.bf16.mxu1 %v6025_v1  ;;  %v2911_v17 = vpop.f32.mrf.mxu0  ;;  %v374_v58 = vld [vmem:[%s9864_s1 + $0xa70] sm:$0xff]  ;;  %v5984_v1 = vcombine.low %v59_v47, %v63_v48  ;;  %v5977_v4 = vcombine.high %v51_v59, %v55_v63  ;;  %v143_v25 = vld [vmem:[%s9864_s1 + $0x338] sm:$0xff] }
 0x149   :  { %v2912_v21 = vadd.f32 %v2911_v17, %v8194_v34  ;;  %3222 = vmatpush2.bf16.msra.mxu0 %v6342_v11  ;;  %v394_v34 = vld [vmem:[%s9864_s1 + $0xb10] sm:$0xff]  ;;  %v6295_v2 = vcombine.high %v370_v57, %v374_v58  ;;  %v43_v11 = vld [vmem:[%s9864_s1 + $0x18] sm:$0xff] }
 0x14a   :  { %3279 = vmatmul.mubr.bf16.vlgmr.msra.gmra.mxu1 %v8072_v7  ;;  %v2913_v24 = vpop.f32.mrf.mxu0  ;;  %3223 = vmatprep.subr.bf16.mxu0 %v6335_v13  ;;  %v398_v7 = vld [vmem:[%s9864_s1 + $0xb30] sm:$0xff]  ;;  %v6294_v13 = vcombine.low %v370_v57, %v374_v58  ;;  %v227_v17 = vld [vmem:[%s9864_s1 + $0x5d8] sm:$0xff] }
 0x14b   :  { %3288 = vmatpush1.bf16.msra.mxu1 %v6024_v12  ;;  %v8401_v27 = vadd.f32 %v8295_v53, %v2912_v21  ;;  %v2914_v28 = vadd.f32 %v2913_v24, %v8208_v44  ;;  %3319 = vmatprep.mubr.bf16.mxu1 %v7411_v60  ;;  %v75_v53 = vld [vmem:[%s9864_s1 + $0x118] sm:$0xff]  ;;  %v6319_v36 = vcombine.high %v394_v34, %v398_v7  ;;  %v362_v6 = vld [vmem:[%s9864_s1 + $0xa10] sm:$0xff] }
 0x14c   :  { %3289 = vmatprep.subr.bf16.mxu1 %v6017_v14  ;;  %v2915_v29 = vpop.f32.mrf.mxu0  ;;  %v79_v44 = vld [vmem:[%s9864_s1 + $0x138] sm:$0xff]  ;;  %v6318_v41 = vcombine.low %v394_v34, %v398_v7  ;;  %v366_v8 = vld [vmem:[%s9864_s1 + $0xa30] sm:$0xff]  ;;  %v5976_v14 = vcombine.low %v51_v59, %v55_v63 }
 0x14d   :  { %v8418_v30 = vadd.f32 %v8298_v62, %v2914_v28  ;;  %3224 = vmatpush2.bf16.msra.mxu0 %v6334_v22  ;;  %v6001_v60 = vcombine.high %v75_v53, %v79_v44  ;;  %v67_v62 = vld [vmem:[%s9864_s1 + $0xd8] sm:$0xff]  ;;  %v6000_v42 = vcombine.low %v75_v53, %v79_v44  ;;  %v6287_v15 = vcombine.high %v362_v6, %v366_v8 }
 0x14e   :  { %v2916_v33 = vpop.f32.mrf.mxu0  ;;  %3225 = vmatprep.subr.bf16.mxu0 %v6327_v26  ;;  %v5993_v45 = vcombine.high %v67_v62, %v71_v40  ;;  %v5992_v50 = vcombine.low %v67_v62, %v71_v40  ;;  %v47_v12 = vld [vmem:[%s9864_s1 + $0x38] sm:$0xff]  ;;  %v6286_v22 = vcombine.low %v362_v6, %v366_v8  ;;  %v6152_v29 = vcombine.low %v227_v17, %v231_v18 }
 0x14f   :  { %3290 = vmatpush1.bf16.msra.mxu1 %v6016_v55  ;;  %v5969_v16 = vcombine.high %v43_v11, %v47_v12  ;;  %v167_v21 = vld [vmem:[%s9864_s1 + $0x3f8] sm:$0xff]  ;;  %v5968_v24 = vcombine.low %v43_v11, %v47_v12  ;;  %v6153_v55 = vcombine.high %v227_v17, %v231_v18 }
 0x150   :  { %3291 = vmatprep.subr.bf16.mxu1 %v6009_v56  ;;  %v6089_v26 = vcombine.high %v163_v19, %v167_v21  ;;  %v219_v28 = vld [vmem:[%s9864_s1 + $0x598] sm:$0xff]  ;;  %v6088_v53 = vcombine.low %v163_v19, %v167_v21 }
 0x151   :  { %3226 = vmatpush2.bf16.msra.mxu0 %v6326_v32  ;;  %v223_v56 = vld [vmem:[%s9864_s1 + $0x5b8] sm:$0xff] }
 0x152   :  { %3227 = vmatprep.subr.bf16.mxu0 %v6319_v36  ;;  %v155_v34 = vld [vmem:[%s9864_s1 + $0x398] sm:$0xff]  ;;  %v6145_v44 = vcombine.high %v219_v28, %v223_v56  ;;  %v6144_v38 = vcombine.low %v219_v28, %v223_v56 }
 0x153   :  { %3292 = vmatpush1.bf16.msra.mxu1 %v6008_v35  ;;  %v159_v7 = vld [vmem:[%s9864_s1 + $0x3b8] sm:$0xff] }
 0x154   :  { %3293 = vmatprep.subr.bf16.mxu1 %v6001_v60  ;;  %v6081_v32 = vcombine.high %v155_v34, %v159_v7  ;;  %v211_v33 = vld [vmem:[%s9864_s1 + $0x558] sm:$0xff]  ;;  %v6080_v62 = vcombine.low %v155_v34, %v159_v7 }
 0x155   :  { %3228 = vmatpush2.bf16.msra.mxu0 %v6318_v41  ;;  %v215_v35 = vld [vmem:[%s9864_s1 + $0x578] sm:$0xff] }
 0x156   :  { %3229 = vmatprep.subr.bf16.mxu0 %v6311_v43  ;;  %v147_v36 = vld [vmem:[%s9864_s1 + $0x358] sm:$0xff]  ;;  %v6137_v40 = vcombine.high %v211_v33, %v215_v35  ;;  %v6136_v47 = vcombine.low %v211_v33, %v215_v35 }
 0x157   :  { %3294 = vmatpush1.bf16.msra.mxu1 %v6000_v42  ;;  %v151_v60 = vld [vmem:[%s9864_s1 + $0x378] sm:$0xff] }
 0x158   :  { %3295 = vmatprep.subr.bf16.mxu1 %v5993_v45  ;;  %v6073_v42 = vcombine.high %v147_v36, %v151_v60  ;;  %v203_v43 = vld [vmem:[%s9864_s1 + $0x518] sm:$0xff]  ;;  %v6072_v48 = vcombine.low %v147_v36, %v151_v60 }
 0x159   :  { %3230 = vmatpush2.bf16.msra.mxu0 %v6310_v49  ;;  %v207_v45 = vld [vmem:[%s9864_s1 + $0x538] sm:$0xff] }
 0x15a   :  { %3231 = vmatprep.subr.bf16.mxu0 %v6303_v51  ;;  %v6129_v49 = vcombine.high %v203_v43, %v207_v45  ;;  %v199_v57 = vld [vmem:[%s9864_s1 + $0x4f8] sm:$0xff]  ;;  %v6128_v63 = vcombine.low %v203_v43, %v207_v45 }
 0x15b   :  { %3296 = vmatpush1.bf16.msra.mxu1 %v5992_v50  ;;  %v131_v58 = vld [vmem:[%s9864_s1 + $0x2d8] sm:$0xff] }
 0x15c   :  { %3297 = vmatprep.subr.bf16.mxu1 %v5985_v52  ;;  %v195_v52 = vld [vmem:[%s9864_s1 + $0x4d8] sm:$0xff] }
 0x15d   :  { %3232 = vmatpush2.bf16.msra.mxu0 %v6302_v0  ;;  %v135_v59 = vld [vmem:[%s9864_s1 + $0x2f8] sm:$0xff]  ;;  %v6120_v12 = vcombine.low %v195_v52, %v199_v57 }
 0x15e   :  { %3233 = vmatprep.subr.bf16.mxu0 %v6295_v2  ;;  %v6057_v2 = vcombine.high %v131_v58, %v135_v59  ;;  %v191_v6 = vld [vmem:[%s9864_s1 + $0x4b8] sm:$0xff] }
 0x15f   :  { %3298 = vmatpush1.bf16.msra.mxu1 %v5984_v1  ;;  %v6121_v1 = vcombine.high %v195_v52, %v199_v57  ;;  %v123_v8 = vld [vmem:[%s9864_s1 + $0x298] sm:$0xff] }
 0x160   :  { %3299 = vmatprep.subr.bf16.mxu1 %v5977_v4  ;;  %v187_v4 = vld [vmem:[%s9864_s1 + $0x498] sm:$0xff] }
 0x161   :  { %3234 = vmatpush2.bf16.msra.mxu0 %v6294_v13  ;;  %v127_v11 = vld [vmem:[%s9864_s1 + $0x2b8] sm:$0xff]  ;;  %v6056_v13 = vcombine.low %v131_v58, %v135_v59  ;;  %v6112_v21 = vcombine.low %v187_v4, %v191_v6 }
 0x162   :  { %3235 = vmatprep.subr.bf16.mxu0 %v6287_v15  ;;  %v6049_v15 = vcombine.high %v123_v8, %v127_v11  ;;  %v183_v17 = vld [vmem:[%s9864_s1 + $0x478] sm:$0xff] }
 0x163   :  { %3300 = vmatpush1.bf16.msra.mxu1 %v5976_v14  ;;  %v6113_v14 = vcombine.high %v187_v4, %v191_v6  ;;  %v115_v18 = vld [vmem:[%s9864_s1 + $0x258] sm:$0xff] }
 0x164   :  { %3301 = vmatprep.subr.bf16.mxu1 %v5969_v16  ;;  %v179_v16 = vld [vmem:[%s9864_s1 + $0x458] sm:$0xff] }
 0x165   :  { %3236 = vmatpush2.bf16.msra.mxu0 %v6286_v22  ;;  %v119_v19 = vld [vmem:[%s9864_s1 + $0x278] sm:$0xff]  ;;  %v6048_v22 = vcombine.low %v123_v8, %v127_v11  ;;  %v6104_v7 = vcombine.low %v179_v16, %v183_v17 }
 0x166   :  { %3328 = vmatprep.subr.bf16.mxu0 %v6153_v55  ;;  %v6041_v55 = vcombine.high %v115_v18, %v119_v19  ;;  %v175_v28 = vld [vmem:[%s9864_s1 + $0x438] sm:$0xff] }
 0x167   :  { %3302 = vmatpush1.bf16.msra.mxu1 %v5968_v24  ;;  %v6105_v24 = vcombine.high %v179_v16, %v183_v17  ;;  %v107_v56 = vld [vmem:[%s9864_s1 + $0x218] sm:$0xff] }
 0x168   :  { %3303 = vmatprep.subr.bf16.mxu1 %v6089_v26  ;;  %3238 = vmatmul.mubr.bf16.vlgmr.msra.gmra.mxu0 %v7764_v39  ;;  %v171_v26 = vld [vmem:[%s9864_s1 + $0x418] sm:$0xff] }
 0x169   :  { %3329 = vmatpush1.bf16.msra.mxu0 %v6152_v29  ;;  %3360 = vmatprep.mubr.bf16.mxu0 %v7415_v61  ;;  %v139_v61 = vld [vmem:[%s9864_s1 + $0x318] sm:$0xff]  ;;  %v6040_v29 = vcombine.low %v115_v18, %v119_v19 }
 0x16a   :  { %v8505_v37 = vpop.f32.mrf.mxu1  ;;  %3330 = vmatprep.subr.bf16.mxu0 %v6145_v44  ;;  %v6065_v51 = vcombine.high %v139_v61, %v143_v25  ;;  %v6064_v0 = vcombine.low %v139_v61, %v143_v25  ;;  %v111_v34 = vld [vmem:[%s9864_s1 + $0x238] sm:$0xff]  ;;  %v500_v44 = vsub.s32 2, %v8141_v54 }
 0x16b   :  { %3304 = vmatpush2.bf16.msra.mxu1 %v6088_v53  ;;  %v6097_v53 = vcombine.high %v171_v26, %v175_v28  ;;  %v291_v33 = vld [vmem:[%s9864_s1 + $0x7d8] sm:$0xff] }
 0x16c   :  { %v8508_v41 = vpop.f32.mrf.mxu1  ;;  %3305 = vmatprep.subr.bf16.mxu1 %v6081_v32  ;;  %v6033_v32 = vcombine.high %v107_v56, %v111_v34  ;;  %v295_v35 = vld [vmem:[%s9864_s1 + $0x7f8] sm:$0xff] }
 0x16d   :  { %3331 = vmatpush1.bf16.msra.mxu0 %v6144_v38  ;;  %v355_v36 = vld [vmem:[%s9864_s1 + $0x9d8] sm:$0xff]  ;;  %v6096_v38 = vcombine.low %v171_v26, %v175_v28 }
 0x16e   :  { %v2997_v46 = vpop.f32.mrf.mxu1  ;;  %3332 = vmatprep.subr.bf16.mxu0 %v6137_v40  ;;  %v359_v60 = vld [vmem:[%s9864_s1 + $0x9f8] sm:$0xff]  ;;  %v6217_v40 = vcombine.high %v291_v33, %v295_v35 }
 0x16f   :  { %3306 = vmatpush2.bf16.msra.mxu1 %v6080_v62  ;;  %v6032_v62 = vcombine.low %v107_v56, %v111_v34  ;;  %v6281_v43 = vcombine.high %v355_v36, %v359_v60  ;;  %v283_v45 = vld [vmem:[%s9864_s1 + $0x798] sm:$0xff] }
 0x170   :  { %v2998_v50 = vpop.f32.mrf.mxu1  ;;  %3307 = vmatprep.subr.bf16.mxu1 %v6073_v42  ;;  %v501_v42 = vrot.slane %v8161_v5, %v500_v44  ;;  %v287_v61 = vld [vmem:[%s9864_s1 + $0x7b8] sm:$0xff]  ;;  %v6216_v5 = vcombine.low %v291_v33, %v295_v35 }
 0x171   :  { %3333 = vmatpush1.bf16.msra.mxu0 %v6136_v47  ;;  %v347_v25 = vld [vmem:[%s9864_s1 + $0x998] sm:$0xff]  ;;  %v6280_v47 = vcombine.low %v355_v36, %v359_v60 }
 0x172   :  { %3334 = vmatprep.subr.bf16.mxu0 %v6129_v49  ;;  %v351_v46 = vld [vmem:[%s9864_s1 + $0x9b8] sm:$0xff]  ;;  %v2994_v49 = vadd.f32 %v8505_v37, %v501_v42 }
 0x173   :  { %3308 = vmatpush2.bf16.msra.mxu1 %v6072_v48  ;;  %v6209_v48 = vcombine.high %v283_v45, %v287_v61  ;;  %v6273_v50 = vcombine.high %v347_v25, %v351_v46  ;;  %v279_v52 = vld [vmem:[%s9864_s1 + $0x778] sm:$0xff] }
 0x174   :  { %3309 = vmatprep.subr.bf16.mxu1 %v6065_v51  ;;  %v275_v51 = vld [vmem:[%s9864_s1 + $0x758] sm:$0xff] }
 0x175   :  { %3335 = vmatpush1.bf16.msra.mxu0 %v6128_v63  ;;  %v339_v58 = vld [vmem:[%s9864_s1 + $0x958] sm:$0xff]  ;;  %v6208_v63 = vcombine.low %v283_v45, %v287_v61 }
 0x176   :  { %3336 = vmatprep.subr.bf16.mxu0 %v6121_v1  ;;  %v343_v59 = vld [vmem:[%s9864_s1 + $0x978] sm:$0xff]  ;;  %v6272_v1 = vcombine.low %v347_v25, %v351_v46 }
 0x177   :  { %3310 = vmatpush2.bf16.msra.mxu1 %v6064_v0  ;;  %v6265_v4 = vcombine.high %v339_v58, %v343_v59  ;;  %v267_v6 = vld [vmem:[%s9864_s1 + $0x718] sm:$0xff] }
 0x178   :  { %3311 = vmatprep.subr.bf16.mxu1 %v6057_v2  ;;  %v6201_v2 = vcombine.high %v275_v51, %v279_v52  ;;  %v271_v8 = vld [vmem:[%s9864_s1 + $0x738] sm:$0xff] }
 0x179   :  { %3337 = vmatpush1.bf16.msra.mxu0 %v6120_v12  ;;  %v331_v11 = vld [vmem:[%s9864_s1 + $0x918] sm:$0xff]  ;;  %v6193_v16 = vcombine.high %v267_v6, %v271_v8 }
 0x17a   :  { %3338 = vmatprep.subr.bf16.mxu0 %v6113_v14  ;;  %v335_v12 = vld [vmem:[%s9864_s1 + $0x938] sm:$0xff] }
 0x17b   :  { %3312 = vmatpush2.bf16.msra.mxu1 %v6056_v13  ;;  %v6200_v13 = vcombine.low %v275_v51, %v279_v52  ;;  %v6257_v17 = vcombine.high %v331_v11, %v335_v12  ;;  %v263_v18 = vld [vmem:[%s9864_s1 + $0x6f8] sm:$0xff] }
 0x17c   :  { %3313 = vmatprep.subr.bf16.mxu1 %v6049_v15  ;;  %v6264_v15 = vcombine.low %v339_v58, %v343_v59  ;;  %v323_v19 = vld [vmem:[%s9864_s1 + $0x8d8] sm:$0xff] }
 0x17d   :  { %3339 = vmatpush1.bf16.msra.mxu0 %v6112_v21  ;;  %v327_v21 = vld [vmem:[%s9864_s1 + $0x8f8] sm:$0xff] }
 0x17e   :  { %3340 = vmatprep.subr.bf16.mxu0 %v6105_v24  ;;  %v6256_v24 = vcombine.low %v331_v11, %v335_v12  ;;  %v6249_v26 = vcombine.high %v323_v19, %v327_v21  ;;  %v251_v28 = vld [vmem:[%s9864_s1 + $0x698] sm:$0xff] }
 0x17f   :  { %3314 = vmatpush2.bf16.msra.mxu1 %v6048_v22  ;;  %v6192_v22 = vcombine.low %v267_v6, %v271_v8  ;;  %v255_v56 = vld [vmem:[%s9864_s1 + $0x6b8] sm:$0xff] }
 0x180   :  { %3315 = vmatprep.subr.bf16.mxu1 %v6041_v55  ;;  %v315_v34 = vld [vmem:[%s9864_s1 + $0x898] sm:$0xff] }
 0x181   :  { %3341 = vmatpush1.bf16.msra.mxu0 %v6104_v7  ;;  %v319_v7 = vld [vmem:[%s9864_s1 + $0x8b8] sm:$0xff] }
 0x182   :  { %3342 = vmatprep.subr.bf16.mxu0 %v6097_v53  ;;  %v6248_v53 = vcombine.low %v323_v19, %v327_v21  ;;  %v6241_v33 = vcombine.high %v315_v34, %v319_v7  ;;  %v243_v35 = vld [vmem:[%s9864_s1 + $0x658] sm:$0xff] }
 0x183   :  { %3316 = vmatpush2.bf16.msra.mxu1 %v6040_v29  ;;  %v247_v36 = vld [vmem:[%s9864_s1 + $0x678] sm:$0xff] }
 0x184   :  { %3317 = vmatprep.subr.bf16.mxu1 %v6033_v32  ;;  %v6177_v32 = vcombine.high %v251_v28, %v255_v56  ;;  %v307_v60 = vld [vmem:[%s9864_s1 + $0x858] sm:$0xff]  ;;  %v6169_v42 = vcombine.high %v243_v35, %v247_v36 }
 0x185   :  { %3343 = vmatpush1.bf16.msra.mxu0 %v6096_v38  ;;  %v311_v38 = vld [vmem:[%s9864_s1 + $0x878] sm:$0xff] }
 0x186   :  { %3344 = vmatprep.subr.bf16.mxu0 %v6217_v40  ;;  %v6240_v40 = vcombine.low %v315_v34, %v319_v7  ;;  %v235_v45 = vld [vmem:[%s9864_s1 + $0x618] sm:$0xff] }
 0x187   :  { %3318 = vmatpush2.bf16.msra.mxu1 %v6032_v62  ;;  %v6176_v62 = vcombine.low %v251_v28, %v255_v56  ;;  %v239_v61 = vld [vmem:[%s9864_s1 + $0x638] sm:$0xff] }
 0x188   :  { %3369 = vmatprep.subr.bf16.mxu1 %v6281_v43  ;;  %v3034_v57 = vpop.f32.mrf.mxu0  ;;  %v6233_v43 = vcombine.high %v307_v60, %v311_v38  ;;  %v299_v25 = vld [vmem:[%s9864_s1 + $0x818] sm:$0xff]  ;;  %v6160_v58 = vcombine.low %v235_v45, %v239_v61 }
 0x189   :  { %v8611_v37 = vadd.f32 %v3034_v57, %v2994_v49  ;;  %3345 = vmatpush2.bf16.msra.mxu0 %v6216_v5  ;;  %v303_v46 = vld [vmem:[%s9864_s1 + $0x838] sm:$0xff]  ;;  %v6168_v5 = vcombine.low %v243_v35, %v247_v36 }
 0x18a   :  { %3320 = vmatmul.mubr.bf16.vlgmr.msra.gmra.mxu1 %v7541_v20  ;;  %v8614_v0 = vpop.f32.mrf.mxu0  ;;  %3346 = vmatprep.subr.bf16.mxu0 %v6209_v48  ;;  %v6161_v48 = vcombine.high %v235_v45, %v239_v61  ;;  %v6225_v49 = vcombine.high %v299_v25, %v303_v46  ;;  %v487_v51 = vld [vmem:[%s9864_s1 + $0xdf8] sm:$0xff]  ;;  %v6224_v59 = vcombine.low %v299_v25, %v303_v46  ;;  %v8748_v45 = vld [vmem:[%s9865_s2] sm:$0xff] }
 0x18b   :  { %3370 = vmatpush1.bf16.msra.mxu1 %v6280_v47  ;;  %3401 = vmatprep.mubr.bf16.mxu1 %v7573_v31  ;;  %v259_v31 = vld [vmem:[%s9864_s1 + $0x6d8] sm:$0xff]  ;;  %v6232_v47 = vcombine.low %v307_v60, %v311_v38 }
 0x18c   :  { %3371 = vmatprep.subr.bf16.mxu1 %v6273_v50  ;;  %v3038_v20 = vpop.f32.mrf.mxu0  ;;  %v6185_v55 = vcombine.high %v259_v31, %v263_v18  ;;  %v6184_v29 = vcombine.low %v259_v31, %v263_v18  ;;  %v483_v50 = vld [vmem:[%s9864_s1 + $0xdd8] sm:$0xff] }
 0x18d   :  { %3347 = vmatpush2.bf16.msra.mxu0 %v6208_v63  ;;  %v419_v52 = vld [vmem:[%s9864_s1 + $0xbd8] sm:$0xff]  ;;  %v6409_v63 = vcombine.high %v483_v50, %v487_v51  ;;  %v6408_v20 = vcombine.low %v483_v50, %v487_v51 }
 0x18e   :  { %v3039_v14 = vpop.f32.mrf.mxu0  ;;  %3348 = vmatprep.subr.bf16.mxu0 %v6201_v2  ;;  %v423_v57 = vld [vmem:[%s9864_s1 + $0xbf8] sm:$0xff] }
 0x18f   :  { %3372 = vmatpush1.bf16.msra.mxu1 %v6272_v1  ;;  %v6345_v1 = vcombine.high %v419_v52, %v423_v57  ;;  %v475_v2 = vld [vmem:[%s9864_s1 + $0xd98] sm:$0xff]  ;;  %v6344_v11 = vcombine.low %v419_v52, %v423_v57 }
 0x190   :  { %3373 = vmatprep.subr.bf16.mxu1 %v6265_v4  ;;  %v479_v4 = vld [vmem:[%s9864_s1 + $0xdb8] sm:$0xff] }
 0x191   :  { %3349 = vmatpush2.bf16.msra.mxu0 %v6200_v13  ;;  %v411_v6 = vld [vmem:[%s9864_s1 + $0xb98] sm:$0xff]  ;;  %v6401_v12 = vcombine.high %v475_v2, %v479_v4  ;;  %v6400_v19 = vcombine.low %v475_v2, %v479_v4 }
 0x192   :  { %3350 = vmatprep.subr.bf16.mxu0 %v6193_v16  ;;  %v415_v8 = vld [vmem:[%s9864_s1 + $0xbb8] sm:$0xff] }
 0x193   :  { %3374 = vmatpush1.bf16.msra.mxu1 %v6264_v15  ;;  %v6337_v13 = vcombine.high %v411_v6, %v415_v8  ;;  %v467_v14 = vld [vmem:[%s9864_s1 + $0xd58] sm:$0xff] }
 0x194   :  { %3375 = vmatprep.subr.bf16.mxu1 %v6257_v17  ;;  %v471_v15 = vld [vmem:[%s9864_s1 + $0xd78] sm:$0xff] }
 0x195   :  { %3351 = vmatpush2.bf16.msra.mxu0 %v6192_v22  ;;  %v403_v17 = vld [vmem:[%s9864_s1 + $0xb58] sm:$0xff] }
 0x196   :  { %3352 = vmatprep.subr.bf16.mxu0 %v6185_v55  ;;  %v407_v31 = vld [vmem:[%s9864_s1 + $0xb78] sm:$0xff] }
 0x197   :  { %3376 = vmatpush1.bf16.msra.mxu1 %v6256_v24  ;;  %v6336_v24 = vcombine.low %v411_v6, %v415_v8  ;;  %v459_v28 = vld [vmem:[%s9864_s1 + $0xd18] sm:$0xff]  ;;  %v6328_v35 = vcombine.low %v403_v17, %v407_v31 }
 0x198   :  { %3377 = vmatprep.subr.bf16.mxu1 %v6249_v26  ;;  %v6329_v26 = vcombine.high %v403_v17, %v407_v31  ;;  %v463_v56 = vld [vmem:[%s9864_s1 + $0xd38] sm:$0xff] }
 0x199   :  { %3353 = vmatpush2.bf16.msra.mxu0 %v6184_v29  ;;  %v395_v34 = vld [vmem:[%s9864_s1 + $0xb18] sm:$0xff]  ;;  %v504_v29 = vsub.s32 3, %v8141_v54  ;;  %v6385_v36 = vcombine.high %v459_v28, %v463_v56  ;;  %v6384_v25 = vcombine.low %v459_v28, %v463_v56  ;;  %v6748_v28 = vld [vmem:[%s9866_s3 + $0x2e4] ss:$16 sps:$4 sm:$0xff]  }
 0x19a   :  { %3354 = vmatprep.subr.bf16.mxu0 %v6177_v32  ;;  %v399_v7 = vld [vmem:[%s9864_s1 + $0xb38] sm:$0xff]  ;;  %v6392_v32 = vcombine.low %v467_v14, %v471_v15 }
 0x19b   :  { %3378 = vmatpush1.bf16.msra.mxu1 %v6248_v53  ;;  %v6321_v38 = vcombine.high %v395_v34, %v399_v7  ;;  %v505_v61 = vrot.slane %v8748_v45, %v504_v29  ;;  %v6320_v46 = vcombine.low %v395_v34, %v399_v7  ;;  %v379_v50 = vld [vmem:[%s9864_s1 + $0xa98] sm:$0xff]  ;;  %v6743_v34 = vld [vmem:[%s9866_s3 + $0xe0] ss:$16 sps:$4 sm:$0xff]  }
 0x19c   :  { %3379 = vmatprep.subr.bf16.mxu1 %v6241_v33  ;;  %v383_v51 = vld [vmem:[%s9864_s1 + $0xab8] sm:$0xff]  ;;  %v6746_v7 = vld [vmem:[%s9866_s3 + $0x2e0] ss:$16 sps:$4 sm:$0xff]  }
 0x19d   :  { %3355 = vmatpush2.bf16.msra.mxu0 %v6176_v62  ;;  %v451_v62 = vld [vmem:[%s9864_s1 + $0xcd8] sm:$0xff]  ;;  %v2996_v52 = vadd.f32 %v8508_v41, %v505_v61  ;;  %v6761_v61 = vld [vmem:[%s9866_s3 + $0x80] ss:$16 sps:$4 sm:$0xff]  }
 0x19e   :  { %3356 = vmatprep.subr.bf16.mxu0 %v6169_v42  ;;  %v387_v42 = vld [vmem:[%s9864_s1 + $0xad8] sm:$0xff] }
 0x19f   :  { %3380 = vmatpush1.bf16.msra.mxu1 %v6240_v40  ;;  %v455_v40 = vld [vmem:[%s9864_s1 + $0xcf8] sm:$0xff] }
 0x1a0   :  { %3381 = vmatprep.subr.bf16.mxu1 %v6233_v43  ;;  %v391_v43 = vld [vmem:[%s9864_s1 + $0xaf8] sm:$0xff]  ;;  %v6376_v57 = vcombine.low %v451_v62, %v455_v40 }
 0x1a1   :  { %3357 = vmatpush2.bf16.msra.mxu0 %v6168_v5  ;;  %v6377_v5 = vcombine.high %v451_v62, %v455_v40  ;;  %v435_v2 = vld [vmem:[%s9864_s1 + $0xc58] sm:$0xff]  ;;  %v6755_v62 = vld [vmem:[%s9866_s3 + $0xa0] ss:$16 sps:$4 sm:$0xff]  }
 0x1a2   :  { %3358 = vmatprep.subr.bf16.mxu0 %v6161_v48  ;;  %v443_v48 = vld [vmem:[%s9864_s1 + $0xc98] sm:$0xff]  ;;  %v6758_v40 = vld [vmem:[%s9866_s3 + $0x2a0] ss:$16 sps:$4 sm:$0xff]  }
 0x1a3   :  { %3382 = vmatpush1.bf16.msra.mxu1 %v6232_v47  ;;  %v6313_v47 = vcombine.high %v387_v42, %v391_v43  ;;  %v439_v4 = vld [vmem:[%s9864_s1 + $0xc78] sm:$0xff] }
 0x1a4   :  { %3383 = vmatprep.subr.bf16.mxu1 %v6225_v49  ;;  %v447_v49 = vld [vmem:[%s9864_s1 + $0xcb8] sm:$0xff]  ;;  %v6360_v31 = vcombine.low %v435_v2, %v439_v4 }
 0x1a5   :  { %3359 = vmatpush2.bf16.msra.mxu0 %v6160_v58  ;;  %v6312_v58 = vcombine.low %v387_v42, %v391_v43  ;;  %v371_v41 = vld [vmem:[%s9864_s1 + $0xa58] sm:$0xff]  ;;  %v6763_v42 = vld [vmem:[%s9866_s3 + $0x84] ss:$16 sps:$4 sm:$0xff]  }
 0x1a6   :  { %3410 = vmatprep.subr.bf16.mxu0 %v6409_v63  ;;  %v3037_v63 = vadd.f32 %v8614_v0, %v2996_v52  ;;  %v375_v6 = vld [vmem:[%s9864_s1 + $0xa78] sm:$0xff]  ;;  %v6368_v0 = vcombine.low %v443_v48, %v447_v49  ;;  %v6766_v43 = vld [vmem:[%s9866_s3 + $0x284] ss:$16 sps:$4 sm:$0xff]   ;;  %v6776_v52 = vld [vmem:[%s9866_s3 + $0x240] ss:$16 sps:$4 sm:$0xff]  }
 0x1a7   :  { %3384 = vmatpush1.bf16.msra.mxu1 %v6224_v59  ;;  %v6369_v59 = vcombine.high %v443_v48, %v447_v49  ;;  %v6770_v48 = vld [vmem:[%s9866_s3 + $0x260] ss:$16 sps:$4 sm:$0xff]   ;;  %v6775_v49 = vld [vmem:[%s9866_s3 + $0x44] ss:$16 sps:$4 sm:$0xff]  }
 0x1a8   :  { %3385 = vmatprep.subr.bf16.mxu1 %v6345_v1  ;;  %v3116_v16 = vpop.f32.mrf.mxu0  ;;  %3361 = vmatmul.mubr.bf16.vlgmr.msra.gmra.mxu0 %v7551_v23  ;;  %v6393_v23 = vcombine.high %v467_v14, %v471_v15  ;;  %v6305_v1 = vcombine.high %v379_v50, %v383_v51  ;;  %v431_v14 = vld [vmem:[%s9864_s1 + $0xc38] sm:$0xff] }
 0x1a9   :  { %3411 = vmatpush1.bf16.msra.mxu0 %v6408_v20  ;;  %3442 = vmatprep.mubr.bf16.mxu0 %v7252_v9  ;;  %v6304_v20 = vcombine.low %v379_v50, %v383_v51  ;;  %v363_v15 = vld [vmem:[%s9864_s1 + $0xa18] sm:$0xff]  ;;  %v6778_v50 = vld [vmem:[%s9866_s3 + $0x244] ss:$16 sps:$4 sm:$0xff]   ;;  %v6773_v51 = vld [vmem:[%s9866_s3 + $0x40] ss:$16 sps:$4 sm:$0xff]  }
 0x1aa   :  { %v3075_v18 = vpop.f32.mrf.mxu1  ;;  %v8716_v22 = vpop.f32.mrf.mxu0  ;;  %3412 = vmatprep.subr.bf16.mxu0 %v6401_v12  ;;  %v6297_v12 = vcombine.high %v371_v41, %v375_v6 }
 0x1ab   :  { %v3076_v21 = vadd.f32 %v3075_v18, %v8611_v37  ;;  %3386 = vmatpush2.bf16.msra.mxu1 %v6344_v11  ;;  %v6361_v11 = vcombine.high %v435_v2, %v439_v4  ;;  %v6296_v18 = vcombine.low %v371_v41, %v375_v6  ;;  %v6790_v2 = vld [vmem:[%s9866_s3 + $0x204] ss:$16 sps:$4 sm:$0xff]   ;;  %v6785_v4 = vld [vmem:[%s9866_s3] ss:$16 sps:$4 sm:$0xff]   ;;  %v508_v41 = vsub.s32 4, %v8141_v54 }
 0x1ac   :  { %v3077_v55 = vpop.f32.mrf.mxu1  ;;  %3387 = vmatprep.subr.bf16.mxu1 %v6337_v13  ;;  %v3120_v37 = vpop.f32.mrf.mxu0  ;;  %v427_v13 = vld [vmem:[%s9864_s1 + $0xc18] sm:$0xff]  ;;  %v6788_v6 = vld [vmem:[%s9866_s3 + $0x200] ss:$16 sps:$4 sm:$0xff]  }
 0x1ad   :  { %v8724_v9 = vadd.f32 %v3116_v16, %v3076_v21  ;;  %3413 = vmatpush1.bf16.msra.mxu0 %v6400_v19  ;;  %v3078_v8 = vadd.f32 %v3077_v55, %v3037_v63  ;;  %v367_v16 = vld [vmem:[%s9864_s1 + $0xa38] sm:$0xff]  ;;  %v6353_v19 = vcombine.high %v427_v13, %v431_v14  ;;  %v6352_v55 = vcombine.low %v427_v13, %v431_v14  ;;  %v6782_v63 = vld [vmem:[%s9866_s3 + $0x220] ss:$16 sps:$4 sm:$0xff]   ;;  %v6799_v13 = vld [vmem:[%s9866_s3 + $0x1c4] ss:$16 sps:$4 sm:$0xff]  }
 0x1ae   :  { %v3079_v53 = vpop.f32.mrf.mxu1  ;;  %v3121_v33 = vpop.f32.mrf.mxu0  ;;  %3414 = vmatprep.subr.bf16.mxu0 %v6393_v23  ;;  %v6289_v21 = vcombine.high %v363_v15, %v367_v16  ;;  %v6802_v14 = vld [vmem:[%s9866_s3 + $0x3c4] ss:$16 sps:$4 sm:$0xff]  }
 0x1af   :  { %3388 = vmatpush2.bf16.msra.mxu1 %v6336_v24  ;;  %v3119_v17 = vadd.f32 %v8716_v22, %v3078_v8  ;;  %v3452_v24 = vmul.f32 0.01, %v8418_v30  ;;  %v6745_v22 = vld [vmem:[%s9866_s3 + $0xe4] ss:$16 sps:$4 sm:$0xff]  }
 0x1b0   :  { %v3080_v60 = vpop.f32.mrf.mxu1  ;;  %3389 = vmatprep.subr.bf16.mxu1 %v6329_v26  ;;  %v6288_v26 = vcombine.low %v363_v15, %v367_v16  ;;  %v6751_v53 = vld [vmem:[%s9866_s3 + $0xc4] ss:$16 sps:$4 sm:$0xff]  }
 0x1b1   :  { %3415 = vmatpush1.bf16.msra.mxu0 %v6392_v32  ;;  %v3454_v23 = vmul.f32 0.01, %v3119_v17  ;;  %v3460_v56 = vmax.f32 %v8418_v30, %v3452_v24  ;;  %v7229_v30 = vld [vmem:[%s9863_s0 + $0x18] ss:$0 sps:$4 sm:$0xff]   ;;  %v6754_v33 = vld [vmem:[%s9866_s3 + $0x2c4] ss:$16 sps:$4 sm:$0xff]  }
 0x1b2   :  { %3416 = vmatprep.subr.bf16.mxu0 %v6385_v36  ;;  %v6749_v36 = vld [vmem:[%s9866_s3 + $0xc0] ss:$16 sps:$4 sm:$0xff]   ;;  %v6793_v8 = vld [vmem:[%s9866_s3 + $0x1e4] ss:$16 sps:$4 sm:$0xff]  }
 0x1b3   :  { %3390 = vmatpush2.bf16.msra.mxu1 %v6328_v35  ;;  %v3462_v37 = vmax.f32 %v3119_v17, %v3454_v23  ;;  %v8812_v32 = vpack.c.bf16 %v3460_v56, %v3460_v56  ;;  %v6752_v60 = vld [vmem:[%s9866_s3 + $0x2c0] ss:$16 sps:$4 sm:$0xff]  }
 0x1b4   :  { %3391 = vmatprep.subr.bf16.mxu1 %v6321_v38  ;;  %v6757_v38 = vld [vmem:[%s9866_s3 + $0xa4] ss:$16 sps:$4 sm:$0xff]  }
 0x1b5   :  { %3417 = vmatpush1.bf16.msra.mxu0 %v6384_v25  ;;  %v8817_v35 = vpack.c.bf16 %v3462_v37, %v3462_v37  ;;  %v6764_v25 = vld [vmem:[%s9866_s3 + $0x280] ss:$16 sps:$4 sm:$0xff]  }
 0x1b6   :  { %3418 = vmatprep.subr.bf16.mxu0 %v6377_v5  ;;  %v6772_v5 = vld [vmem:[%s9866_s3 + $0x264] ss:$16 sps:$4 sm:$0xff]   ;;  %v6806_v37 = vld [vmem:[%s9866_s3 + $0x3a0] ss:$16 sps:$4 sm:$0xff]  }
 0x1b7   :  { %3392 = vmatpush2.bf16.msra.mxu1 %v6320_v46  ;;  %v6769_v46 = vld [vmem:[%s9866_s3 + $0x64] ss:$16 sps:$4 sm:$0xff]  }
 0x1b8   :  { %3393 = vmatprep.subr.bf16.mxu1 %v6313_v47  ;;  %v6767_v47 = vld [vmem:[%s9866_s3 + $0x60] ss:$16 sps:$4 sm:$0xff]  }
 0x1b9   :  { %3419 = vmatpush1.bf16.msra.mxu0 %v6376_v57  ;;  %v6781_v57 = vld [vmem:[%s9866_s3 + $0x24] ss:$16 sps:$4 sm:$0xff]  }
 0x1ba   :  { %3420 = vmatprep.subr.bf16.mxu0 %v6369_v59  ;;  %v6779_v59 = vld [vmem:[%s9866_s3 + $0x20] ss:$16 sps:$4 sm:$0xff]  }
 0x1bb   :  { %3394 = vmatpush2.bf16.msra.mxu1 %v6312_v58  ;;  %v6784_v58 = vld [vmem:[%s9866_s3 + $0x224] ss:$16 sps:$4 sm:$0xff]  }
 0x1bc   :  { %3395 = vmatprep.subr.bf16.mxu1 %v6305_v1  ;;  %v6787_v1 = vld [vmem:[%s9866_s3 + $0x4] ss:$16 sps:$4 sm:$0xff]  }
 0x1bd   :  { %3421 = vmatpush1.bf16.msra.mxu0 %v6368_v0  ;;  %v6796_v0 = vld [vmem:[%s9866_s3 + $0x3e4] ss:$16 sps:$4 sm:$0xff]  }
 0x1be   :  { %3422 = vmatprep.subr.bf16.mxu0 %v6361_v11  ;;  %v6791_v11 = vld [vmem:[%s9866_s3 + $0x1e0] ss:$16 sps:$4 sm:$0xff]  }
 0x1bf   :  { %3396 = vmatpush2.bf16.msra.mxu1 %v6304_v20  ;;  %v509_v20 = vrot.slane %v8748_v45, %v508_v41  ;;  %v6907_v41 = vld [vmem:[%s9866_s3 + $0x6c4] ss:$16 sps:$4 sm:$0xff]  }
 0x1c0   :  { %3397 = vmatprep.subr.bf16.mxu1 %v6297_v12  ;;  %v6794_v12 = vld [vmem:[%s9866_s3 + $0x3e0] ss:$16 sps:$4 sm:$0xff]  }
 0x1c1   :  { %3423 = vmatpush1.bf16.msra.mxu0 %v6360_v31  ;;  %v6797_v31 = vld [vmem:[%s9866_s3 + $0x1c0] ss:$16 sps:$4 sm:$0xff]  }
 0x1c2   :  { %3424 = vmatprep.subr.bf16.mxu0 %v6353_v19  ;;  %v6800_v19 = vld [vmem:[%s9866_s3 + $0x3c0] ss:$16 sps:$4 sm:$0xff]  }
 0x1c3   :  { %3398 = vmatpush2.bf16.msra.mxu1 %v6296_v18 }
 0x1c4   :  { %3399 = vmatprep.subr.bf16.mxu1 %v6289_v21  ;;  %v6805_v21 = vld [vmem:[%s9866_s3 + $0x1a4] ss:$16 sps:$4 sm:$0xff]  }
 0x1c5   :  { %3425 = vmatpush1.bf16.msra.mxu0 %v6352_v55  ;;  %v6808_v55 = vld [vmem:[%s9866_s3 + $0x3a4] ss:$16 sps:$4 sm:$0xff]  }
 0x1c6   :  { %5033 = vmatprep.subr.bf16.mxu0 %v6745_v22 }
 0x1c7   :  { %3400 = vmatpush2.bf16.msra.mxu1 %v6288_v26 }
 0x1c8   :  { %5074 = vmatprep.subr.bf16.mxu1 %v6748_v28  ;;  %3443 = vmatmul.mubr.bf16.vlgmr.msra.gmra.mxu0 %v7229_v30  ;;  %v6803_v28 = vld [vmem:[%s9866_s3 + $0x1a0] ss:$16 sps:$4 sm:$0xff]  }
 0x1c9   :  { %5034 = vmatpush1.bf16.msra.mxu0 %v6743_v34  ;;  %5065 = vmatprep.mubr.bf16.mxu0 %v8812_v32  ;;  %v6811_v34 = vld [vmem:[%s9866_s3 + $0x184] ss:$16 sps:$4 sm:$0xff]   ;;  %v6809_v30 = vld [vmem:[%s9866_s3 + $0x180] ss:$16 sps:$4 sm:$0xff]  }
 0x1ca   :  { %3402 = vmatmul.mubr.bf16.vlgmr.msra.gmra.mxu1 %v7764_v39  ;;  %5035 = vmatprep.subr.bf16.mxu0 %v6751_v53  ;;  %v6760_v39 = vld [vmem:[%s9866_s3 + $0x2a4] ss:$16 sps:$4 sm:$0xff]  }
 0x1cb   :  { %5075 = vmatpush1.bf16.msra.mxu1 %v6746_v7  ;;  %5106 = vmatprep.mubr.bf16.mxu1 %v8817_v35  ;;  %v6814_v53 = vld [vmem:[%s9866_s3 + $0x384] ss:$16 sps:$4 sm:$0xff]  }
 0x1cc   :  { %5076 = vmatprep.subr.bf16.mxu1 %v6754_v33  ;;  %v6812_v33 = vld [vmem:[%s9866_s3 + $0x380] ss:$16 sps:$4 sm:$0xff]  }
 0x1cd   :  { %5036 = vmatpush1.bf16.msra.mxu0 %v6749_v36  ;;  %v6817_v36 = vld [vmem:[%s9866_s3 + $0x164] ss:$16 sps:$4 sm:$0xff]  }
 0x1ce   :  { %5037 = vmatprep.subr.bf16.mxu0 %v6757_v38  ;;  %v6815_v38 = vld [vmem:[%s9866_s3 + $0x160] ss:$16 sps:$4 sm:$0xff]  }
 0x1cf   :  { %5077 = vmatpush1.bf16.msra.mxu1 %v6752_v60  ;;  %v6820_v60 = vld [vmem:[%s9866_s3 + $0x364] ss:$16 sps:$4 sm:$0xff]  }
 0x1d0   :  { %5078 = vmatprep.subr.bf16.mxu1 %v6760_v39  ;;  %v6818_v39 = vld [vmem:[%s9866_s3 + $0x360] ss:$16 sps:$4 sm:$0xff]  }
 0x1d1   :  { %5038 = vmatpush1.bf16.msra.mxu0 %v6755_v62  ;;  %v6823_v62 = vld [vmem:[%s9866_s3 + $0x144] ss:$16 sps:$4 sm:$0xff]  }
 0x1d2   :  { %5039 = vmatprep.subr.bf16.mxu0 %v6763_v42  ;;  %v6821_v42 = vld [vmem:[%s9866_s3 + $0x140] ss:$16 sps:$4 sm:$0xff]  }
 0x1d3   :  { %5079 = vmatpush1.bf16.msra.mxu1 %v6758_v40  ;;  %v6826_v40 = vld [vmem:[%s9866_s3 + $0x344] ss:$16 sps:$4 sm:$0xff]  }
 0x1d4   :  { %5080 = vmatprep.subr.bf16.mxu1 %v6766_v43  ;;  %v6824_v43 = vld [vmem:[%s9866_s3 + $0x340] ss:$16 sps:$4 sm:$0xff]  }
 0x1d5   :  { %5040 = vmatpush1.bf16.msra.mxu0 %v6761_v61  ;;  %v6829_v61 = vld [vmem:[%s9866_s3 + $0x124] ss:$16 sps:$4 sm:$0xff]  }
 0x1d6   :  { %5041 = vmatprep.subr.bf16.mxu0 %v6769_v46  ;;  %v6827_v46 = vld [vmem:[%s9866_s3 + $0x120] ss:$16 sps:$4 sm:$0xff]  }
 0x1d7   :  { %5081 = vmatpush1.bf16.msra.mxu1 %v6764_v25  ;;  %v6832_v25 = vld [vmem:[%s9866_s3 + $0x324] ss:$16 sps:$4 sm:$0xff]  }
 0x1d8   :  { %5082 = vmatprep.subr.bf16.mxu1 %v6772_v5  ;;  %v3451_v5 = vmul.f32 0.01, %v8401_v27 }
 0x1d9   :  { %5042 = vmatpush1.bf16.msra.mxu0 %v6767_v47  ;;  %v6830_v47 = vld [vmem:[%s9866_s3 + $0x320] ss:$16 sps:$4 sm:$0xff]  }
 0x1da   :  { %5043 = vmatprep.subr.bf16.mxu0 %v6775_v49  ;;  %v3453_v49 = vmul.f32 0.01, %v8724_v9 }
 0x1db   :  { %5083 = vmatpush1.bf16.msra.mxu1 %v6770_v48  ;;  %v6835_v48 = vld [vmem:[%s9866_s3 + $0x104] ss:$16 sps:$4 sm:$0xff]  }
 0x1dc   :  { %5084 = vmatprep.subr.bf16.mxu1 %v6778_v50  ;;  %v6838_v50 = vld [vmem:[%s9866_s3 + $0x304] ss:$16 sps:$4 sm:$0xff]  }
 0x1dd   :  { %5044 = vmatpush1.bf16.msra.mxu0 %v6773_v51  ;;  %v6833_v51 = vld [vmem:[%s9866_s3 + $0x100] ss:$16 sps:$4 sm:$0xff]  }
 0x1de   :  { %5045 = vmatprep.subr.bf16.mxu0 %v6781_v57  ;;  %v6836_v57 = vld [vmem:[%s9866_s3 + $0x300] ss:$16 sps:$4 sm:$0xff]  }
 0x1df   :  { %5085 = vmatpush1.bf16.msra.mxu1 %v6776_v52  ;;  %v3459_v52 = vmax.f32 %v8401_v27, %v3451_v5  ;;  %v6839_v27 = vld [vmem:[%s9866_s3 + $0x4e0] ss:$16 sps:$4 sm:$0xff]   ;;  %v6868_v5 = vld [vmem:[%s9866_s3 + $0x5c4] ss:$16 sps:$4 sm:$0xff]  }
 0x1e0   :  { %5086 = vmatprep.subr.bf16.mxu1 %v6784_v58  ;;  %v6841_v58 = vld [vmem:[%s9866_s3 + $0x4e4] ss:$16 sps:$4 sm:$0xff]  }
 0x1e1   :  { %5046 = vmatpush1.bf16.msra.mxu0 %v6779_v59  ;;  %v3461_v59 = vmax.f32 %v8724_v9, %v3453_v49  ;;  %v6899_v9 = vld [vmem:[%s9866_s3 + $0x6e0] ss:$16 sps:$4 sm:$0xff]  }
 0x1e2   :  { %5047 = vmatprep.subr.bf16.mxu0 %v6787_v1  ;;  %v9017_v1 = vpack.c.bf16 %v3459_v52, %v3459_v52  ;;  %v6871_v52 = vld [vmem:[%s9866_s3 + $0x5a4] ss:$16 sps:$4 sm:$0xff]  }
 0x1e3   :  { %5087 = vmatpush1.bf16.msra.mxu1 %v6782_v63  ;;  %v6901_v63 = vld [vmem:[%s9866_s3 + $0x6e4] ss:$16 sps:$4 sm:$0xff]  }
 0x1e4   :  { %5088 = vmatprep.subr.bf16.mxu1 %v6790_v2  ;;  %v6844_v2 = vld [vmem:[%s9866_s3 + $0x4c4] ss:$16 sps:$4 sm:$0xff]  }
 0x1e5   :  { %5048 = vmatpush1.bf16.msra.mxu0 %v6785_v4  ;;  %v9025_v4 = vpack.c.bf16 %v3461_v59, %v3461_v59 }
 0x1e6   :  { %5049 = vmatprep.subr.bf16.mxu0 %v6793_v8  ;;  %v6842_v8 = vld [vmem:[%s9866_s3 + $0x4c0] ss:$16 sps:$4 sm:$0xff]  }
 0x1e7   :  { %5089 = vmatpush1.bf16.msra.mxu1 %v6788_v6 }
 0x1e8   :  { %5090 = vmatprep.subr.bf16.mxu1 %v6796_v0  ;;  %v3157_v15 = vpop.f32.mrf.mxu0  ;;  %v6847_v0 = vld [vmem:[%s9866_s3 + $0x4a4] ss:$16 sps:$4 sm:$0xff]  }
 0x1e9   :  { %v3158_v16 = vadd.f32 %v3157_v15, %v509_v20  ;;  %5050 = vmatpush2.bf16.msra.mxu0 %v6791_v11  ;;  %v6905_v20 = vld [vmem:[%s9866_s3 + $0x6c0] ss:$16 sps:$4 sm:$0xff]   ;;  %v6850_v15 = vld [vmem:[%s9866_s3 + $0x484] ss:$16 sps:$4 sm:$0xff]  }
 0x1ea   :  { %v3198_v17 = vpop.f32.mrf.mxu1  ;;  %v8923_v18 = vpop.f32.mrf.mxu0  ;;  %5051 = vmatprep.subr.bf16.mxu0 %v6799_v13 }
 0x1eb   :  { %5091 = vmatpush2.bf16.msra.mxu1 %v6794_v12  ;;  %v8931_v24 = vadd.f32 %v3198_v17, %v3158_v16  ;;  %v6913_v12 = vld [vmem:[%s9866_s3 + $0x6a4] ss:$16 sps:$4 sm:$0xff]   ;;  %v6911_v16 = vld [vmem:[%s9866_s3 + $0x6a0] ss:$16 sps:$4 sm:$0xff]  }
 0x1ec   :  { %v8933_v23 = vpop.f32.mrf.mxu1  ;;  %5092 = vmatprep.subr.bf16.mxu1 %v6802_v14  ;;  %v3161_v26 = vpop.f32.mrf.mxu0  ;;  %v6845_v14 = vld [vmem:[%s9866_s3 + $0x4a0] ss:$16 sps:$4 sm:$0xff]  }
 0x1ed   :  { %5052 = vmatpush2.bf16.msra.mxu0 %v6797_v31  ;;  %v6919_v31 = vld [vmem:[%s9866_s3 + $0x684] ss:$16 sps:$4 sm:$0xff]  }
 0x1ee   :  { %v3202_v22 = vpop.f32.mrf.mxu1  ;;  %v3162_v56 = vpop.f32.mrf.mxu0  ;;  %5053 = vmatprep.subr.bf16.mxu0 %v6805_v21  ;;  %v6853_v21 = vld [vmem:[%s9866_s3 + $0x464] ss:$16 sps:$4 sm:$0xff]  }
 0x1ef   :  { %5093 = vmatpush2.bf16.msra.mxu1 %v6800_v19  ;;  %v6848_v19 = vld [vmem:[%s9866_s3 + $0x480] ss:$16 sps:$4 sm:$0xff]   ;;  %v6925_v26 = vld [vmem:[%s9866_s3 + $0x664] ss:$16 sps:$4 sm:$0xff]  }
 0x1f0   :  { %v3203_v7 = vpop.f32.mrf.mxu1  ;;  %5094 = vmatprep.subr.bf16.mxu1 %v6808_v55  ;;  %v6917_v55 = vld [vmem:[%s9866_s3 + $0x680] ss:$16 sps:$4 sm:$0xff]  }
 0x1f1   :  { %5054 = vmatpush2.bf16.msra.mxu0 %v6803_v28  ;;  %v6851_v22 = vld [vmem:[%s9866_s3 + $0x460] ss:$16 sps:$4 sm:$0xff]   ;;  %v6856_v28 = vld [vmem:[%s9866_s3 + $0x444] ss:$16 sps:$4 sm:$0xff]  }
 0x1f2   :  { %5055 = vmatprep.subr.bf16.mxu0 %v6811_v34  ;;  %v6923_v56 = vld [vmem:[%s9866_s3 + $0x660] ss:$16 sps:$4 sm:$0xff]   ;;  %v6859_v7 = vld [vmem:[%s9866_s3 + $0x424] ss:$16 sps:$4 sm:$0xff]  }
 0x1f3   :  { %5095 = vmatpush2.bf16.msra.mxu1 %v6806_v37  ;;  %v6931_v37 = vld [vmem:[%s9866_s3 + $0x644] ss:$16 sps:$4 sm:$0xff]   ;;  %v6854_v34 = vld [vmem:[%s9866_s3 + $0x440] ss:$16 sps:$4 sm:$0xff]  }
 0x1f4   :  { %5096 = vmatprep.subr.bf16.mxu1 %v6814_v53  ;;  %v6929_v53 = vld [vmem:[%s9866_s3 + $0x640] ss:$16 sps:$4 sm:$0xff]  }
 0x1f5   :  { %5056 = vmatpush2.bf16.msra.mxu0 %v6809_v30  ;;  %v6937_v30 = vld [vmem:[%s9866_s3 + $0x624] ss:$16 sps:$4 sm:$0xff]  }
 0x1f6   :  { %5057 = vmatprep.subr.bf16.mxu0 %v6817_v36  ;;  %v6857_v36 = vld [vmem:[%s9866_s3 + $0x420] ss:$16 sps:$4 sm:$0xff]  }
 0x1f7   :  { %5097 = vmatpush2.bf16.msra.mxu1 %v6812_v33  ;;  %v512_v33 = vsub.s32 5, %v8141_v54 }
 0x1f8   :  { %5098 = vmatprep.subr.bf16.mxu1 %v6820_v60  ;;  %v6862_v60 = vld [vmem:[%s9866_s3 + $0x404] ss:$16 sps:$4 sm:$0xff]  }
 0x1f9   :  { %5058 = vmatpush2.bf16.msra.mxu0 %v6815_v38  ;;  %v6935_v38 = vld [vmem:[%s9866_s3 + $0x620] ss:$16 sps:$4 sm:$0xff]  }
 0x1fa   :  { %5059 = vmatprep.subr.bf16.mxu0 %v6823_v62  ;;  %v513_v62 = vrot.slane %v8748_v45, %v512_v33  ;;  %v6889_v33 = vld [vmem:[%s9866_s3 + $0xec] ss:$16 sps:$4 sm:$0xff]  }
 0x1fb   :  { %5099 = vmatpush2.bf16.msra.mxu1 %v6818_v39  ;;  %v6943_v39 = vld [vmem:[%s9866_s3 + $0x604] ss:$16 sps:$4 sm:$0xff]  }
 0x1fc   :  { %5100 = vmatprep.subr.bf16.mxu1 %v6826_v40  ;;  %v6860_v40 = vld [vmem:[%s9866_s3 + $0x400] ss:$16 sps:$4 sm:$0xff]  }
 0x1fd   :  { %5060 = vmatpush2.bf16.msra.mxu0 %v6821_v42  ;;  %v6865_v42 = vld [vmem:[%s9866_s3 + $0x5e4] ss:$16 sps:$4 sm:$0xff]  }
 0x1fe   :  { %5061 = vmatprep.subr.bf16.mxu0 %v6829_v61  ;;  %v6949_v61 = vld [vmem:[%s9866_s3 + $0x7e4] ss:$16 sps:$4 sm:$0xff]  }
 0x1ff   :  { %5101 = vmatpush2.bf16.msra.mxu1 %v6824_v43  ;;  %v6941_v43 = vld [vmem:[%s9866_s3 + $0x600] ss:$16 sps:$4 sm:$0xff]  }
 0x200   :  { %5102 = vmatprep.subr.bf16.mxu1 %v6832_v25  ;;  %v3160_v25 = vadd.f32 %v8923_v18, %v513_v62  ;;  %v6955_v18 = vld [vmem:[%s9866_s3 + $0x7c4] ss:$16 sps:$4 sm:$0xff]   ;;  %v6892_v62 = vld [vmem:[%s9866_s3 + $0xcc] ss:$16 sps:$4 sm:$0xff]  }
 0x201   :  { %5062 = vmatpush2.bf16.msra.mxu0 %v6827_v46  ;;  %v6863_v46 = vld [vmem:[%s9866_s3 + $0x5e0] ss:$16 sps:$4 sm:$0xff]  }
 0x202   :  { %5063 = vmatprep.subr.bf16.mxu0 %v6835_v48  ;;  %v3201_v49 = vadd.f32 %v8933_v23, %v3160_v25  ;;  %v6961_v23 = vld [vmem:[%s9866_s3 + $0x7a4] ss:$16 sps:$4 sm:$0xff]  }
 0x203   :  { %5103 = vmatpush2.bf16.msra.mxu1 %v6830_v47  ;;  %v6947_v47 = vld [vmem:[%s9866_s3 + $0x7e0] ss:$16 sps:$4 sm:$0xff]  }
 0x204   :  { %5104 = vmatprep.subr.bf16.mxu1 %v6838_v50  ;;  %v6866_v50 = vld [vmem:[%s9866_s3 + $0x5c0] ss:$16 sps:$4 sm:$0xff]  }
 0x205   :  { %5064 = vmatpush2.bf16.msra.mxu0 %v6833_v51 }
 0x206   :  { %5115 = vmatprep.subr.bf16.mxu0 %v6841_v58 }
 0x207   :  { %5105 = vmatpush2.bf16.msra.mxu1 %v6836_v57  ;;  %v6953_v57 = vld [vmem:[%s9866_s3 + $0x7c0] ss:$16 sps:$4 sm:$0xff]  }
 0x208   :  { %5156 = vmatprep.subr.bf16.mxu1 %v6901_v63  ;;  %5066 = vmatmul.mubr.bf16.vlgmr.msra.gmra.mxu0 %v9017_v1 }
 0x209   :  { %5116 = vmatpush1.bf16.msra.mxu0 %v6839_v27  ;;  %v6869_v27 = vld [vmem:[%s9866_s3 + $0x5a0] ss:$16 sps:$4 sm:$0xff]  }
 0x20a   :  { %v9031_v6 = vpop.f32.mrf.mxu1  ;;  %5107 = vmatmul.mubr.bf16.vlgmr.msra.gmra.mxu1 %v9025_v4  ;;  %5117 = vmatprep.subr.bf16.mxu0 %v6844_v2 }
 0x20b   :  { %5157 = vmatpush1.bf16.msra.mxu1 %v6899_v9  ;;  %v6874_v9 = vld [vmem:[%s9866_s3 + $0x584] ss:$16 sps:$4 sm:$0xff]  }
 0x20c   :  { %v9043_v11 = vpop.f32.mrf.mxu1  ;;  %5158 = vmatprep.subr.bf16.mxu1 %v6907_v41  ;;  %v6959_v41 = vld [vmem:[%s9866_s3 + $0x7a0] ss:$16 sps:$4 sm:$0xff]  }
 0x20d   :  { %5118 = vmatpush1.bf16.msra.mxu0 %v6842_v8 }
 0x20e   :  { %v3284_v13 = vpop.f32.mrf.mxu1  ;;  %5119 = vmatprep.subr.bf16.mxu0 %v6847_v0  ;;  %v6967_v0 = vld [vmem:[%s9866_s3 + $0x784] ss:$16 sps:$4 sm:$0xff]  }
 0x20f   :  { %5159 = vmatpush1.bf16.msra.mxu1 %v6905_v20  ;;  %v6872_v20 = vld [vmem:[%s9866_s3 + $0x580] ss:$16 sps:$4 sm:$0xff]  }
 0x210   :  { %v3285_v17 = vpop.f32.mrf.mxu1  ;;  %5160 = vmatprep.subr.bf16.mxu1 %v6913_v12  ;;  %v6877_v12 = vld [vmem:[%s9866_s3 + $0x564] ss:$16 sps:$4 sm:$0xff]   ;;  %v6965_v13 = vld [vmem:[%s9866_s3 + $0x780] ss:$16 sps:$4 sm:$0xff]  }
 0x211   :  { %5120 = vmatpush1.bf16.msra.mxu0 %v6845_v14 }
 0x212   :  { %5121 = vmatprep.subr.bf16.mxu0 %v6850_v15  ;;  %v6973_v15 = vld [vmem:[%s9866_s3 + $0x764] ss:$16 sps:$4 sm:$0xff]  }
 0x213   :  { %5161 = vmatpush1.bf16.msra.mxu1 %v6911_v16  ;;  %v6875_v16 = vld [vmem:[%s9866_s3 + $0x560] ss:$16 sps:$4 sm:$0xff]  }
 0x214   :  { %5162 = vmatprep.subr.bf16.mxu1 %v6919_v31  ;;  %v6880_v31 = vld [vmem:[%s9866_s3 + $0x544] ss:$16 sps:$4 sm:$0xff]  }
 0x215   :  { %5122 = vmatpush1.bf16.msra.mxu0 %v6848_v19  ;;  %v6971_v19 = vld [vmem:[%s9866_s3 + $0x760] ss:$16 sps:$4 sm:$0xff]  }
 0x216   :  { %5123 = vmatprep.subr.bf16.mxu0 %v6853_v21  ;;  %v6979_v21 = vld [vmem:[%s9866_s3 + $0x744] ss:$16 sps:$4 sm:$0xff]  }
 0x217   :  { %5163 = vmatpush1.bf16.msra.mxu1 %v6917_v55 }
 0x218   :  { %5164 = vmatprep.subr.bf16.mxu1 %v6925_v26  ;;  %v6883_v26 = vld [vmem:[%s9866_s3 + $0x524] ss:$16 sps:$4 sm:$0xff]  }
 0x219   :  { %5124 = vmatpush1.bf16.msra.mxu0 %v6851_v22  ;;  %v6977_v22 = vld [vmem:[%s9866_s3 + $0x740] ss:$16 sps:$4 sm:$0xff]  }
 0x21a   :  { %5125 = vmatprep.subr.bf16.mxu0 %v6856_v28  ;;  %v6985_v28 = vld [vmem:[%s9866_s3 + $0x724] ss:$16 sps:$4 sm:$0xff]  }
 0x21b   :  { %5165 = vmatpush1.bf16.msra.mxu1 %v6923_v56 }
 0x21c   :  { %5166 = vmatprep.subr.bf16.mxu1 %v6931_v37  ;;  %v6886_v37 = vld [vmem:[%s9866_s3 + $0x504] ss:$16 sps:$4 sm:$0xff]  }
 0x21d   :  { %5126 = vmatpush1.bf16.msra.mxu0 %v6854_v34  ;;  %v6983_v34 = vld [vmem:[%s9866_s3 + $0x720] ss:$16 sps:$4 sm:$0xff]  }
 0x21e   :  { %5127 = vmatprep.subr.bf16.mxu0 %v6859_v7  ;;  %v6991_v7 = vld [vmem:[%s9866_s3 + $0x704] ss:$16 sps:$4 sm:$0xff]  }
 0x21f   :  { %5167 = vmatpush1.bf16.msra.mxu1 %v6929_v53  ;;  %v6884_v53 = vld [vmem:[%s9866_s3 + $0x500] ss:$16 sps:$4 sm:$0xff]  }
 0x220   :  { %5168 = vmatprep.subr.bf16.mxu1 %v6937_v30 }
 0x221   :  { %5128 = vmatpush1.bf16.msra.mxu0 %v6857_v36  ;;  %v6989_v36 = vld [vmem:[%s9866_s3 + $0x700] ss:$16 sps:$4 sm:$0xff]  }
 0x222   :  { %5129 = vmatprep.subr.bf16.mxu0 %v6862_v60  ;;  %v6997_v60 = vld [vmem:[%s9866_s3 + $0x2ec] ss:$16 sps:$4 sm:$0xff]  }
 0x223   :  { %5169 = vmatpush1.bf16.msra.mxu1 %v6935_v38  ;;  %v6887_v38 = vld [vmem:[%s9866_s3 + $0xe8] ss:$16 sps:$4 sm:$0xff]  }
 0x224   :  { %5170 = vmatprep.subr.bf16.mxu1 %v6943_v39 }
 0x225   :  { %5130 = vmatpush1.bf16.msra.mxu0 %v6860_v40 }
 0x226   :  { %5131 = vmatprep.subr.bf16.mxu0 %v6865_v42  ;;  %v6890_v42 = vld [vmem:[%s9866_s3 + $0xc8] ss:$16 sps:$4 sm:$0xff]  }
 0x227   :  { %5171 = vmatpush1.bf16.msra.mxu1 %v6941_v43  ;;  %v6895_v43 = vld [vmem:[%s9866_s3 + $0xac] ss:$16 sps:$4 sm:$0xff]  }
 0x228   :  { %5172 = vmatprep.subr.bf16.mxu1 %v6949_v61  ;;  %v3239_v48 = vpop.f32.mrf.mxu0 }
 0x229   :  { %5132 = vmatpush2.bf16.msra.mxu0 %v6863_v46  ;;  %v3240_v17 = vadd.f32 %v3239_v48, %v8931_v24  ;;  %v6878_v24 = vld [vmem:[%s9866_s3 + $0x540] ss:$16 sps:$4 sm:$0xff]   ;;  %v6893_v46 = vld [vmem:[%s9866_s3 + $0xa8] ss:$16 sps:$4 sm:$0xff]  }
 0x22a   :  { %v3241_v51 = vpop.f32.mrf.mxu0  ;;  %5133 = vmatprep.subr.bf16.mxu0 %v6868_v5  ;;  %v6902_v48 = vld [vmem:[%s9866_s3 + $0x68] ss:$16 sps:$4 sm:$0xff]  }
 0x22b   :  { %5173 = vmatpush2.bf16.msra.mxu1 %v6947_v47  ;;  %v3242_v58 = vadd.f32 %v3241_v51, %v3201_v49  ;;  %v3281_v55 = vadd.f32 %v9031_v6, %v3240_v17  ;;  %v6881_v6 = vld [vmem:[%s9866_s3 + $0x520] ss:$16 sps:$4 sm:$0xff]   ;;  %v6896_v47 = vld [vmem:[%s9866_s3 + $0x88] ss:$16 sps:$4 sm:$0xff]   ;;  %v6910_v49 = vld [vmem:[%s9866_s3 + $0x4c] ss:$16 sps:$4 sm:$0xff]  }
 0x22c   :  { %5174 = vmatprep.subr.bf16.mxu1 %v6955_v18  ;;  %v3243_v59 = vpop.f32.mrf.mxu0  ;;  %v6904_v18 = vld [vmem:[%s9866_s3 + $0x6c] ss:$16 sps:$4 sm:$0xff]   ;;  %v6956_v17 = vld [vmem:[%s9866_s3 + $0x148] ss:$16 sps:$4 sm:$0xff]  }
 0x22d   :  { %v3283_v63 = vadd.f32 %v9043_v11, %v3242_v58  ;;  %5134 = vmatpush2.bf16.msra.mxu0 %v6866_v50  ;;  %v3455_v56 = vmul.f32 0.01, %v3281_v55  ;;  %v6908_v50 = vld [vmem:[%s9866_s3 + $0x48] ss:$16 sps:$4 sm:$0xff]   ;;  %v6916_v51 = vld [vmem:[%s9866_s3 + $0x2c] ss:$16 sps:$4 sm:$0xff]  }
 0x22e   :  { %v3244_v2 = vpop.f32.mrf.mxu0  ;;  %5135 = vmatprep.subr.bf16.mxu0 %v6871_v52  ;;  %v6914_v52 = vld [vmem:[%s9866_s3 + $0x28] ss:$16 sps:$4 sm:$0xff]  }
 0x22f   :  { %5175 = vmatpush2.bf16.msra.mxu1 %v6953_v57  ;;  %v3456_v8 = vmul.f32 0.01, %v3283_v63  ;;  %v3463_v30 = vmax.f32 %v3281_v55, %v3455_v56  ;;  %v6922_v57 = vld [vmem:[%s9866_s3 + $0xc] ss:$16 sps:$4 sm:$0xff]   ;;  %v6920_v58 = vld [vmem:[%s9866_s3 + $0x8] ss:$16 sps:$4 sm:$0xff]  }
 0x230   :  { %5176 = vmatprep.subr.bf16.mxu1 %v6961_v23  ;;  %v6928_v23 = vld [vmem:[%s9866_s3 + $0x1ec] ss:$16 sps:$4 sm:$0xff]   ;;  %v6926_v59 = vld [vmem:[%s9866_s3 + $0x1e8] ss:$16 sps:$4 sm:$0xff]   ;;  %v520_v55 = vsub.s32 7, %v8141_v54 }
 0x231   :  { %5136 = vmatpush2.bf16.msra.mxu0 %v6869_v27  ;;  %v3464_v11 = vmax.f32 %v3283_v63, %v3456_v8  ;;  %v9229_v39 = vpack.c.bf16 %v3463_v30, %v3463_v30  ;;  %v6934_v63 = vld [vmem:[%s9866_s3 + $0x1cc] ss:$16 sps:$4 sm:$0xff]   ;;  %v6932_v2 = vld [vmem:[%s9866_s3 + $0x1c8] ss:$16 sps:$4 sm:$0xff]  }
 0x232   :  { %5137 = vmatprep.subr.bf16.mxu0 %v6874_v9  ;;  %v6974_v56 = vld [vmem:[%s9866_s3 + $0x4e8] ss:$16 sps:$4 sm:$0xff]  }
 0x233   :  { %5177 = vmatpush2.bf16.msra.mxu1 %v6959_v41  ;;  %v9170_v14 = vpack.c.bf16 %v3464_v11, %v3464_v11  ;;  %v6940_v41 = vld [vmem:[%s9866_s3 + $0x1ac] ss:$16 sps:$4 sm:$0xff]  }
 0x234   :  { %5178 = vmatprep.subr.bf16.mxu1 %v6967_v0  ;;  %v6938_v0 = vld [vmem:[%s9866_s3 + $0x1a8] ss:$16 sps:$4 sm:$0xff]   ;;  %v6946_v11 = vld [vmem:[%s9866_s3 + $0x18c] ss:$16 sps:$4 sm:$0xff]  }
 0x235   :  { %5138 = vmatpush2.bf16.msra.mxu0 %v6872_v20  ;;  %5147 = vmatprep.mubr.bf16.mxu0 %v9170_v14 }
 0x236   :  { %5139 = vmatprep.subr.bf16.mxu0 %v6877_v12  ;;  %v6944_v12 = vld [vmem:[%s9866_s3 + $0x188] ss:$16 sps:$4 sm:$0xff]  }
 0x237   :  { %5179 = vmatpush2.bf16.msra.mxu1 %v6965_v13  ;;  %v6952_v13 = vld [vmem:[%s9866_s3 + $0x16c] ss:$16 sps:$4 sm:$0xff]  }
 0x238   :  { %5180 = vmatprep.subr.bf16.mxu1 %v6973_v15  ;;  %v6950_v15 = vld [vmem:[%s9866_s3 + $0x168] ss:$16 sps:$4 sm:$0xff]  }
 0x239   :  { %5140 = vmatpush2.bf16.msra.mxu0 %v6875_v16  ;;  %v6958_v16 = vld [vmem:[%s9866_s3 + $0x14c] ss:$16 sps:$4 sm:$0xff]  }
 0x23a   :  { %5141 = vmatprep.subr.bf16.mxu0 %v6880_v31  ;;  %v6964_v31 = vld [vmem:[%s9866_s3 + $0x12c] ss:$16 sps:$4 sm:$0xff]  }
 0x23b   :  { %5181 = vmatpush2.bf16.msra.mxu1 %v6971_v19  ;;  %v6962_v19 = vld [vmem:[%s9866_s3 + $0x128] ss:$16 sps:$4 sm:$0xff]  }
 0x23c   :  { %5182 = vmatprep.subr.bf16.mxu1 %v6979_v21  ;;  %v516_v21 = vsub.s32 6, %v8141_v54 }
 0x23d   :  { %5142 = vmatpush2.bf16.msra.mxu0 %v6878_v24  ;;  %v6970_v24 = vld [vmem:[%s9866_s3 + $0x10c] ss:$16 sps:$4 sm:$0xff]  }
 0x23e   :  { %5143 = vmatprep.subr.bf16.mxu0 %v6883_v26  ;;  %v6968_v26 = vld [vmem:[%s9866_s3 + $0x108] ss:$16 sps:$4 sm:$0xff]  }
 0x23f   :  { %5183 = vmatpush2.bf16.msra.mxu1 %v6977_v22  ;;  %v517_v22 = vrot.slane %v8748_v45, %v516_v21  ;;  %v7025_v21 = vld [vmem:[%s9866_s3 + $0x248] ss:$16 sps:$4 sm:$0xff]  }
 0x240   :  { %5184 = vmatprep.subr.bf16.mxu1 %v6985_v28  ;;  %v6976_v28 = vld [vmem:[%s9866_s3 + $0x4ec] ss:$16 sps:$4 sm:$0xff]  }
 0x241   :  { %5144 = vmatpush2.bf16.msra.mxu0 %v6881_v6  ;;  %v521_v6 = vrot.slane %v8748_v45, %v520_v55  ;;  %v6980_v45 = vld [vmem:[%s9866_s3 + $0x4c8] ss:$16 sps:$4 sm:$0xff]   ;;  %v7033_v55 = vld [vmem:[%s9866_s3 + $0x22c] ss:$16 sps:$4 sm:$0xff]  }
 0x242   :  { %5145 = vmatprep.subr.bf16.mxu0 %v6886_v37 }
 0x243   :  { %5185 = vmatpush2.bf16.msra.mxu1 %v6983_v34  ;;  %v6982_v34 = vld [vmem:[%s9866_s3 + $0x4cc] ss:$16 sps:$4 sm:$0xff]  }
 0x244   :  { %5186 = vmatprep.subr.bf16.mxu1 %v6991_v7 }
 0x245   :  { %5146 = vmatpush2.bf16.msra.mxu0 %v6884_v53 }
 0x246   :  { %5197 = vmatprep.subr.bf16.mxu0 %v6889_v33 }
 0x247   :  { %5187 = vmatpush2.bf16.msra.mxu1 %v6989_v36 }
 0x248   :  { %5238 = vmatprep.subr.bf16.mxu1 %v6997_v60  ;;  %5148 = vmatmul.mubr.bf16.vlgmr.msra.gmra.mxu0 %v9229_v39 }
 0x249   :  { %5198 = vmatpush1.bf16.msra.mxu0 %v6887_v38  ;;  %5229 = vmatprep.mubr.bf16.mxu0 %v8812_v32  ;;  %v6898_v32 = vld [vmem:[%s9866_s3 + $0x8c] ss:$16 sps:$4 sm:$0xff]  }
 0x24a   :  { %v9235_v40 = vpop.f32.mrf.mxu1  ;;  %5199 = vmatprep.subr.bf16.mxu0 %v6892_v62  ;;  %v6988_v62 = vld [vmem:[%s9866_s3 + $0x4ac] ss:$16 sps:$4 sm:$0xff]  }
 0x24b   :  { %v3322_v37 = vadd.f32 %v9235_v40, %v517_v22  ;;  %v7031_v22 = vld [vmem:[%s9866_s3 + $0x228] ss:$16 sps:$4 sm:$0xff]  }
 0x24c   :  { %v9244_v61 = vpop.f32.mrf.mxu1 }
 0x24d   :  { %5200 = vmatpush1.bf16.msra.mxu0 %v6890_v42  ;;  %v3324_v7 = vadd.f32 %v9244_v61, %v521_v6  ;;  %v7039_v6 = vld [vmem:[%s9866_s3 + $0x20c] ss:$16 sps:$4 sm:$0xff]  }
 0x24e   :  { %v3325_v25 = vpop.f32.mrf.mxu1  ;;  %5201 = vmatprep.subr.bf16.mxu0 %v6895_v43 }
 0x250   :  { %v3326_v5 = vpop.f32.mrf.mxu1 }
 0x251   :  { %5202 = vmatpush1.bf16.msra.mxu0 %v6893_v46  ;;  %v6994_v5 = vld [vmem:[%s9866_s3 + $0x48c] ss:$16 sps:$4 sm:$0xff]  }
 0x252   :  { %5203 = vmatprep.subr.bf16.mxu0 %v6898_v32 }
 0x255   :  { %5204 = vmatpush1.bf16.msra.mxu0 %v6896_v47 }
 0x256   :  { %5205 = vmatprep.subr.bf16.mxu0 %v6904_v18 }
 0x259   :  { %5206 = vmatpush1.bf16.msra.mxu0 %v6902_v48 }
 0x25a   :  { %5207 = vmatprep.subr.bf16.mxu0 %v6910_v49  ;;  %v6992_v49 = vld [vmem:[%s9866_s3 + $0x488] ss:$16 sps:$4 sm:$0xff]  }
 0x25d   :  { %5208 = vmatpush1.bf16.msra.mxu0 %v6908_v50 }
 0x25e   :  { %5209 = vmatprep.subr.bf16.mxu0 %v6916_v51  ;;  %v7000_v51 = vld [vmem:[%s9866_s3 + $0x46c] ss:$16 sps:$4 sm:$0xff]  }
 0x261   :  { %5210 = vmatpush1.bf16.msra.mxu0 %v6914_v52 }
 0x262   :  { %5211 = vmatprep.subr.bf16.mxu0 %v6922_v57  ;;  %v6995_v57 = vld [vmem:[%s9866_s3 + $0x2e8] ss:$16 sps:$4 sm:$0xff]  }
 0x265   :  { %5212 = vmatpush1.bf16.msra.mxu0 %v6920_v58 }
 0x266   :  { %5213 = vmatprep.subr.bf16.mxu0 %v6928_v23  ;;  %v6998_v23 = vld [vmem:[%s9866_s3 + $0x468] ss:$16 sps:$4 sm:$0xff]  }
 0x268   :  { %v3362_v27 = vpop.f32.mrf.mxu0 }
 0x269   :  { %5214 = vmatpush2.bf16.msra.mxu0 %v6926_v59  ;;  %v3363_v53 = vadd.f32 %v3362_v27, %v3322_v37  ;;  %v7003_v59 = vld [vmem:[%s9866_s3 + $0x2cc] ss:$16 sps:$4 sm:$0xff]   ;;  %v7001_v27 = vld [vmem:[%s9866_s3 + $0x2c8] ss:$16 sps:$4 sm:$0xff]  }
 0x26a   :  { %v3364_v9 = vpop.f32.mrf.mxu0  ;;  %5215 = vmatprep.subr.bf16.mxu0 %v6934_v63  ;;  %v7006_v63 = vld [vmem:[%s9866_s3 + $0x44c] ss:$16 sps:$4 sm:$0xff]   ;;  %v7037_v37 = vld [vmem:[%s9866_s3 + $0x208] ss:$16 sps:$4 sm:$0xff]  }
 0x26b   :  { %v3365_v36 = vadd.f32 %v3364_v9, %v3324_v7  ;;  %v7009_v9 = vld [vmem:[%s9866_s3 + $0x2ac] ss:$16 sps:$4 sm:$0xff]  }
 0x26c   :  { %v3366_v8 = vpop.f32.mrf.mxu0  ;;  %v7045_v7 = vld [vmem:[%s9866_s3 + $0x3ec] ss:$16 sps:$4 sm:$0xff]  }
 0x26d   :  { %5216 = vmatpush2.bf16.msra.mxu0 %v6932_v2  ;;  %v7004_v2 = vld [vmem:[%s9866_s3 + $0x448] ss:$16 sps:$4 sm:$0xff]  }
 0x26e   :  { %v3367_v20 = vpop.f32.mrf.mxu0  ;;  %5217 = vmatprep.subr.bf16.mxu0 %v6940_v41  ;;  %v7012_v41 = vld [vmem:[%s9866_s3 + $0x42c] ss:$16 sps:$4 sm:$0xff]   ;;  %v7010_v8 = vld [vmem:[%s9866_s3 + $0x428] ss:$16 sps:$4 sm:$0xff]  }
 0x26f   :  { %v7018_v20 = vld [vmem:[%s9866_s3 + $0x40c] ss:$16 sps:$4 sm:$0xff]  }
 0x271   :  { %5218 = vmatpush2.bf16.msra.mxu0 %v6938_v0  ;;  %v7015_v0 = vld [vmem:[%s9866_s3 + $0x28c] ss:$16 sps:$4 sm:$0xff]  }
 0x272   :  { %5219 = vmatprep.subr.bf16.mxu0 %v6946_v11  ;;  %v7013_v11 = vld [vmem:[%s9866_s3 + $0x288] ss:$16 sps:$4 sm:$0xff]  }
 0x275   :  { %5220 = vmatpush2.bf16.msra.mxu0 %v6944_v12  ;;  %v7016_v12 = vld [vmem:[%s9866_s3 + $0x408] ss:$16 sps:$4 sm:$0xff]  }
 0x276   :  { %5221 = vmatprep.subr.bf16.mxu0 %v6952_v13  ;;  %v7021_v13 = vld [vmem:[%s9866_s3 + $0x26c] ss:$16 sps:$4 sm:$0xff]  }
 0x279   :  { %5222 = vmatpush2.bf16.msra.mxu0 %v6950_v15  ;;  %v7024_v15 = vld [vmem:[%s9866_s3 + $0x5ec] ss:$16 sps:$4 sm:$0xff]  }
 0x27a   :  { %5223 = vmatprep.subr.bf16.mxu0 %v6958_v16  ;;  %v7019_v16 = vld [vmem:[%s9866_s3 + $0x268] ss:$16 sps:$4 sm:$0xff]  }
 0x27d   :  { %5224 = vmatpush2.bf16.msra.mxu0 %v6956_v17  ;;  %v7022_v17 = vld [vmem:[%s9866_s3 + $0x5e8] ss:$16 sps:$4 sm:$0xff]  }
 0x27e   :  { %5225 = vmatprep.subr.bf16.mxu0 %v6964_v31  ;;  %v7027_v31 = vld [vmem:[%s9866_s3 + $0x24c] ss:$16 sps:$4 sm:$0xff]  }
 0x281   :  { %5226 = vmatpush2.bf16.msra.mxu0 %v6962_v19  ;;  %v7030_v19 = vld [vmem:[%s9866_s3 + $0x5cc] ss:$16 sps:$4 sm:$0xff]  }
 0x282   :  { %5227 = vmatprep.subr.bf16.mxu0 %v6970_v24  ;;  %v7028_v24 = vld [vmem:[%s9866_s3 + $0x5c8] ss:$16 sps:$4 sm:$0xff]  }
 0x285   :  { %5228 = vmatpush2.bf16.msra.mxu0 %v6968_v26  ;;  %v7036_v26 = vld [vmem:[%s9866_s3 + $0x5ac] ss:$16 sps:$4 sm:$0xff]  }
 0x286   :  { %5279 = vmatprep.subr.bf16.mxu0 %v6976_v28  ;;  %v7034_v28 = vld [vmem:[%s9866_s3 + $0x5a8] ss:$16 sps:$4 sm:$0xff]  }
 0x288   :  { %v3444_v30 = vpop.f32.mrf.mxu0  ;;  %5230 = vmatmul.mubr.bf16.vlgmr.msra.gmra.mxu0 %v9017_v1 }
 0x289   :  { %5280 = vmatpush1.bf16.msra.mxu0 %v6974_v56  ;;  %5311 = vmatprep.mubr.bf16.mxu0 %v9170_v14  ;;  %v6986_v14 = vld [vmem:[%s9866_s3 + $0x4a8] ss:$16 sps:$4 sm:$0xff]   ;;  %v7042_v56 = vld [vmem:[%s9866_s3 + $0x58c] ss:$16 sps:$4 sm:$0xff]  }
 0x28a   :  { %v3403_v33 = vpop.f32.mrf.mxu1  ;;  %v3446_v38 = vpop.f32.mrf.mxu0  ;;  %5281 = vmatprep.subr.bf16.mxu0 %v6982_v34  ;;  %v7040_v34 = vld [vmem:[%s9866_s3 + $0x588] ss:$16 sps:$4 sm:$0xff]  }
 0x28b   :  { %v3404_v60 = vadd.f32 %v3403_v33, %v3363_v53  ;;  %v7048_v53 = vld [vmem:[%s9866_s3 + $0x56c] ss:$16 sps:$4 sm:$0xff]   ;;  %v7046_v33 = vld [vmem:[%s9866_s3 + $0x568] ss:$16 sps:$4 sm:$0xff]  }
 0x28c   :  { %v3405_v40 = vpop.f32.mrf.mxu1  ;;  %v3448_v1 = vpop.f32.mrf.mxu0 }
 0x28d   :  { %v3445_v42 = vadd.f32 %v3444_v30, %v3404_v60  ;;  %v3406_v43 = vadd.f32 %v3405_v40, %v3365_v36  ;;  %5282 = vmatpush1.bf16.msra.mxu0 %v6980_v45  ;;  %v7043_v30 = vld [vmem:[%s9866_s3 + $0x3e8] ss:$16 sps:$4 sm:$0xff]   ;;  %v7051_v45 = vld [vmem:[%s9866_s3 + $0x3cc] ss:$16 sps:$4 sm:$0xff]  }
 0x28e   :  { %v3407_v61 = vpop.f32.mrf.mxu1  ;;  %v3449_v32 = vpop.f32.mrf.mxu0  ;;  %5283 = vmatprep.subr.bf16.mxu0 %v6988_v62  ;;  %v7054_v36 = vld [vmem:[%s9866_s3 + $0x54c] ss:$16 sps:$4 sm:$0xff]   ;;  %v7049_v60 = vld [vmem:[%s9866_s3 + $0x3c8] ss:$16 sps:$4 sm:$0xff]  }
 0x28f   :  { %v3457_v25 = vmul.f32 0.01, %v3445_v42  ;;  %v3447_v46 = vadd.f32 %v3446_v38, %v3406_v43  ;;  %v7052_v38 = vld [vmem:[%s9866_s3 + $0x548] ss:$16 sps:$4 sm:$0xff]   ;;  %v7057_v62 = vld [vmem:[%s9866_s3 + $0x3ac] ss:$16 sps:$4 sm:$0xff]  }
 0x290   :  { %v3408_v47 = vpop.f32.mrf.mxu1  ;;  %v7060_v40 = vld [vmem:[%s9866_s3 + $0x52c] ss:$16 sps:$4 sm:$0xff]   ;;  %v7058_v43 = vld [vmem:[%s9866_s3 + $0x528] ss:$16 sps:$4 sm:$0xff]   ;;  %v9513_v32 = vld [vmem:[%s9867_s4] sm:$0xf] }
 0x291   :  { %v3458_v18 = vmul.f32 0.01, %v3447_v46  ;;  %v3465_v48 = vmax.f32 %v3445_v42, %v3457_v25  ;;  %5284 = vmatpush1.bf16.msra.mxu0 %v6986_v14  ;;  %v7055_v42 = vld [vmem:[%s9866_s3 + $0x3a8] ss:$16 sps:$4 sm:$0xff]   ;;  %v7063_v1 = vld [vmem:[%s9866_s3 + $0x38c] ss:$16 sps:$4 sm:$0xff]  }
 0x292   :  { %5285 = vmatprep.subr.bf16.mxu0 %v6994_v5  ;;  %v7066_v61 = vld [vmem:[%s9866_s3 + $0x50c] ss:$16 sps:$4 sm:$0xff]   ;;  %v7061_v14 = vld [vmem:[%s9866_s3 + $0x388] ss:$16 sps:$4 sm:$0xff]  }
 0x293   :  { %v3466_v50 = vmax.f32 %v3447_v46, %v3458_v18  ;;  %v9367_v58 = vpack.c.bf16 %v3465_v48, %v3465_v48  ;;  %v7064_v25 = vld [vmem:[%s9866_s3 + $0x508] ss:$16 sps:$4 sm:$0xff]   ;;  %v7069_v46 = vld [vmem:[%s9866_s3 + $0x36c] ss:$16 sps:$4 sm:$0xff]   ;;  %v3736_v18 = vrot.slane %v9513_v32, %v8156_v3 }
 0x294   :  { %v7129_v5 = vld [vmem:[%s9868_s5 + $0x74] ss:$8 sps:$4 sm:$0xff]   ;;  %v7067_v47 = vld [vmem:[%s9866_s3 + $0x368] ss:$16 sps:$4 sm:$0xff]  }
 0x295   :  { %v9362_v52 = vpack.c.bf16 %v3466_v50, %v3466_v50  ;;  %5286 = vmatpush1.bf16.msra.mxu0 %v6992_v49  ;;  %v7072_v48 = vld [vmem:[%s9866_s3 + $0x34c] ss:$16 sps:$4 sm:$0xff]   ;;  %v7127_v49 = vld [vmem:[%s9868_s5 + $0x70] ss:$8 sps:$4 sm:$0xff]  }
 0x296   :  { %5287 = vmatprep.subr.bf16.mxu0 %v7000_v51  ;;  %v7132_v50 = vld [vmem:[%s9868_s5 + $0x64] ss:$8 sps:$4 sm:$0xff]   ;;  %v3740_v51 = vrot.slane %v9513_v32, %v8164_v10 }
 0x297   :  { %5188 = vmatprep.mubr.bf16.mxu1 %v9362_v52 }
 0x298   :  { %5189 = vmatmul.mubr.bf16.vlgmr.msra.gmra.mxu1 %v9367_v58 }
 0x299   :  { %5239 = vmatpush1.bf16.msra.mxu1 %v6995_v57  ;;  %5270 = vmatprep.mubr.bf16.mxu1 %v8817_v35  ;;  %v7007_v35 = vld [vmem:[%s9866_s3 + $0x2a8] ss:$16 sps:$4 sm:$0xff]  }
 0x29a   :  { %5240 = vmatprep.subr.bf16.mxu1 %v7003_v59  ;;  %5288 = vmatpush1.bf16.msra.mxu0 %v6998_v23  ;;  %v7070_v23 = vld [vmem:[%s9866_s3 + $0x348] ss:$16 sps:$4 sm:$0xff]  }
 0x29b   :  { %5289 = vmatprep.subr.bf16.mxu0 %v7006_v63 }
 0x29d   :  { %5241 = vmatpush1.bf16.msra.mxu1 %v7001_v27  ;;  %v7075_v27 = vld [vmem:[%s9866_s3 + $0x32c] ss:$16 sps:$4 sm:$0xff]  }
 0x29e   :  { %5242 = vmatprep.subr.bf16.mxu1 %v7009_v9  ;;  %5290 = vmatpush1.bf16.msra.mxu0 %v7004_v2  ;;  %v7130_v2 = vld [vmem:[%s9868_s5 + $0x60] ss:$8 sps:$4 sm:$0xff]  }
 0x29f   :  { %5291 = vmatprep.subr.bf16.mxu0 %v7012_v41 }
 0x2a1   :  { %5243 = vmatpush1.bf16.msra.mxu1 %v7007_v35 }
 0x2a2   :  { %5244 = vmatprep.subr.bf16.mxu1 %v7015_v0  ;;  %5292 = vmatpush1.bf16.msra.mxu0 %v7010_v8 }
 0x2a3   :  { %5293 = vmatprep.subr.bf16.mxu0 %v7018_v20  ;;  %v7073_v20 = vld [vmem:[%s9866_s3 + $0x328] ss:$16 sps:$4 sm:$0xff]  }
 0x2a5   :  { %5245 = vmatpush1.bf16.msra.mxu1 %v7013_v11 }
 0x2a6   :  { %5246 = vmatprep.subr.bf16.mxu1 %v7021_v13  ;;  %5294 = vmatpush1.bf16.msra.mxu0 %v7016_v12  ;;  %v7078_v13 = vld [vmem:[%s9866_s3 + $0x30c] ss:$16 sps:$4 sm:$0xff]  }
 0x2a7   :  { %5295 = vmatprep.subr.bf16.mxu0 %v7024_v15  ;;  %v7133_v15 = vld [vmem:[%s9868_s5 + $0x50] ss:$8 sps:$4 sm:$0xff]  }
 0x2a9   :  { %5247 = vmatpush1.bf16.msra.mxu1 %v7019_v16 }
 0x2aa   :  { %5248 = vmatprep.subr.bf16.mxu1 %v7027_v31  ;;  %5296 = vmatpush2.bf16.msra.mxu0 %v7022_v17  ;;  %v7138_v17 = vld [vmem:[%s9868_s5 + $0x44] ss:$8 sps:$4 sm:$0xff]  }
 0x2ab   :  { %5297 = vmatprep.subr.bf16.mxu0 %v7030_v19  ;;  %v7076_v19 = vld [vmem:[%s9866_s3 + $0x308] ss:$16 sps:$4 sm:$0xff]  }
 0x2ad   :  { %5249 = vmatpush1.bf16.msra.mxu1 %v7025_v21  ;;  %v7081_v21 = vld [vmem:[%s9866_s3 + $0x6ec] ss:$16 sps:$4 sm:$0xff]  }
 0x2ae   :  { %5250 = vmatprep.subr.bf16.mxu1 %v7033_v55  ;;  %5298 = vmatpush2.bf16.msra.mxu0 %v7028_v24  ;;  %v7136_v24 = vld [vmem:[%s9868_s5 + $0x40] ss:$8 sps:$4 sm:$0xff]   ;;  %v7141_v55 = vld [vmem:[%s9868_s5 + $0x34] ss:$8 sps:$4 sm:$0xff]  }
 0x2af   :  { %5299 = vmatprep.subr.bf16.mxu0 %v7036_v26  ;;  %v7079_v26 = vld [vmem:[%s9866_s3 + $0x6e8] ss:$16 sps:$4 sm:$0xff]  }
 0x2b1   :  { %5251 = vmatpush1.bf16.msra.mxu1 %v7031_v22  ;;  %v7084_v22 = vld [vmem:[%s9866_s3 + $0x6cc] ss:$16 sps:$4 sm:$0xff]  }
 0x2b2   :  { %5252 = vmatprep.subr.bf16.mxu1 %v7039_v6  ;;  %5300 = vmatpush2.bf16.msra.mxu0 %v7034_v28  ;;  %v7139_v28 = vld [vmem:[%s9868_s5 + $0x30] ss:$8 sps:$4 sm:$0xff]   ;;  %v7144_v6 = vld [vmem:[%s9868_s5 + $0x24] ss:$8 sps:$4 sm:$0xff]  }
 0x2b3   :  { %5301 = vmatprep.subr.bf16.mxu0 %v7042_v56  ;;  %v7082_v56 = vld [vmem:[%s9866_s3 + $0x6c8] ss:$16 sps:$4 sm:$0xff]  }
 0x2b5   :  { %5253 = vmatpush1.bf16.msra.mxu1 %v7037_v37  ;;  %v7087_v37 = vld [vmem:[%s9866_s3 + $0x6ac] ss:$16 sps:$4 sm:$0xff]  }
 0x2b6   :  { %5254 = vmatprep.subr.bf16.mxu1 %v7045_v7  ;;  %5302 = vmatpush2.bf16.msra.mxu0 %v7040_v34  ;;  %v7142_v34 = vld [vmem:[%s9868_s5 + $0x20] ss:$8 sps:$4 sm:$0xff]   ;;  %v7090_v7 = vld [vmem:[%s9866_s3 + $0x68c] ss:$16 sps:$4 sm:$0xff]  }
 0x2b7   :  { %5303 = vmatprep.subr.bf16.mxu0 %v7048_v53  ;;  %v7145_v53 = vld [vmem:[%s9868_s5 + $0x10] ss:$8 sps:$4 sm:$0xff]  }
 0x2b9   :  { %5255 = vmatpush2.bf16.msra.mxu1 %v7043_v30  ;;  %v7150_v30 = vld [vmem:[%s9868_s5 + $0x4] ss:$8 sps:$4 sm:$0xff]  }
 0x2ba   :  { %5256 = vmatprep.subr.bf16.mxu1 %v7051_v45  ;;  %5304 = vmatpush2.bf16.msra.mxu0 %v7046_v33  ;;  %v7088_v33 = vld [vmem:[%s9866_s3 + $0x688] ss:$16 sps:$4 sm:$0xff]   ;;  %v7093_v45 = vld [vmem:[%s9866_s3 + $0x66c] ss:$16 sps:$4 sm:$0xff]  }
 0x2bb   :  { %5305 = vmatprep.subr.bf16.mxu0 %v7054_v36  ;;  %v7148_v36 = vld [vmem:[%s9868_s5] ss:$8 sps:$4 sm:$0xff]  }
 0x2bd   :  { %5257 = vmatpush2.bf16.msra.mxu1 %v7049_v60  ;;  %v7153_v60 = vld [vmem:[%s9868_s5 + $0xf4] ss:$8 sps:$4 sm:$0xff]  }
 0x2be   :  { %5258 = vmatprep.subr.bf16.mxu1 %v7057_v62  ;;  %5306 = vmatpush2.bf16.msra.mxu0 %v7052_v38  ;;  %v7091_v38 = vld [vmem:[%s9866_s3 + $0x668] ss:$16 sps:$4 sm:$0xff]   ;;  %v7096_v62 = vld [vmem:[%s9866_s3 + $0x64c] ss:$16 sps:$4 sm:$0xff]  }
 0x2bf   :  { %5307 = vmatprep.subr.bf16.mxu0 %v7060_v40  ;;  %v7151_v40 = vld [vmem:[%s9868_s5 + $0xf0] ss:$8 sps:$4 sm:$0xff]  }
 0x2c1   :  { %5259 = vmatpush2.bf16.msra.mxu1 %v7055_v42  ;;  %v7156_v42 = vld [vmem:[%s9868_s5 + $0xe4] ss:$8 sps:$4 sm:$0xff]  }
 0x2c2   :  { %5260 = vmatprep.subr.bf16.mxu1 %v7063_v1  ;;  %5308 = vmatpush2.bf16.msra.mxu0 %v7058_v43  ;;  %v7094_v43 = vld [vmem:[%s9866_s3 + $0x648] ss:$16 sps:$4 sm:$0xff]   ;;  %v7099_v1 = vld [vmem:[%s9866_s3 + $0x62c] ss:$16 sps:$4 sm:$0xff]  }
 0x2c3   :  { %5309 = vmatprep.subr.bf16.mxu0 %v7066_v61  ;;  %v7154_v61 = vld [vmem:[%s9868_s5 + $0xe0] ss:$8 sps:$4 sm:$0xff]  }
 0x2c5   :  { %5261 = vmatpush2.bf16.msra.mxu1 %v7061_v14  ;;  %v7159_v14 = vld [vmem:[%s9868_s5 + $0xd4] ss:$8 sps:$4 sm:$0xff]  }
 0x2c6   :  { %5262 = vmatprep.subr.bf16.mxu1 %v7069_v46  ;;  %5310 = vmatpush2.bf16.msra.mxu0 %v7064_v25  ;;  %v7097_v25 = vld [vmem:[%s9866_s3 + $0x628] ss:$16 sps:$4 sm:$0xff]   ;;  %v7102_v46 = vld [vmem:[%s9866_s3 + $0x60c] ss:$16 sps:$4 sm:$0xff]  }
 0x2c7   :  { %5769 = vmatprep.subr.bf16.mxu0 %v7129_v5  ;;  %v7157_v5 = vld [vmem:[%s9868_s5 + $0xd0] ss:$8 sps:$4 sm:$0xff]  }
 0x2c8   :  { %v5067_v57 = vpop.f32.mrf.mxu0 }
 0x2c9   :  { %5263 = vmatpush2.bf16.msra.mxu1 %v7067_v47  ;;  %5312 = vmatmul.mubr.bf16.vlgmr.msra.gmra.mxu0 %v9229_v39  ;;  %v5068_v59 = vadd.f32 %v5067_v57, %v3736_v18  ;;  %v7135_v39 = vld [vmem:[%s9868_s5 + $0x54] ss:$8 sps:$4 sm:$0xff]   ;;  %v7162_v47 = vld [vmem:[%s9868_s5 + $0xc4] ss:$8 sps:$4 sm:$0xff]   ;;  %v7100_v18 = vld [vmem:[%s9866_s3 + $0x608] ss:$16 sps:$4 sm:$0xff]  }
 0x2ca   :  { %v5108_v63 = vpop.f32.mrf.mxu1  ;;  %5264 = vmatprep.subr.bf16.mxu1 %v7072_v48  ;;  %5770 = vmatpush1.bf16.msra.mxu0 %v7127_v49  ;;  %v5069_v9 = vpop.f32.mrf.mxu0  ;;  %v7105_v48 = vld [vmem:[%s9866_s3 + $0x7ec] ss:$16 sps:$4 sm:$0xff]   ;;  %v7160_v49 = vld [vmem:[%s9868_s5 + $0xc0] ss:$8 sps:$4 sm:$0xff]  }
 0x2cb   :  { %5771 = vmatprep.subr.bf16.mxu0 %v7132_v50  ;;  %v9547_v41 = vadd.f32 %v5108_v63, %v5068_v59  ;;  %v5070_v35 = vadd.f32 %v5069_v9, %v3740_v51  ;;  %v7165_v50 = vld [vmem:[%s9868_s5 + $0xb4] ss:$8 sps:$4 sm:$0xff]   ;;  %v7103_v51 = vld [vmem:[%s9866_s3 + $0x7e8] ss:$16 sps:$4 sm:$0xff]   ;;  %v7168_v59 = vld [vmem:[%s9868_s5 + $0xa4] ss:$8 sps:$4 sm:$0xff]  }
 0x2cc   :  { %v5110_v8 = vpop.f32.mrf.mxu1  ;;  %v5071_v0 = vpop.f32.mrf.mxu0  ;;  %v7108_v57 = vld [vmem:[%s9866_s3 + $0x7cc] ss:$16 sps:$4 sm:$0xff]   ;;  %v7106_v63 = vld [vmem:[%s9866_s3 + $0x7c8] ss:$16 sps:$4 sm:$0xff]  }
 0x2cd   :  { %5265 = vmatpush2.bf16.msra.mxu1 %v7070_v23  ;;  %v9552_v11 = vadd.f32 %v5110_v8, %v5070_v35  ;;  %v7163_v23 = vld [vmem:[%s9868_s5 + $0xb0] ss:$8 sps:$4 sm:$0xff]   ;;  %v7171_v9 = vld [vmem:[%s9868_s5 + $0x94] ss:$8 sps:$4 sm:$0xff]   ;;  %v7174_v0 = vld [vmem:[%s9868_s5 + $0x84] ss:$8 sps:$4 sm:$0xff]  }
 0x2ce   :  { %v5112_v12 = vpop.f32.mrf.mxu1  ;;  %5266 = vmatprep.subr.bf16.mxu1 %v7075_v27  ;;  %5772 = vmatpush1.bf16.msra.mxu0 %v7130_v2  ;;  %v5072_v16 = vpop.f32.mrf.mxu0  ;;  %v7111_v27 = vld [vmem:[%s9866_s3 + $0x7ac] ss:$16 sps:$4 sm:$0xff]   ;;  %v7166_v2 = vld [vmem:[%s9868_s5 + $0xa0] ss:$8 sps:$4 sm:$0xff]   ;;  %v7169_v8 = vld [vmem:[%s9868_s5 + $0x90] ss:$8 sps:$4 sm:$0xff]  }
 0x2cf   :  { %5773 = vmatprep.subr.bf16.mxu0 %v7135_v39  ;;  %v7109_v39 = vld [vmem:[%s9866_s3 + $0x7a8] ss:$16 sps:$4 sm:$0xff]   ;;  %v7114_v35 = vld [vmem:[%s9866_s3 + $0x78c] ss:$16 sps:$4 sm:$0xff]  }
 0x2d0   :  { %v5113_v31 = vpop.f32.mrf.mxu1  ;;  %v7117_v12 = vld [vmem:[%s9866_s3 + $0x76c] ss:$16 sps:$4 sm:$0xff]  }
 0x2d1   :  { %5267 = vmatpush2.bf16.msra.mxu1 %v7073_v20  ;;  %v7112_v20 = vld [vmem:[%s9866_s3 + $0x788] ss:$16 sps:$4 sm:$0xff]   ;;  %v7120_v16 = vld [vmem:[%s9866_s3 + $0x74c] ss:$16 sps:$4 sm:$0xff]  }
 0x2d2   :  { %5268 = vmatprep.subr.bf16.mxu1 %v7078_v13  ;;  %5774 = vmatpush1.bf16.msra.mxu0 %v7133_v15  ;;  %v7172_v13 = vld [vmem:[%s9868_s5 + $0x80] ss:$8 sps:$4 sm:$0xff]  }
 0x2d3   :  { %5775 = vmatprep.subr.bf16.mxu0 %v7138_v17  ;;  %v7115_v15 = vld [vmem:[%s9866_s3 + $0x768] ss:$16 sps:$4 sm:$0xff]  }
 0x2d4   :  { %v7118_v31 = vld [vmem:[%s9866_s3 + $0x748] ss:$16 sps:$4 sm:$0xff]  }
 0x2d5   :  { %5269 = vmatpush2.bf16.msra.mxu1 %v7076_v19 }
 0x2d6   :  { %5320 = vmatprep.subr.bf16.mxu1 %v7081_v21  ;;  %5776 = vmatpush1.bf16.msra.mxu0 %v7136_v24  ;;  %v7123_v21 = vld [vmem:[%s9866_s3 + $0x72c] ss:$16 sps:$4 sm:$0xff]  }
 0x2d7   :  { %5777 = vmatprep.subr.bf16.mxu0 %v7141_v55 }
 0x2d8   :  { %5271 = vmatmul.mubr.bf16.vlgmr.msra.gmra.mxu1 %v9025_v4  ;;  %v7147_v4 = vld [vmem:[%s9868_s5 + $0x14] ss:$8 sps:$4 sm:$0xff]  }
 0x2d9   :  { %5321 = vmatpush1.bf16.msra.mxu1 %v7079_v26  ;;  %5352 = vmatprep.mubr.bf16.mxu1 %v9362_v52  ;;  %v7085_v52 = vld [vmem:[%s9866_s3 + $0x6a8] ss:$16 sps:$4 sm:$0xff]  }
 0x2da   :  { %5322 = vmatprep.subr.bf16.mxu1 %v7084_v22  ;;  %5778 = vmatpush1.bf16.msra.mxu0 %v7139_v28  ;;  %v7121_v22 = vld [vmem:[%s9866_s3 + $0x728] ss:$16 sps:$4 sm:$0xff]  }
 0x2db   :  { %5779 = vmatprep.subr.bf16.mxu0 %v7144_v6  ;;  %v7124_v6 = vld [vmem:[%s9866_s3 + $0x708] ss:$16 sps:$4 sm:$0xff]  }
 0x2dd   :  { %5323 = vmatpush1.bf16.msra.mxu1 %v7082_v56  ;;  %v7177_v56 = vld [vmem:[%s9868_s5 + $0x174] ss:$8 sps:$4 sm:$0xff]  }
 0x2de   :  { %5324 = vmatprep.subr.bf16.mxu1 %v7087_v37  ;;  %5780 = vmatpush1.bf16.msra.mxu0 %v7142_v34  ;;  %v7180_v37 = vld [vmem:[%s9868_s5 + $0x164] ss:$8 sps:$4 sm:$0xff]   ;;  %v7178_v34 = vld [vmem:[%s9868_s5 + $0x160] ss:$8 sps:$4 sm:$0xff]  }
 0x2df   :  { %5781 = vmatprep.subr.bf16.mxu0 %v7147_v4  ;;  %v7181_v4 = vld [vmem:[%s9868_s5 + $0x150] ss:$8 sps:$4 sm:$0xff]  }
 0x2e1   :  { %5325 = vmatpush1.bf16.msra.mxu1 %v7085_v52  ;;  %v7186_v52 = vld [vmem:[%s9868_s5 + $0x144] ss:$8 sps:$4 sm:$0xff]  }
 0x2e2   :  { %5326 = vmatprep.subr.bf16.mxu1 %v7090_v7  ;;  %5782 = vmatpush1.bf16.msra.mxu0 %v7145_v53  ;;  %v7184_v7 = vld [vmem:[%s9868_s5 + $0x140] ss:$8 sps:$4 sm:$0xff]   ;;  %v7189_v53 = vld [vmem:[%s9868_s5 + $0x134] ss:$8 sps:$4 sm:$0xff]  }
 0x2e3   :  { %5783 = vmatprep.subr.bf16.mxu0 %v7150_v30  ;;  %v7187_v30 = vld [vmem:[%s9868_s5 + $0x130] ss:$8 sps:$4 sm:$0xff]  }
 0x2e5   :  { %5327 = vmatpush1.bf16.msra.mxu1 %v7088_v33  ;;  %v7192_v33 = vld [vmem:[%s9868_s5 + $0x124] ss:$8 sps:$4 sm:$0xff]  }
 0x2e6   :  { %5328 = vmatprep.subr.bf16.mxu1 %v7093_v45  ;;  %5784 = vmatpush1.bf16.msra.mxu0 %v7148_v36  ;;  %v7190_v45 = vld [vmem:[%s9868_s5 + $0x120] ss:$8 sps:$4 sm:$0xff]   ;;  %v7195_v36 = vld [vmem:[%s9868_s5 + $0x114] ss:$8 sps:$4 sm:$0xff]  }
 0x2e7   :  { %5785 = vmatprep.subr.bf16.mxu0 %v7153_v60  ;;  %v7193_v60 = vld [vmem:[%s9868_s5 + $0x110] ss:$8 sps:$4 sm:$0xff]  }
 0x2e9   :  { %5329 = vmatpush1.bf16.msra.mxu1 %v7091_v38  ;;  %v7198_v38 = vld [vmem:[%s9868_s5 + $0x104] ss:$8 sps:$4 sm:$0xff]  }
 0x2ea   :  { %5330 = vmatprep.subr.bf16.mxu1 %v7096_v62  ;;  %5786 = vmatpush2.bf16.msra.mxu0 %v7151_v40  ;;  %v7196_v62 = vld [vmem:[%s9868_s5 + $0x100] ss:$8 sps:$4 sm:$0xff]   ;;  %v7201_v40 = vld [vmem:[%s9868_s5 + $0x1f4] ss:$8 sps:$4 sm:$0xff]  }
 0x2eb   :  { %5787 = vmatprep.subr.bf16.mxu0 %v7156_v42  ;;  %v7199_v42 = vld [vmem:[%s9868_s5 + $0x1f0] ss:$8 sps:$4 sm:$0xff]  }
 0x2ed   :  { %5331 = vmatpush1.bf16.msra.mxu1 %v7094_v43  ;;  %v7204_v43 = vld [vmem:[%s9868_s5 + $0x1e4] ss:$8 sps:$4 sm:$0xff]  }
 0x2ee   :  { %5332 = vmatprep.subr.bf16.mxu1 %v7099_v1  ;;  %5788 = vmatpush2.bf16.msra.mxu0 %v7154_v61  ;;  %v7202_v1 = vld [vmem:[%s9868_s5 + $0x1e0] ss:$8 sps:$4 sm:$0xff]   ;;  %v7207_v61 = vld [vmem:[%s9868_s5 + $0x1d4] ss:$8 sps:$4 sm:$0xff]  }
 0x2ef   :  { %5789 = vmatprep.subr.bf16.mxu0 %v7159_v14  ;;  %v7205_v14 = vld [vmem:[%s9868_s5 + $0x1d0] ss:$8 sps:$4 sm:$0xff]  }
 0x2f1   :  { %5333 = vmatpush1.bf16.msra.mxu1 %v7097_v25  ;;  %v7210_v25 = vld [vmem:[%s9868_s5 + $0x1c4] ss:$8 sps:$4 sm:$0xff]  }
 0x2f2   :  { %5334 = vmatprep.subr.bf16.mxu1 %v7102_v46  ;;  %5790 = vmatpush2.bf16.msra.mxu0 %v7157_v5  ;;  %v7208_v5 = vld [vmem:[%s9868_s5 + $0x1c0] ss:$8 sps:$4 sm:$0xff]  }
 0x2f3   :  { %5791 = vmatprep.subr.bf16.mxu0 %v7162_v47  ;;  %v7213_v47 = vld [vmem:[%s9868_s5 + $0x1b4] ss:$8 sps:$4 sm:$0xff]  }
 0x2f5   :  { %5335 = vmatpush1.bf16.msra.mxu1 %v7100_v18 }
 0x2f6   :  { %5336 = vmatprep.subr.bf16.mxu1 %v7105_v48  ;;  %5792 = vmatpush2.bf16.msra.mxu0 %v7160_v49  ;;  %v7211_v49 = vld [vmem:[%s9868_s5 + $0x1b0] ss:$8 sps:$4 sm:$0xff]  }
 0x2f7   :  { %5793 = vmatprep.subr.bf16.mxu0 %v7165_v50 }
 0x2f9   :  { %5337 = vmatpush2.bf16.msra.mxu1 %v7103_v51  ;;  %v7216_v51 = vld [vmem:[%s9868_s5 + $0x1a4] ss:$8 sps:$4 sm:$0xff]  }
 0x2fa   :  { %5338 = vmatprep.subr.bf16.mxu1 %v7108_v57  ;;  %5794 = vmatpush2.bf16.msra.mxu0 %v7163_v23  ;;  %v7214_v57 = vld [vmem:[%s9868_s5 + $0x1a0] ss:$8 sps:$4 sm:$0xff]  }
 0x2fb   :  { %5795 = vmatprep.subr.bf16.mxu0 %v7168_v59 }
 0x2fd   :  { %5339 = vmatpush2.bf16.msra.mxu1 %v7106_v63 }
 0x2fe   :  { %5340 = vmatprep.subr.bf16.mxu1 %v7111_v27  ;;  %5796 = vmatpush2.bf16.msra.mxu0 %v7166_v2  ;;  %v7219_v27 = vld [vmem:[%s9868_s5 + $0x194] ss:$8 sps:$4 sm:$0xff]  }
 0x2ff   :  { %5797 = vmatprep.subr.bf16.mxu0 %v7171_v9 }
 0x301   :  { %5341 = vmatpush2.bf16.msra.mxu1 %v7109_v39  ;;  %v7217_v39 = vld [vmem:[%s9868_s5 + $0x190] ss:$8 sps:$4 sm:$0xff]  }
 0x302   :  { %5342 = vmatprep.subr.bf16.mxu1 %v7114_v35  ;;  %5798 = vmatpush2.bf16.msra.mxu0 %v7169_v8 }
 0x303   :  { %5799 = vmatprep.subr.bf16.mxu0 %v7174_v0 }
 0x305   :  { %5343 = vmatpush2.bf16.msra.mxu1 %v7112_v20 }
 0x306   :  { %5344 = vmatprep.subr.bf16.mxu1 %v7117_v12  ;;  %5800 = vmatpush2.bf16.msra.mxu0 %v7172_v13  ;;  %v7222_v12 = vld [vmem:[%s9868_s5 + $0x184] ss:$8 sps:$4 sm:$0xff]  }
 0x308   :  { %v5149_v17 = vpop.f32.mrf.mxu0 }
 0x309   :  { %5345 = vmatpush2.bf16.msra.mxu1 %v7115_v15  ;;  %v9728_v19 = vadd.f32 %v5149_v17, %v9547_v41  ;;  %v7126_v41 = vld [vmem:[%s9866_s3 + $0x70c] ss:$16 sps:$4 sm:$0xff]   ;;  %v7220_v15 = vld [vmem:[%s9868_s5 + $0x180] ss:$8 sps:$4 sm:$0xff]  }
 0x30a   :  { %5346 = vmatprep.subr.bf16.mxu1 %v7120_v16  ;;  %v5151_v24 = vpop.f32.mrf.mxu0 }
 0x30b   :  { %v9734_v55 = vadd.f32 %v5151_v24, %v9552_v11  ;;  %v7175_v11 = vld [vmem:[%s9868_s5 + $0x170] ss:$8 sps:$4 sm:$0xff]  }
 0x30c   :  { %v5153_v26 = vpop.f32.mrf.mxu0 }
 0x30d   :  { %5347 = vmatpush2.bf16.msra.mxu1 %v7118_v31  ;;  %v3748_v26 = vrot.slane %v9513_v32, %v504_v29 }
 0x30e   :  { %5348 = vmatprep.subr.bf16.mxu1 %v7123_v21  ;;  %v5154_v28 = vpop.f32.mrf.mxu0 }
 0x311   :  { %5349 = vmatpush2.bf16.msra.mxu1 %v7121_v22 }
 0x312   :  { %5350 = vmatprep.subr.bf16.mxu1 %v7126_v41 }
 0x315   :  { %5351 = vmatpush2.bf16.msra.mxu1 %v7124_v6 }
 0x316   :  { %5810 = vmatprep.subr.bf16.mxu1 %v7177_v56 }
 0x318   :  { %5353 = vmatmul.mubr.bf16.vlgmr.msra.gmra.mxu1 %v9367_v58  ;;  %v7183_v58 = vld [vmem:[%s9868_s5 + $0x154] ss:$8 sps:$4 sm:$0xff]  }
 0x319   :  { %5811 = vmatpush1.bf16.msra.mxu1 %v7175_v11 }
 0x31a   :  { %5812 = vmatprep.subr.bf16.mxu1 %v7180_v37 }
 0x31d   :  { %5813 = vmatpush1.bf16.msra.mxu1 %v7178_v34 }
 0x31e   :  { %5814 = vmatprep.subr.bf16.mxu1 %v7183_v58 }
 0x321   :  { %5815 = vmatpush1.bf16.msra.mxu1 %v7181_v4 }
 0x322   :  { %5816 = vmatprep.subr.bf16.mxu1 %v7186_v52 }
 0x325   :  { %5817 = vmatpush1.bf16.msra.mxu1 %v7184_v7 }
 0x326   :  { %5818 = vmatprep.subr.bf16.mxu1 %v7189_v53 }
 0x329   :  { %5819 = vmatpush1.bf16.msra.mxu1 %v7187_v30 }
 0x32a   :  { %5820 = vmatprep.subr.bf16.mxu1 %v7192_v33 }
 0x32d   :  { %5821 = vmatpush1.bf16.msra.mxu1 %v7190_v45 }
 0x32e   :  { %5822 = vmatprep.subr.bf16.mxu1 %v7195_v36 }
 0x331   :  { %5823 = vmatpush1.bf16.msra.mxu1 %v7193_v60 }
 0x332   :  { %5824 = vmatprep.subr.bf16.mxu1 %v7198_v38 }
 0x335   :  { %5825 = vmatpush1.bf16.msra.mxu1 %v7196_v62 }
 0x336   :  { %5826 = vmatprep.subr.bf16.mxu1 %v7201_v40 }
 0x339   :  { %5827 = vmatpush2.bf16.msra.mxu1 %v7199_v42 }
 0x33a   :  { %5828 = vmatprep.subr.bf16.mxu1 %v7204_v43 }
 0x33d   :  { %5829 = vmatpush2.bf16.msra.mxu1 %v7202_v1  ;;  %v7253_v1 = vmov 1966171168  }
 0x33e   :  { %5830 = vmatprep.subr.bf16.mxu1 %v7207_v61  ;;  %v5878_v61 = vunpack.c.l.s4 %v7253_v1 }
 0x341   :  { %5831 = vmatpush2.bf16.msra.mxu1 %v7205_v14  ;;  %v6730_v14 = vld.sshfl [vmem:[%s9870_s7] sm:$0x11 pattern:$0x75316420] }
 0x342   :  { %5832 = vmatprep.subr.bf16.mxu1 %v7210_v25  ;;  %v5879_v25 = vunpack.c.0.s8 %v5878_v61 }
 0x345   :  { %5833 = vmatpush2.bf16.msra.mxu1 %v7208_v5  ;;  %v5882_v5 = vsub.s32 %v5879_v25, %v8141_v54 }
 0x346   :  { %5834 = vmatprep.subr.bf16.mxu1 %v7213_v47 }
 0x348   :  { %v5231_v46 = vpop.f32.mrf.mxu0 }
 0x349   :  { %5835 = vmatpush2.bf16.msra.mxu1 %v7211_v49  ;;  %v5437_v49 = vld [vmem:[%s9869_s6] sm:$0x3]  ;;  %s7254_s6 = smov [#allocation3]  }
 0x34a   :  { %v5233_v18 = vpop.f32.mrf.mxu0  ;;  %5836 = vmatprep.subr.bf16.mxu1 %v7216_v51  ;;  %v5446_v51 = vrot.slane %v5437_v49, %v8164_v10  ;;  %s5947_s7 = sshll.u32 %s7254_s6, 4  ;;  %s5948_s7 = int_to_ptr.vmem [resolvable:$true] %s5947_s7 }
 0x34b   :  { %v5234_v28 = vadd.f32 %v5233_v18, %v3748_v26  ;;  %v5883_v18 = vrot.slane %v6730_v14, %v5882_v5  ;;  %s7230_s26 = scalar_lea.vmem %s5948_s7, 16  ;;  %s7234_s27 = scalar_lea.vmem %s5948_s7, 32 }
 0x34c   :  { %v5235_v48 = vpop.f32.mrf.mxu0  ;;  %p7231_p0 = scmp.ne.s32.totalorder %s5948_s7, %s7230_s26  ;;  %p7235_p1 = scmp.lt.s32.totalorder %s5948_s7, %s5948_s7 }
 0x34d   :  { %5837 = vmatpush2.bf16.msra.mxu1 %v7214_v57  ;;  %v5858_v48 = vld [vmem:[#allocation2] sm:$0x1]  ;;  %p7236_p2 = scmp.lt.s32.totalorder %s7234_s27, %s7230_s26 }
 0x34e   :  { %v5236_v50 = vpop.f32.mrf.mxu0  ;;  %5838 = vmatprep.subr.bf16.mxu1 %v7219_v27  ;;  %5861 = vperm.xlu0 %6735, %v5858_v48  }
 0x34f   :  { %v5442_v50 = vrot.slane %v5437_v49, %v8156_v3  ;;  %p7237_p3 = por %p7236_p2, %p7235_p1 }
 0x351   :  { %5839 = vmatpush2.bf16.msra.mxu1 %v7217_v39  ;;  %p7238_p4 = pnand %p7237_p3, %p7231_p0 }
 0x352   :  { %5840 = vmatprep.subr.bf16.mxu1 %v7222_v12 }
 0x355   :  { %5841 = vmatpush2.bf16.msra.mxu1 %v7220_v15 }
 0x358   :  { %v5190_v23 = vpop.f32.mrf.mxu1 }
 0x359   :  { %v5191_v59 = vadd.f32 %v5190_v23, %v9728_v19 }
 0x35a   :  { %v5192_v63 = vpop.f32.mrf.mxu1 }
 0x35b   :  { %v5361_v2 = vmul.f32 0.01, %v5191_v59  ;;  %v5193_v9 = vadd.f32 %v5192_v63, %v9734_v55  ;;  %v3744_v55 = vrot.slane %v9513_v32, %v500_v44 }
 0x35c   :  { %v5194_v35 = vpop.f32.mrf.mxu1 }
 0x35d   :  { %v5362_v8 = vmul.f32 0.01, %v5193_v9  ;;  %v5365_v0 = vmax.f32 %v5191_v59, %v5361_v2  ;;  %v5232_v22 = vadd.f32 %v5231_v46, %v3744_v55  ;;  %v5876_v46 = vcombine.high %v6730_v14, %v6730_v14 }
 0x35e   :  { %v5195_v20 = vpop.f32.mrf.mxu1 }
 0x35f   :  { %v5366_v13 = vmax.f32 %v5193_v9, %v5362_v8  ;;  %v5369_v17 = vpack.c.bf16 %v5365_v0, %v5365_v0  ;;  %v5890_v47 = vrot.slane %v5876_v46, %v5882_v5 }
 0x361   :  { %v5370_v16 = vpack.c.bf16 %v5366_v13, %v5366_v13 }
 0x363   :  { %5801 = vmatprep.mubr.bf16.mxu0 %v5370_v16 }
 0x364   :  { %5802 = vmatmul.mubr.bf16.vlgmr.msra.gmra.mxu0 %v5369_v17 }
 0x365   :  { %5925 = vmatprep.mubr.bf16.mxu0 %v5890_v47 }
 0x389   :  { %v5313_v31 = vpop.f32.mrf.mxu0 }
 0x38b   :  { %v5315_v19 = vpop.f32.mrf.mxu0 }
 0x38d   :  { %v5317_v21 = vpop.f32.mrf.mxu0 }
 0x38f   :  { %v5318_v24 = vpop.f32.mrf.mxu0 }
 0x398   :  { %v5272_v41 = vpop.f32.mrf.mxu1 }
 0x399   :  { %v5273_v6 = vadd.f32 %v5272_v41, %v5232_v22 }
 0x39a   :  { %v5274_v11 = vpop.f32.mrf.mxu1 }
 0x39b   :  { %v5275_v56 = vadd.f32 %v5274_v11, %v5234_v28  ;;  %v5314_v37 = vadd.f32 %v5313_v31, %v5273_v6 }
 0x39c   :  { %v5276_v34 = vpop.f32.mrf.mxu1 }
 0x39d   :  { %v5316_v58 = vadd.f32 %v5315_v19, %v5275_v56 }
 0x39e   :  { %v5277_v4 = vpop.f32.mrf.mxu1 }
 0x3c9   :  { %v5862_v13 = vpop.permute.xlu0 %5861 }
 0x3ca   :  { %v5867_v10 = vrot.slane %v5862_v13, %v8156_v3 }
 0x3d8   :  { %v5354_v52 = vpop.f32.mrf.mxu1 }
 0x3d9   :  { %v5355_v7 = vadd.f32 %v5354_v52, %v5314_v37 }
 0x3da   :  { %v5356_v53 = vpop.f32.mrf.mxu1 }
 0x3db   :  { %v5363_v30 = vmul.f32 0.01, %v5355_v7  ;;  %v5357_v33 = vadd.f32 %v5356_v53, %v5316_v58 }
 0x3dc   :  { %v5358_v44 = vpop.f32.mrf.mxu1 }
 0x3dd   :  { %v5364_v45 = vmul.f32 0.01, %v5357_v33  ;;  %v5367_v36 = vmax.f32 %v5355_v7, %v5363_v30 }
 0x3de   :  { %v5359_v60 = vpop.f32.mrf.mxu1 }
 0x3df   :  { %v5368_v29 = vmax.f32 %v5357_v33, %v5364_v45  ;;  %v5371_v38 = vpack.c.bf16 %v5367_v36, %v5367_v36 }
 0x3e1   :  { %v5372_v32 = vpack.c.bf16 %v5368_v29, %v5368_v29 }
 0x3e3   :  { %5842 = vmatprep.mubr.bf16.mxu1 %v5372_v32 }
 0x3e4   :  { %5843 = vmatmul.mubr.bf16.vlgmr.msra.gmra.mxu1 %v5371_v38 }
 0x424   :  { %v5803_v62 = vpop.f32.mrf.mxu0 }
 0x425   :  { %v5804_v57 = vadd.f32 %v5803_v62, %v5442_v50 }
 0x426   :  { %v5805_v40 = vpop.f32.mrf.mxu0 }
 0x427   :  { %v5806_v59 = vadd.f32 %v5805_v40, %v5446_v51 }
 0x428   :  { %v5807_v42 = vpop.f32.mrf.mxu0 }
 0x42a   :  { %v5808_v43 = vpop.f32.mrf.mxu0 }
 0x4a4   :  { %v5844_v23 = vpop.f32.mrf.mxu1 }
 0x4a5   :  { %v5845_v63 = vadd.f32 %v5844_v23, %v5804_v57 }
 0x4a6   :  { %v5846_v27 = vpop.f32.mrf.mxu1 }
 0x4a7   :  { %v5851_v2 = vmul.f32 0.01, %v5845_v63  ;;  %v5847_v54 = vadd.f32 %v5846_v27, %v5806_v59 }
 0x4a8   :  { %v5848_v9 = vpop.f32.mrf.mxu1 }
 0x4a9   :  { %v5852_v39 = vmul.f32 0.01, %v5847_v54  ;;  %v5853_v35 = vmax.f32 %v5845_v63, %v5851_v2 }
 0x4aa   :  { %v5849_v8 = vpop.f32.mrf.mxu1 }
 0x4ab   :  { %v5854_v0 = vmax.f32 %v5847_v54, %v5852_v39  ;;  %v5855_v12 = vpack.c.bf16 %v5853_v35, %v5853_v35 }
 0x4ad   :  { %v5856_v20 = vpack.c.bf16 %v5854_v0, %v5854_v0 }
 0x4af   :  { %5907 = vmatprep.subr.bf16.mxu0 %v5856_v20 }
 0x4b0   :  { %5908 = vmatpush1.bf16.xpose.msra.mxu0 %v5855_v12 }
 0x4b7   :  { %5926 = vmatmul.mubr.bf16.vlgmr.msra.gmra.mxu0 %v5883_v18 }
 0x577   :  { %v5927_v15 = vpop.f32.mrf.mxu0 }
 0x578   :  { %v5928_v16 = vadd.f32 %v5927_v15, %v5867_v10 }
 0x579   :  { %v5929_v17 = vpop.f32.mrf.mxu0 }
 0x57a   :  { %v6731_v31 = vmul.f32 -1.442695, %v5928_v16 }
 0x57b   :  { %v5930_v19 = vpop.f32.mrf.mxu0 }
 0x57c   :  { %7223 = vpow2.f32 %v6731_v31 }
 0x57d   :  { %v5931_v21 = vpop.f32.mrf.mxu0 }
 0x589   :  { %v7224_v24 = vpop.eup %7223 }
 0x58a   :  { %v5936_v55 = vadd.f32 1.0, %v7224_v24 }
 0x58c   :  { %7225 = vrcp.f32 %v5936_v55 }
 0x599   :  { %v7226_v26 = vpop.eup %7225 }
 0x59a   :  { %5940 = vst.msk [vmem:[#allocation3] sm:$0x1] %vm5939_vm0, %v7226_v26 }
 0x59b   :  { %7241 = shalt.err (!%p7238_p4)
}
 0x59c   :  { %5950 = dma.vmem_to_hbm [thread:$0]  %s5948_s7, 16, %s9872_s9, [#allocation4]  }
 0x59d   :  { %7250 = dma.done.wait [#allocation4], 16  }
 0x59e   :  { %7251 = vsyncadd [#allocation4], 4294967280 }
 0x59f   :  { %5954 = vsyncpa [#allocation4], 1 }

</bundles_post_ra>
